<compile_context>
chip_gen: v7x
topology: tpu7x:2x2x1
jax: 0.10.0
libtpu: 0.0.40
codegen_flags: <defaults>
</compile_context>

<pallas_src>
import functools

import jax
import jax.numpy as jnp
from jax.experimental import pallas as pl
from jax.experimental.pallas import tpu as pltpu


# ----------------------------------------------------------------------------
# small helpers
# ----------------------------------------------------------------------------
def _round_up(x, m):
    return ((x + m - 1) // m) * m


def _pad_axis(x, target, axis):
    pad = target - x.shape[axis]
    if pad == 0:
        return x
    widths = [(0, 0)] * x.ndim
    widths[axis] = (0, pad)
    return jnp.pad(x, widths)


def _apply_act(y, act):
    if act is None:
        return y
    if act == "relu":
        return jnp.maximum(y, 0.0)
    if act == "leaky_relu":
        return jnp.where(y >= 0.0, y, 0.2 * y)
    if act == "tanh":
        return jnp.tanh(y)
    raise ValueError(f"unknown activation: {act}")


# ----------------------------------------------------------------------------
# Pallas tiled (phase-batched) matmul kernel -- the MXU hot path
# ----------------------------------------------------------------------------
def _mm_kernel_multi_k(a_ref, b_ref, o_ref, acc_ref, *, act):
    @pl.when(pl.program_id(3) == 0)
    def _():
        acc_ref[...] = jnp.zeros_like(acc_ref)

    acc_ref[...] += jnp.dot(a_ref[...], b_ref[...],
                            preferred_element_type=jnp.float32)

    @pl.when(pl.program_id(3) == pl.num_programs(3) - 1)
    def _():
        o_ref[...] = _apply_act(acc_ref[...], act).astype(o_ref.dtype)


def _mm_kernel_single_k(a_ref, b_ref, o_ref, *, act):
    # K fits in one tile: no accumulator scratch, write directly (fused act).
    y = jnp.dot(a_ref[...], b_ref[...], preferred_element_type=jnp.float32)
    o_ref[...] = _apply_act(y, act).astype(o_ref.dtype)


def pallas_matmul(a, b, *, act=None, out_dtype=jnp.float32,
                  tm=512, tn=256, tk=512):
    """Batched tiled matmul: a (P, M, K) @ b (P, K, N) -> (P, M, N).

    Operands are cast to bfloat16 (f32 accumulation on the MXU).  `act`
    (None / 'relu' / 'leaky_relu' / 'tanh') is fused into the store epilogue.
    Tile sizes adapt to the problem so tiny layers are not over-padded.
    """
    P, M, K = a.shape
    P2, K2, N = b.shape
    assert P == P2 and K == K2

    a = a.astype(jnp.bfloat16)
    b = b.astype(jnp.bfloat16)

    tm = min(tm, _round_up(M, 8))
    tn = min(tn, _round_up(N, 128))
    tk = min(tk, _round_up(K, 128))

    Mp, Kp, Np = _round_up(M, tm), _round_up(K, tk), _round_up(N, tn)
    a_p = _pad_axis(_pad_axis(a, Mp, 1), Kp, 2)
    b_p = _pad_axis(_pad_axis(b, Kp, 1), Np, 2)

    nk = Kp // tk
    grid = (P, Mp // tm, Np // tn, nk)

    # Leading phase dim is squeezed (block size None) -> kernel sees 2D tiles.
    a_spec = pl.BlockSpec((None, tm, tk), lambda p, i, j, k: (p, i, k))
    b_spec = pl.BlockSpec((None, tk, tn), lambda p, i, j, k: (p, k, j))
    o_spec = pl.BlockSpec((None, tm, tn), lambda p, i, j, k: (p, i, j))

    out_bytes = P * Mp * Np * jnp.dtype(out_dtype).itemsize
    cost = pl.CostEstimate(
        flops=2 * P * Mp * Np * Kp,
        transcendentals=(P * Mp * Np) if act == "tanh" else 0,
        bytes_accessed=int(a_p.size * 2 + b_p.size * 2 + out_bytes))

    if nk == 1:
        kernel = functools.partial(_mm_kernel_single_k, act=act)
        scratch = []
    else:
        kernel = functools.partial(_mm_kernel_multi_k, act=act)
        scratch = [pltpu.VMEM((tm, tn), jnp.float32)]

    out = pl.pallas_call(
        kernel,
        out_shape=jax.ShapeDtypeStruct((P, Mp, Np), out_dtype),
        grid_spec=pltpu.PrefetchScalarGridSpec(
            num_scalar_prefetch=0,
            grid=grid,
            in_specs=[a_spec, b_spec],
            out_specs=o_spec,
            scratch_shapes=scratch),
        compiler_params=pltpu.CompilerParams(
            dimension_semantics=("parallel", "parallel", "parallel",
                                 "arbitrary")),
        cost_estimate=cost,
    )(a_p, b_p)
    return out[:, :M, :N]


# ----------------------------------------------------------------------------
# Pallas elementwise kernel: y = act(x * scale + shift), per-channel scale/shift
# (BN apply + activation; math stays in f32 per v5e guidance, output may be bf16)
# ----------------------------------------------------------------------------
def _affine_act_kernel(x_ref, scale_ref, shift_ref, o_ref, *, act):
    y = x_ref[...].astype(jnp.float32) * scale_ref[...] + shift_ref[...]
    o_ref[...] = _apply_act(y, act).astype(o_ref.dtype)


def pallas_affine_act(x2d, scale, shift, act, *, out_dtype=jnp.float32, tm=512):
    """x2d: (M, C) channel-last; scale/shift: (C,) broadcast over rows."""
    M, C = x2d.shape
    tm = min(tm, _round_up(M, 8))
    Mp, Cp = _round_up(M, tm), _round_up(C, 128)
    x_p = _pad_axis(_pad_axis(x2d, Mp, 0), Cp, 1)
    scale_p = _pad_axis(scale.reshape(1, C).astype(jnp.float32), Cp, 1)
    shift_p = _pad_axis(shift.reshape(1, C).astype(jnp.float32), Cp, 1)

    cost = pl.CostEstimate(
        flops=2 * Mp * Cp,
        transcendentals=0,
        bytes_accessed=int(x_p.size * x_p.dtype.itemsize
                           + Mp * Cp * jnp.dtype(out_dtype).itemsize))

    out = pl.pallas_call(
        functools.partial(_affine_act_kernel, act=act),
        out_shape=jax.ShapeDtypeStruct((Mp, Cp), out_dtype),
        grid_spec=pltpu.PrefetchScalarGridSpec(
            num_scalar_prefetch=0,
            grid=(Mp // tm,),
            in_specs=[pl.BlockSpec((tm, Cp), lambda i: (i, 0)),
                      pl.BlockSpec((1, Cp), lambda i: (0, 0)),
                      pl.BlockSpec((1, Cp), lambda i: (0, 0))],
            out_specs=pl.BlockSpec((tm, Cp), lambda i: (i, 0))),
        compiler_params=pltpu.CompilerParams(
            dimension_semantics=("parallel",)),
        cost_estimate=cost,
    )(x_p, scale_p, shift_p)
    return out[:M, :C]


# ----------------------------------------------------------------------------
# Layer building blocks
# ----------------------------------------------------------------------------
def batchnorm_act(x2d, gamma, beta, act, *, out_dtype=jnp.float32, eps=1e-5):
    """Training-mode batch norm over axis 0 (+ activation).

    Stats (tiny per-channel reductions) are plain-JAX glue; the full-tensor
    normalize + activation pass is the Pallas kernel above.
    """
    x32 = x2d.astype(jnp.float32)
    mean = jnp.mean(x32, axis=0)
    var = jnp.var(x32, axis=0)          # biased variance, as PyTorch normalizes
    invstd = jax.lax.rsqrt(var + eps)
    scale = gamma * invstd
    shift = beta - mean * scale
    return pallas_affine_act(x2d, scale, shift, act, out_dtype=out_dtype)


def conv_transpose1x1_in(x, w):
    """ConvTranspose2d(k=4, stride=1, pad=0, bias=False) on a 1x1 input.

    x: (N, Cin);  w: PyTorch (Cin, Cout, 4, 4)  ->  (N, 4, 4, Cout) NHWC.
    out[n, kh, kw, co] = sum_ci x[n, ci] * w[ci, co, kh, kw]  (pure matmul).
    """
    n, cin = x.shape
    _, cout, kh, kw = w.shape
    b = w.transpose(0, 2, 3, 1).reshape(cin, kh * kw * cout)
    y = pallas_matmul(x[None], b[None])[0]          # (N, 16*Cout) f32
    return y.reshape(n, kh, kw, cout)


def conv_transpose_s2(x, w, *, act=None, out_dtype=jnp.float32):
    """ConvTranspose2d(k=4, stride=2, pad=1, bias=False) via 4-phase sub-pixel
    decomposition (no zero-stuffed upsample, only 2x2 taps per phase).

    x: (N, H, W, Cin) NHWC;  w: PyTorch (Cin, Cout, 4, 4)  ->  (N, 2H, 2W, Cout).
    Phase (p, q) produces output pixels (2j+p, 2i+q):
      out[2j+p, 2i+q] = sum_{di,dj in {0,1}} xp[j+p+di, i+q+dj] . w[:, :, 3-p-2di, 3-q-2dj]
    where xp is x padded by 1 pixel on every spatial side.
    """
    N, H, W, Cin = x.shape
    Cin2, Cout, kh, kw = w.shape
    assert Cin == Cin2 and kh == 4 and kw == 4

    xp = jnp.pad(x, ((0, 0), (1, 1), (1, 1), (0, 0)))

    # TODO(synk): the 4-tap gather below is still materialized by XLA glue; an
    # in-kernel tap gather via a tap grid axis would remove that copy entirely.
    a_list, b_list = [], []
    for p in range(2):
        for q in range(2):
            taps, wtaps = [], []
            for di in range(2):
                for dj in range(2):
                    taps.append(xp[:, p + di: p + di + H, q + dj: q + dj + W, :])
                    wtaps.append(w[:, :, 3 - p - 2 * di, 3 - q - 2 * dj])
            a_list.append(jnp.concatenate(taps, axis=-1)
                          .reshape(N * H * W, 4 * Cin))
            b_list.append(jnp.concatenate(wtaps, axis=0))      # (4*Cin, Cout)

    a = jnp.stack(a_list, axis=0)           # (4, N*H*W, 4*Cin)
    b = jnp.stack(b_list, axis=0)           # (4, 4*Cin, Cout)

    out = pallas_matmul(a, b, act=act, out_dtype=out_dtype)    # (4, N*H*W, Cout)

    # interleave the 4 phases back into the full-resolution image
    out = out.reshape(2, 2, N, H, W, Cout)      # (p, q, N, j, i, C)
    out = out.transpose(2, 3, 0, 4, 1, 5)       # (N, j, p, i, q, C)
    return out.reshape(N, 2 * H, 2 * W, Cout)


# ----------------------------------------------------------------------------
# Generator forward
# ----------------------------------------------------------------------------
def generator_forward(params, embd, z):
    n = embd.shape[0]

    # --- projected_dim: Linear + BatchNorm1d + LeakyReLU(0.2) ---
    # (bias folded into the matmul via an appended ones-column)
    a = jnp.concatenate([embd, jnp.ones((n, 1), embd.dtype)], axis=1)
    b = jnp.concatenate([params["fc_w"].T, params["fc_b"][None, :]], axis=0)
    h = pallas_matmul(a[None], b[None])[0]                       # (N, proj) f32
    h = batchnorm_act(h, params["bn0_g"], params["bn0_b"],
                      act="leaky_relu", out_dtype=jnp.bfloat16)

    # --- concat(proj, z) -> (N, proj+z, 1, 1)  (kept as (N, C) for layer 1) ---
    x0 = jnp.concatenate([h, z.astype(jnp.bfloat16)], axis=1)

    # --- layer 1: ConvTranspose2d(C0, c*8, 4, 1, 0) on 1x1 input + BN + ReLU ---
    y = conv_transpose1x1_in(x0, params["deconv_w"][0])          # (N, 4, 4, C1)
    C1 = y.shape[-1]
    y2 = batchnorm_act(y.reshape(n * 16, C1),
                       params["bn_g"][0], params["bn_b"][0],
                       act="relu", out_dtype=jnp.bfloat16)
    x = y2.reshape(n, 4, 4, C1)

    # --- layers 2..4: ConvTranspose2d(4, 2, 1) + BN + ReLU ---
    for li in range(1, 4):
        y = conv_transpose_s2(x, params["deconv_w"][li])         # f32 NHWC
        N_, H_, W_, C_ = y.shape
        y2 = batchnorm_act(y.reshape(N_ * H_ * W_, C_),
                           params["bn_g"][li], params["bn_b"][li],
                           act="relu", out_dtype=jnp.bfloat16)
        x = y2.reshape(N_, H_, W_, C_)

    # --- layer 5: ConvTranspose2d(4, 2, 1) + Tanh (fused into matmul epilogue) ---
    y = conv_transpose_s2(x, params["deconv_w"][4],
                          act="tanh", out_dtype=jnp.float32)     # (N, 64, 64, 3)

    # return NCHW to match the PyTorch module
    return jnp.transpose(y, (0, 3, 1, 2))


# ----------------------------------------------------------------------------
# Deterministic parameter init (synthetic; shapes follow Generator.__init__)
# ----------------------------------------------------------------------------
def init_params(key, embd_dim, proj_dim, z_dim, c_dim):
    keys = jax.random.split(key, 32)      # >= 17 keys needed (4 + 5 + 2*4)
    ki = iter(keys)

    def nrm(shape, s=0.02):
        return (s * jax.random.normal(next(ki), shape)).astype(jnp.float32)

    chans = [proj_dim + z_dim, c_dim * 8, c_dim * 4, c_dim * 2, c_dim, 3]

    params = {
        "fc_w": nrm((proj_dim, embd_dim)),
        "fc_b": nrm((proj_dim,)),
        "bn0_g": 1.0 + nrm((proj_dim,), 0.01),
        "bn0_b": nrm((proj_dim,), 0.01),
        "deconv_w": [], "bn_g": [], "bn_b": [],
    }
    for li in range(5):
        cin, cout = chans[li], chans[li + 1]
        params["deconv_w"].append(nrm((cin, cout, 4, 4)))   # PyTorch layout
        if li < 4:
            params["bn_g"].append(1.0 + nrm((cout,), 0.01))
            params["bn_b"].append(nrm((cout,), 0.01))
    return params


# ----------------------------------------------------------------------------
if __name__ == "__main__":
    # small shapes consistent with the module's forward
    BATCH, EMBD_DIM, PROJ_DIM, Z_DIM, C_DIM = 2, 32, 16, 8, 8

    key = jax.random.PRNGKey(0)
    k_p, k_e, k_z = jax.random.split(key, 3)

    params = init_params(k_p, EMBD_DIM, PROJ_DIM, Z_DIM, C_DIM)
    embd = jax.random.normal(k_e, (BATCH, EMBD_DIM), dtype=jnp.float32)
    z = jax.random.normal(k_z, (BATCH, Z_DIM), dtype=jnp.float32)

    fwd = jax.jit(generator_forward)
    out = jax.block_until_ready(fwd(params, embd, z))

    # sanity: DCGAN generator output is (N, 3, 64, 64), values in [-1, 1] (tanh)
    assert out.shape == (BATCH, 3, 64, 64), out.shape
    assert bool(jnp.all(jnp.isfinite(out)))
    assert bool(jnp.all(jnp.abs(out) <= 1.0))
    print("KERNEL_OK")
</pallas_src>

<mosaic_0001>
module attributes {stable_mosaic.version = 11 : i64} {
  func.func @_mm_kernel_single_k(%arg0: i32, %arg1: i32, %arg2: i32, %arg3: i32, %arg4: memref<1x8x128xbf16, #tpu.memory_space<vmem>>, %arg5: memref<1x128x128xbf16, #tpu.memory_space<vmem>>, %arg6: memref<1x8x128xf32, #tpu.memory_space<vmem>>) attributes {dimension_semantics = [#tpu.dimension_semantics<parallel>, #tpu.dimension_semantics<parallel>, #tpu.dimension_semantics<parallel>, #tpu.dimension_semantics<arbitrary>], iteration_bounds = array<i64: 1, 1, 1, 1>, scalar_prefetch = 0 : i64, scratch_operands = 0 : i64, tpu.core_type = #tpu.core_type<tc>, window_params = [{transform_indices = @transform_0, window_bounds = array<i64: 1, 8, 128>}, {transform_indices = @transform_1, window_bounds = array<i64: 1, 128, 128>}, {transform_indices = @transform_2, window_bounds = array<i64: 1, 8, 128>}]} {
    %c0 = arith.constant 0 : index
    %c0_0 = arith.constant 0 : index
    %c0_1 = arith.constant 0 : index
    %0 = vector.load %arg4[%c0, %c0_0, %c0_1] : memref<1x8x128xbf16, #tpu.memory_space<vmem>>, vector<1x8x128xbf16>
    %1 = vector.shape_cast %0 : vector<1x8x128xbf16> to vector<8x128xbf16>
    %c0_2 = arith.constant 0 : index
    %c0_3 = arith.constant 0 : index
    %c0_4 = arith.constant 0 : index
    %2 = vector.load %arg5[%c0_2, %c0_3, %c0_4] : memref<1x128x128xbf16, #tpu.memory_space<vmem>>, vector<1x128x128xbf16>
    %3 = vector.shape_cast %2 : vector<1x128x128xbf16> to vector<128x128xbf16>
    %cst = arith.constant dense<0.000000e+00> : vector<8x128xf32>
    %4 = tpu.matmul %1, %3, %cst {dimension_numbers = #tpu.dot_dimension_numbers<[1], [0], [0], [1], [0, 0, 1, 1], [], []>} : vector<8x128xbf16>, vector<128x128xbf16>, vector<8x128xf32> -> vector<8x128xf32>
    %c0_5 = arith.constant 0 : index
    %c0_6 = arith.constant 0 : index
    %c0_7 = arith.constant 0 : index
    %5 = vector.load %arg6[%c0_5, %c0_6, %c0_7] : memref<1x8x128xf32, #tpu.memory_space<vmem>>, vector<1x8x128xf32>
    %6 = vector.shape_cast %5 : vector<1x8x128xf32> to vector<8x128xf32>
    %7 = vector.shape_cast %4 : vector<8x128xf32> to vector<1x8x128xf32>
    tpu.vector_store %arg6[%c0_5, %c0_6, %c0_7], %7 {strides = array<i32>} : memref<1x8x128xf32, #tpu.memory_space<vmem>>, vector<1x8x128xf32>,
    return
  }
  func.func @transform_0(%arg0: i32, %arg1: i32, %arg2: i32, %arg3: i32) -> (i32, i32, i32) {
    %c0_i32 = arith.constant 0 : i32
    return %arg0, %arg1, %arg3 : i32, i32, i32
  }
  func.func @transform_1(%arg0: i32, %arg1: i32, %arg2: i32, %arg3: i32) -> (i32, i32, i32) {
    %c0_i32 = arith.constant 0 : i32
    return %arg0, %arg3, %arg2 : i32, i32, i32
  }
  func.func @transform_2(%arg0: i32, %arg1: i32, %arg2: i32, %arg3: i32) -> (i32, i32, i32) {
    %c0_i32 = arith.constant 0 : i32
    return %arg0, %arg1, %arg2 : i32, i32, i32
  }
}

module attributes {stable_mosaic.version = 11 : i64} {
  func.func @_affine_act_kernel(%arg0: i32, %arg1: memref<8x128xf32, #tpu.memory_space<vmem>>, %arg2: memref<1x128xf32, #tpu.memory_space<vmem>>, %arg3: memref<1x128xf32, #tpu.memory_space<vmem>>, %arg4: memref<8x128xbf16, #tpu.memory_space<vmem>>) attributes {dimension_semantics = [#tpu.dimension_semantics<parallel>], iteration_bounds = array<i64: 1>, scalar_prefetch = 0 : i64, scratch_operands = 0 : i64, tpu.core_type = #tpu.core_type<tc>, window_params = [{transform_indices = @transform_0, window_bounds = array<i64: 8, 128>}, {pipeline_mode = #tpu.pipeline_mode<synchronous>, transform_indices = @transform_1, window_bounds = array<i64: 1, 128>}, {pipeline_mode = #tpu.pipeline_mode<synchronous>, transform_indices = @transform_2, window_bounds = array<i64: 1, 128>}, {transform_indices = @transform_3, window_bounds = array<i64: 8, 128>}]} {
    %c0 = arith.constant 0 : index
    %c0_0 = arith.constant 0 : index
    %0 = vector.load %arg1[%c0, %c0_0] : memref<8x128xf32, #tpu.memory_space<vmem>>, vector<8x128xf32>
    %c0_1 = arith.constant 0 : index
    %c0_2 = arith.constant 0 : index
    %1 = vector.load %arg2[%c0_1, %c0_2] : memref<1x128xf32, #tpu.memory_space<vmem>>, vector<1x128xf32>
    %2 = vector.broadcast %1 : vector<1x128xf32> to vector<8x128xf32>
    %3 = arith.mulf %0, %2 : vector<8x128xf32>
    %c0_3 = arith.constant 0 : index
    %c0_4 = arith.constant 0 : index
    %4 = vector.load %arg3[%c0_3, %c0_4] : memref<1x128xf32, #tpu.memory_space<vmem>>, vector<1x128xf32>
    %5 = vector.broadcast %4 : vector<1x128xf32> to vector<8x128xf32>
    %6 = arith.addf %3, %5 : vector<8x128xf32>
    %cst = arith.constant 0.000000e+00 : f32
    %7 = vector.broadcast %cst : f32 to vector<8x128xf32>
    %8 = arith.cmpf oge, %6, %7 : vector<8x128xf32>
    %cst_5 = arith.constant 2.000000e-01 : f32
    %9 = vector.broadcast %cst_5 : f32 to vector<8x128xf32>
    %10 = arith.mulf %9, %6 : vector<8x128xf32>
    %11 = arith.select %8, %6, %10 : vector<8x128xi1>, vector<8x128xf32>
    %12 = arith.truncf %11 : vector<8x128xf32> to vector<8x128xbf16>
    %c0_6 = arith.constant 0 : index
    %c0_7 = arith.constant 0 : index
    %13 = vector.load %arg4[%c0_6, %c0_7] : memref<8x128xbf16, #tpu.memory_space<vmem>>, vector<8x128xbf16>
    tpu.vector_store %arg4[%c0_6, %c0_7], %12 {strides = array<i32>} : memref<8x128xbf16, #tpu.memory_space<vmem>>, vector<8x128xbf16>,
    return
  }
  func.func @transform_0(%arg0: i32) -> (i32, i32) {
    %c0_i32 = arith.constant 0 : i32
    %c0_i32_0 = arith.constant 0 : i32
    return %arg0, %c0_i32 : i32, i32
  }
  func.func @transform_1(%arg0: i32) -> (i32, i32) {
    %c0_i32 = arith.constant 0 : i32
    %c0_i32_0 = arith.constant 0 : i32
    %c0_i32_1 = arith.constant 0 : i32
    return %c0_i32, %c0_i32_0 : i32, i32
  }
  func.func @transform_2(%arg0: i32) -> (i32, i32) {
    %c0_i32 = arith.constant 0 : i32
    %c0_i32_0 = arith.constant 0 : i32
    %c0_i32_1 = arith.constant 0 : i32
    return %c0_i32, %c0_i32_0 : i32, i32
  }
  func.func @transform_3(%arg0: i32) -> (i32, i32) {
    %c0_i32 = arith.constant 0 : i32
    %c0_i32_0 = arith.constant 0 : i32
    return %arg0, %c0_i32 : i32, i32
  }
}

module attributes {stable_mosaic.version = 11 : i64} {
  func.func @_mm_kernel_single_k(%arg0: i32, %arg1: i32, %arg2: i32, %arg3: i32, %arg4: memref<1x8x128xbf16, #tpu.memory_space<vmem>>, %arg5: memref<1x128x256xbf16, #tpu.memory_space<vmem>>, %arg6: memref<1x8x256xf32, #tpu.memory_space<vmem>>) attributes {dimension_semantics = [#tpu.dimension_semantics<parallel>, #tpu.dimension_semantics<parallel>, #tpu.dimension_semantics<parallel>, #tpu.dimension_semantics<arbitrary>], iteration_bounds = array<i64: 1, 1, 4, 1>, scalar_prefetch = 0 : i64, scratch_operands = 0 : i64, tpu.core_type = #tpu.core_type<tc>, window_params = [{transform_indices = @transform_0, window_bounds = array<i64: 1, 8, 128>}, {transform_indices = @transform_1, window_bounds = array<i64: 1, 128, 256>}, {transform_indices = @transform_2, window_bounds = array<i64: 1, 8, 256>}]} {
    %c0 = arith.constant 0 : index
    %c0_0 = arith.constant 0 : index
    %c0_1 = arith.constant 0 : index
    %0 = vector.load %arg4[%c0, %c0_0, %c0_1] : memref<1x8x128xbf16, #tpu.memory_space<vmem>>, vector<1x8x128xbf16>
    %1 = vector.shape_cast %0 : vector<1x8x128xbf16> to vector<8x128xbf16>
    %c0_2 = arith.constant 0 : index
    %c0_3 = arith.constant 0 : index
    %c0_4 = arith.constant 0 : index
    %2 = vector.load %arg5[%c0_2, %c0_3, %c0_4] : memref<1x128x256xbf16, #tpu.memory_space<vmem>>, vector<1x128x256xbf16>
    %3 = vector.shape_cast %2 : vector<1x128x256xbf16> to vector<128x256xbf16>
    %cst = arith.constant dense<0.000000e+00> : vector<8x256xf32>
    %4 = tpu.matmul %1, %3, %cst {dimension_numbers = #tpu.dot_dimension_numbers<[1], [0], [0], [1], [0, 0, 1, 1], [], []>} : vector<8x128xbf16>, vector<128x256xbf16>, vector<8x256xf32> -> vector<8x256xf32>
    %c0_5 = arith.constant 0 : index
    %c0_6 = arith.constant 0 : index
    %c0_7 = arith.constant 0 : index
    %5 = vector.load %arg6[%c0_5, %c0_6, %c0_7] : memref<1x8x256xf32, #tpu.memory_space<vmem>>, vector<1x8x256xf32>
    %6 = vector.shape_cast %5 : vector<1x8x256xf32> to vector<8x256xf32>
    %7 = vector.shape_cast %4 : vector<8x256xf32> to vector<1x8x256xf32>
    tpu.vector_store %arg6[%c0_5, %c0_6, %c0_7], %7 {strides = array<i32>} : memref<1x8x256xf32, #tpu.memory_space<vmem>>, vector<1x8x256xf32>,
    return
  }
  func.func @transform_0(%arg0: i32, %arg1: i32, %arg2: i32, %arg3: i32) -> (i32, i32, i32) {
    %c0_i32 = arith.constant 0 : i32
    return %arg0, %arg1, %arg3 : i32, i32, i32
  }
  func.func @transform_1(%arg0: i32, %arg1: i32, %arg2: i32, %arg3: i32) -> (i32, i32, i32) {
    %c0_i32 = arith.constant 0 : i32
    return %arg0, %arg3, %arg2 : i32, i32, i32
  }
  func.func @transform_2(%arg0: i32, %arg1: i32, %arg2: i32, %arg3: i32) -> (i32, i32, i32) {
    %c0_i32 = arith.constant 0 : i32
    return %arg0, %arg1, %arg2 : i32, i32, i32
  }
}

module attributes {stable_mosaic.version = 11 : i64} {
  func.func @_affine_act_kernel(%arg0: i32, %arg1: memref<32x128xf32, #tpu.memory_space<vmem>>, %arg2: memref<1x128xf32, #tpu.memory_space<vmem>>, %arg3: memref<1x128xf32, #tpu.memory_space<vmem>>, %arg4: memref<32x128xbf16, #tpu.memory_space<vmem>>) attributes {dimension_semantics = [#tpu.dimension_semantics<parallel>], iteration_bounds = array<i64: 1>, scalar_prefetch = 0 : i64, scratch_operands = 0 : i64, tpu.core_type = #tpu.core_type<tc>, window_params = [{transform_indices = @transform_0, window_bounds = array<i64: 32, 128>}, {pipeline_mode = #tpu.pipeline_mode<synchronous>, transform_indices = @transform_1, window_bounds = array<i64: 1, 128>}, {pipeline_mode = #tpu.pipeline_mode<synchronous>, transform_indices = @transform_2, window_bounds = array<i64: 1, 128>}, {transform_indices = @transform_3, window_bounds = array<i64: 32, 128>}]} {
    %c0 = arith.constant 0 : index
    %c0_0 = arith.constant 0 : index
    %0 = vector.load %arg1[%c0, %c0_0] : memref<32x128xf32, #tpu.memory_space<vmem>>, vector<32x128xf32>
    %c0_1 = arith.constant 0 : index
    %c0_2 = arith.constant 0 : index
    %1 = vector.load %arg2[%c0_1, %c0_2] : memref<1x128xf32, #tpu.memory_space<vmem>>, vector<1x128xf32>
    %2 = vector.broadcast %1 : vector<1x128xf32> to vector<32x128xf32>
    %3 = arith.mulf %0, %2 : vector<32x128xf32>
    %c0_3 = arith.constant 0 : index
    %c0_4 = arith.constant 0 : index
    %4 = vector.load %arg3[%c0_3, %c0_4] : memref<1x128xf32, #tpu.memory_space<vmem>>, vector<1x128xf32>
    %5 = vector.broadcast %4 : vector<1x128xf32> to vector<32x128xf32>
    %6 = arith.addf %3, %5 : vector<32x128xf32>
    %cst = arith.constant 0.000000e+00 : f32
    %7 = vector.broadcast %cst : f32 to vector<32x128xf32>
    %8 = arith.maximumf %6, %7 : vector<32x128xf32>
    %9 = arith.truncf %8 : vector<32x128xf32> to vector<32x128xbf16>
    %c0_5 = arith.constant 0 : index
    %c0_6 = arith.constant 0 : index
    %10 = vector.load %arg4[%c0_5, %c0_6] : memref<32x128xbf16, #tpu.memory_space<vmem>>, vector<32x128xbf16>
    tpu.vector_store %arg4[%c0_5, %c0_6], %9 {strides = array<i32>} : memref<32x128xbf16, #tpu.memory_space<vmem>>, vector<32x128xbf16>,
    return
  }
  func.func @transform_0(%arg0: i32) -> (i32, i32) {
    %c0_i32 = arith.constant 0 : i32
    %c0_i32_0 = arith.constant 0 : i32
    return %arg0, %c0_i32 : i32, i32
  }
  func.func @transform_1(%arg0: i32) -> (i32, i32) {
    %c0_i32 = arith.constant 0 : i32
    %c0_i32_0 = arith.constant 0 : i32
    %c0_i32_1 = arith.constant 0 : i32
    return %c0_i32, %c0_i32_0 : i32, i32
  }
  func.func @transform_2(%arg0: i32) -> (i32, i32) {
    %c0_i32 = arith.constant 0 : i32
    %c0_i32_0 = arith.constant 0 : i32
    %c0_i32_1 = arith.constant 0 : i32
    return %c0_i32, %c0_i32_0 : i32, i32
  }
  func.func @transform_3(%arg0: i32) -> (i32, i32) {
    %c0_i32 = arith.constant 0 : i32
    %c0_i32_0 = arith.constant 0 : i32
    return %arg0, %c0_i32 : i32, i32
  }
}

module attributes {stable_mosaic.version = 11 : i64} {
  func.func @_mm_kernel_single_k(%arg0: i32, %arg1: i32, %arg2: i32, %arg3: i32, %arg4: memref<1x32x256xbf16, #tpu.memory_space<vmem>>, %arg5: memref<1x256x128xbf16, #tpu.memory_space<vmem>>, %arg6: memref<1x32x128xf32, #tpu.memory_space<vmem>>) attributes {dimension_semantics = [#tpu.dimension_semantics<parallel>, #tpu.dimension_semantics<parallel>, #tpu.dimension_semantics<parallel>, #tpu.dimension_semantics<arbitrary>], iteration_bounds = array<i64: 4, 1, 1, 1>, scalar_prefetch = 0 : i64, scratch_operands = 0 : i64, tpu.core_type = #tpu.core_type<tc>, window_params = [{transform_indices = @transform_0, window_bounds = array<i64: 1, 32, 256>}, {transform_indices = @transform_1, window_bounds = array<i64: 1, 256, 128>}, {transform_indices = @transform_2, window_bounds = array<i64: 1, 32, 128>}]} {
    %c0 = arith.constant 0 : index
    %c0_0 = arith.constant 0 : index
    %c0_1 = arith.constant 0 : index
    %0 = vector.load %arg4[%c0, %c0_0, %c0_1] : memref<1x32x256xbf16, #tpu.memory_space<vmem>>, vector<1x32x256xbf16>
    %1 = vector.shape_cast %0 : vector<1x32x256xbf16> to vector<32x256xbf16>
    %c0_2 = arith.constant 0 : index
    %c0_3 = arith.constant 0 : index
    %c0_4 = arith.constant 0 : index
    %2 = vector.load %arg5[%c0_2, %c0_3, %c0_4] : memref<1x256x128xbf16, #tpu.memory_space<vmem>>, vector<1x256x128xbf16>
    %3 = vector.shape_cast %2 : vector<1x256x128xbf16> to vector<256x128xbf16>
    %cst = arith.constant dense<0.000000e+00> : vector<32x128xf32>
    %4 = tpu.matmul %1, %3, %cst {dimension_numbers = #tpu.dot_dimension_numbers<[1], [0], [0], [1], [0, 0, 1, 1], [], []>} : vector<32x256xbf16>, vector<256x128xbf16>, vector<32x128xf32> -> vector<32x128xf32>
    %c0_5 = arith.constant 0 : index
    %c0_6 = arith.constant 0 : index
    %c0_7 = arith.constant 0 : index
    %5 = vector.load %arg6[%c0_5, %c0_6, %c0_7] : memref<1x32x128xf32, #tpu.memory_space<vmem>>, vector<1x32x128xf32>
    %6 = vector.shape_cast %5 : vector<1x32x128xf32> to vector<32x128xf32>
    %7 = vector.shape_cast %4 : vector<32x128xf32> to vector<1x32x128xf32>
    tpu.vector_store %arg6[%c0_5, %c0_6, %c0_7], %7 {strides = array<i32>} : memref<1x32x128xf32, #tpu.memory_space<vmem>>, vector<1x32x128xf32>,
    return
  }
  func.func @transform_0(%arg0: i32, %arg1: i32, %arg2: i32, %arg3: i32) -> (i32, i32, i32) {
    %c0_i32 = arith.constant 0 : i32
    return %arg0, %arg1, %arg3 : i32, i32, i32
  }
  func.func @transform_1(%arg0: i32, %arg1: i32, %arg2: i32, %arg3: i32) -> (i32, i32, i32) {
    %c0_i32 = arith.constant 0 : i32
    return %arg0, %arg3, %arg2 : i32, i32, i32
  }
  func.func @transform_2(%arg0: i32, %arg1: i32, %arg2: i32, %arg3: i32) -> (i32, i32, i32) {
    %c0_i32 = arith.constant 0 : i32
    return %arg0, %arg1, %arg2 : i32, i32, i32
  }
}

module attributes {stable_mosaic.version = 11 : i64} {
  func.func @_affine_act_kernel(%arg0: i32, %arg1: memref<128x128xf32, #tpu.memory_space<vmem>>, %arg2: memref<1x128xf32, #tpu.memory_space<vmem>>, %arg3: memref<1x128xf32, #tpu.memory_space<vmem>>, %arg4: memref<128x128xbf16, #tpu.memory_space<vmem>>) attributes {dimension_semantics = [#tpu.dimension_semantics<parallel>], iteration_bounds = array<i64: 1>, scalar_prefetch = 0 : i64, scratch_operands = 0 : i64, tpu.core_type = #tpu.core_type<tc>, window_params = [{transform_indices = @transform_0, window_bounds = array<i64: 128, 128>}, {pipeline_mode = #tpu.pipeline_mode<synchronous>, transform_indices = @transform_1, window_bounds = array<i64: 1, 128>}, {pipeline_mode = #tpu.pipeline_mode<synchronous>, transform_indices = @transform_2, window_bounds = array<i64: 1, 128>}, {transform_indices = @transform_3, window_bounds = array<i64: 128, 128>}]} {
    %c0 = arith.constant 0 : index
    %c0_0 = arith.constant 0 : index
    %0 = vector.load %arg1[%c0, %c0_0] : memref<128x128xf32, #tpu.memory_space<vmem>>, vector<128x128xf32>
    %c0_1 = arith.constant 0 : index
    %c0_2 = arith.constant 0 : index
    %1 = vector.load %arg2[%c0_1, %c0_2] : memref<1x128xf32, #tpu.memory_space<vmem>>, vector<1x128xf32>
    %2 = vector.broadcast %1 : vector<1x128xf32> to vector<128x128xf32>
    %3 = arith.mulf %0, %2 : vector<128x128xf32>
    %c0_3 = arith.constant 0 : index
    %c0_4 = arith.constant 0 : index
    %4 = vector.load %arg3[%c0_3, %c0_4] : memref<1x128xf32, #tpu.memory_space<vmem>>, vector<1x128xf32>
    %5 = vector.broadcast %4 : vector<1x128xf32> to vector<128x128xf32>
    %6 = arith.addf %3, %5 : vector<128x128xf32>
    %cst = arith.constant 0.000000e+00 : f32
    %7 = vector.broadcast %cst : f32 to vector<128x128xf32>
    %8 = arith.maximumf %6, %7 : vector<128x128xf32>
    %9 = arith.truncf %8 : vector<128x128xf32> to vector<128x128xbf16>
    %c0_5 = arith.constant 0 : index
    %c0_6 = arith.constant 0 : index
    %10 = vector.load %arg4[%c0_5, %c0_6] : memref<128x128xbf16, #tpu.memory_space<vmem>>, vector<128x128xbf16>
    tpu.vector_store %arg4[%c0_5, %c0_6], %9 {strides = array<i32>} : memref<128x128xbf16, #tpu.memory_space<vmem>>, vector<128x128xbf16>,
    return
  }
  func.func @transform_0(%arg0: i32) -> (i32, i32) {
    %c0_i32 = arith.constant 0 : i32
    %c0_i32_0 = arith.constant 0 : i32
    return %arg0, %c0_i32 : i32, i32
  }
  func.func @transform_1(%arg0: i32) -> (i32, i32) {
    %c0_i32 = arith.constant 0 : i32
    %c0_i32_0 = arith.constant 0 : i32
    %c0_i32_1 = arith.constant 0 : i32
    return %c0_i32, %c0_i32_0 : i32, i32
  }
  func.func @transform_2(%arg0: i32) -> (i32, i32) {
    %c0_i32 = arith.constant 0 : i32
    %c0_i32_0 = arith.constant 0 : i32
    %c0_i32_1 = arith.constant 0 : i32
    return %c0_i32, %c0_i32_0 : i32, i32
  }
  func.func @transform_3(%arg0: i32) -> (i32, i32) {
    %c0_i32 = arith.constant 0 : i32
    %c0_i32_0 = arith.constant 0 : i32
    return %arg0, %c0_i32 : i32, i32
  }
}

module attributes {stable_mosaic.version = 11 : i64} {
  func.func @_mm_kernel_single_k(%arg0: i32, %arg1: i32, %arg2: i32, %arg3: i32, %arg4: memref<1x128x128xbf16, #tpu.memory_space<vmem>>, %arg5: memref<1x128x128xbf16, #tpu.memory_space<vmem>>, %arg6: memref<1x128x128xf32, #tpu.memory_space<vmem>>) attributes {dimension_semantics = [#tpu.dimension_semantics<parallel>, #tpu.dimension_semantics<parallel>, #tpu.dimension_semantics<parallel>, #tpu.dimension_semantics<arbitrary>], iteration_bounds = array<i64: 4, 1, 1, 1>, scalar_prefetch = 0 : i64, scratch_operands = 0 : i64, tpu.core_type = #tpu.core_type<tc>, window_params = [{transform_indices = @transform_0, window_bounds = array<i64: 1, 128, 128>}, {transform_indices = @transform_1, window_bounds = array<i64: 1, 128, 128>}, {transform_indices = @transform_2, window_bounds = array<i64: 1, 128, 128>}]} {
    %c0 = arith.constant 0 : index
    %c0_0 = arith.constant 0 : index
    %c0_1 = arith.constant 0 : index
    %0 = vector.load %arg4[%c0, %c0_0, %c0_1] : memref<1x128x128xbf16, #tpu.memory_space<vmem>>, vector<1x128x128xbf16>
    %1 = vector.shape_cast %0 : vector<1x128x128xbf16> to vector<128x128xbf16>
    %c0_2 = arith.constant 0 : index
    %c0_3 = arith.constant 0 : index
    %c0_4 = arith.constant 0 : index
    %2 = vector.load %arg5[%c0_2, %c0_3, %c0_4] : memref<1x128x128xbf16, #tpu.memory_space<vmem>>, vector<1x128x128xbf16>
    %3 = vector.shape_cast %2 : vector<1x128x128xbf16> to vector<128x128xbf16>
    %cst = arith.constant dense<0.000000e+00> : vector<128x128xf32>
    %4 = tpu.matmul %1, %3, %cst {dimension_numbers = #tpu.dot_dimension_numbers<[1], [0], [0], [1], [0, 0, 1, 1], [], []>} : vector<128x128xbf16>, vector<128x128xbf16>, vector<128x128xf32> -> vector<128x128xf32>
    %c0_5 = arith.constant 0 : index
    %c0_6 = arith.constant 0 : index
    %c0_7 = arith.constant 0 : index
    %5 = vector.load %arg6[%c0_5, %c0_6, %c0_7] : memref<1x128x128xf32, #tpu.memory_space<vmem>>, vector<1x128x128xf32>
    %6 = vector.shape_cast %5 : vector<1x128x128xf32> to vector<128x128xf32>
    %7 = vector.shape_cast %4 : vector<128x128xf32> to vector<1x128x128xf32>
    tpu.vector_store %arg6[%c0_5, %c0_6, %c0_7], %7 {strides = array<i32>} : memref<1x128x128xf32, #tpu.memory_space<vmem>>, vector<1x128x128xf32>,
    return
  }
  func.func @transform_0(%arg0: i32, %arg1: i32, %arg2: i32, %arg3: i32) -> (i32, i32, i32) {
    %c0_i32 = arith.constant 0 : i32
    return %arg0, %arg1, %arg3 : i32, i32, i32
  }
  func.func @transform_1(%arg0: i32, %arg1: i32, %arg2: i32, %arg3: i32) -> (i32, i32, i32) {
    %c0_i32 = arith.constant 0 : i32
    return %arg0, %arg3, %arg2 : i32, i32, i32
  }
  func.func @transform_2(%arg0: i32, %arg1: i32, %arg2: i32, %arg3: i32) -> (i32, i32, i32) {
    %c0_i32 = arith.constant 0 : i32
    return %arg0, %arg1, %arg2 : i32, i32, i32
  }
}

module attributes {stable_mosaic.version = 11 : i64} {
  func.func @_affine_act_kernel(%arg0: i32, %arg1: memref<512x128xf32, #tpu.memory_space<vmem>>, %arg2: memref<1x128xf32, #tpu.memory_space<vmem>>, %arg3: memref<1x128xf32, #tpu.memory_space<vmem>>, %arg4: memref<512x128xbf16, #tpu.memory_space<vmem>>) attributes {dimension_semantics = [#tpu.dimension_semantics<parallel>], iteration_bounds = array<i64: 1>, scalar_prefetch = 0 : i64, scratch_operands = 0 : i64, tpu.core_type = #tpu.core_type<tc>, window_params = [{transform_indices = @transform_0, window_bounds = array<i64: 512, 128>}, {pipeline_mode = #tpu.pipeline_mode<synchronous>, transform_indices = @transform_1, window_bounds = array<i64: 1, 128>}, {pipeline_mode = #tpu.pipeline_mode<synchronous>, transform_indices = @transform_2, window_bounds = array<i64: 1, 128>}, {transform_indices = @transform_3, window_bounds = array<i64: 512, 128>}]} {
    %c0 = arith.constant 0 : index
    %c0_0 = arith.constant 0 : index
    %0 = vector.load %arg1[%c0, %c0_0] : memref<512x128xf32, #tpu.memory_space<vmem>>, vector<512x128xf32>
    %c0_1 = arith.constant 0 : index
    %c0_2 = arith.constant 0 : index
    %1 = vector.load %arg2[%c0_1, %c0_2] : memref<1x128xf32, #tpu.memory_space<vmem>>, vector<1x128xf32>
    %2 = vector.broadcast %1 : vector<1x128xf32> to vector<512x128xf32>
    %3 = arith.mulf %0, %2 : vector<512x128xf32>
    %c0_3 = arith.constant 0 : index
    %c0_4 = arith.constant 0 : index
    %4 = vector.load %arg3[%c0_3, %c0_4] : memref<1x128xf32, #tpu.memory_space<vmem>>, vector<1x128xf32>
    %5 = vector.broadcast %4 : vector<1x128xf32> to vector<512x128xf32>
    %6 = arith.addf %3, %5 : vector<512x128xf32>
    %cst = arith.constant 0.000000e+00 : f32
    %7 = vector.broadcast %cst : f32 to vector<512x128xf32>
    %8 = arith.maximumf %6, %7 : vector<512x128xf32>
    %9 = arith.truncf %8 : vector<512x128xf32> to vector<512x128xbf16>
    %c0_5 = arith.constant 0 : index
    %c0_6 = arith.constant 0 : index
    %10 = vector.load %arg4[%c0_5, %c0_6] : memref<512x128xbf16, #tpu.memory_space<vmem>>, vector<512x128xbf16>
    tpu.vector_store %arg4[%c0_5, %c0_6], %9 {strides = array<i32>} : memref<512x128xbf16, #tpu.memory_space<vmem>>, vector<512x128xbf16>,
    return
  }
  func.func @transform_0(%arg0: i32) -> (i32, i32) {
    %c0_i32 = arith.constant 0 : i32
    %c0_i32_0 = arith.constant 0 : i32
    return %arg0, %c0_i32 : i32, i32
  }
  func.func @transform_1(%arg0: i32) -> (i32, i32) {
    %c0_i32 = arith.constant 0 : i32
    %c0_i32_0 = arith.constant 0 : i32
    %c0_i32_1 = arith.constant 0 : i32
    return %c0_i32, %c0_i32_0 : i32, i32
  }
  func.func @transform_2(%arg0: i32) -> (i32, i32) {
    %c0_i32 = arith.constant 0 : i32
    %c0_i32_0 = arith.constant 0 : i32
    %c0_i32_1 = arith.constant 0 : i32
    return %c0_i32, %c0_i32_0 : i32, i32
  }
  func.func @transform_3(%arg0: i32) -> (i32, i32) {
    %c0_i32 = arith.constant 0 : i32
    %c0_i32_0 = arith.constant 0 : i32
    return %arg0, %c0_i32 : i32, i32
  }
}

module attributes {stable_mosaic.version = 11 : i64} {
  func.func @_mm_kernel_single_k(%arg0: i32, %arg1: i32, %arg2: i32, %arg3: i32, %arg4: memref<1x512x128xbf16, #tpu.memory_space<vmem>>, %arg5: memref<1x128x128xbf16, #tpu.memory_space<vmem>>, %arg6: memref<1x512x128xf32, #tpu.memory_space<vmem>>) attributes {dimension_semantics = [#tpu.dimension_semantics<parallel>, #tpu.dimension_semantics<parallel>, #tpu.dimension_semantics<parallel>, #tpu.dimension_semantics<arbitrary>], iteration_bounds = array<i64: 4, 1, 1, 1>, scalar_prefetch = 0 : i64, scratch_operands = 0 : i64, tpu.core_type = #tpu.core_type<tc>, window_params = [{transform_indices = @transform_0, window_bounds = array<i64: 1, 512, 128>}, {transform_indices = @transform_1, window_bounds = array<i64: 1, 128, 128>}, {transform_indices = @transform_2, window_bounds = array<i64: 1, 512, 128>}]} {
    %c0 = arith.constant 0 : index
    %c0_0 = arith.constant 0 : index
    %c0_1 = arith.constant 0 : index
    %0 = vector.load %arg4[%c0, %c0_0, %c0_1] : memref<1x512x128xbf16, #tpu.memory_space<vmem>>, vector<1x512x128xbf16>
    %1 = vector.shape_cast %0 : vector<1x512x128xbf16> to vector<512x128xbf16>
    %c0_2 = arith.constant 0 : index
    %c0_3 = arith.constant 0 : index
    %c0_4 = arith.constant 0 : index
    %2 = vector.load %arg5[%c0_2, %c0_3, %c0_4] : memref<1x128x128xbf16, #tpu.memory_space<vmem>>, vector<1x128x128xbf16>
    %3 = vector.shape_cast %2 : vector<1x128x128xbf16> to vector<128x128xbf16>
    %cst = arith.constant dense<0.000000e+00> : vector<512x128xf32>
    %4 = tpu.matmul %1, %3, %cst {dimension_numbers = #tpu.dot_dimension_numbers<[1], [0], [0], [1], [0, 0, 1, 1], [], []>} : vector<512x128xbf16>, vector<128x128xbf16>, vector<512x128xf32> -> vector<512x128xf32>
    %c0_5 = arith.constant 0 : index
    %c0_6 = arith.constant 0 : index
    %c0_7 = arith.constant 0 : index
    %5 = vector.load %arg6[%c0_5, %c0_6, %c0_7] : memref<1x512x128xf32, #tpu.memory_space<vmem>>, vector<1x512x128xf32>
    %6 = vector.shape_cast %5 : vector<1x512x128xf32> to vector<512x128xf32>
    %7 = vector.shape_cast %4 : vector<512x128xf32> to vector<1x512x128xf32>
    tpu.vector_store %arg6[%c0_5, %c0_6, %c0_7], %7 {strides = array<i32>} : memref<1x512x128xf32, #tpu.memory_space<vmem>>, vector<1x512x128xf32>,
    return
  }
  func.func @transform_0(%arg0: i32, %arg1: i32, %arg2: i32, %arg3: i32) -> (i32, i32, i32) {
    %c0_i32 = arith.constant 0 : i32
    return %arg0, %arg1, %arg3 : i32, i32, i32
  }
  func.func @transform_1(%arg0: i32, %arg1: i32, %arg2: i32, %arg3: i32) -> (i32, i32, i32) {
    %c0_i32 = arith.constant 0 : i32
    return %arg0, %arg3, %arg2 : i32, i32, i32
  }
  func.func @transform_2(%arg0: i32, %arg1: i32, %arg2: i32, %arg3: i32) -> (i32, i32, i32) {
    %c0_i32 = arith.constant 0 : i32
    return %arg0, %arg1, %arg2 : i32, i32, i32
  }
}

module attributes {stable_mosaic.version = 11 : i64} {
  func.func @_affine_act_kernel(%arg0: i32, %arg1: memref<512x128xf32, #tpu.memory_space<vmem>>, %arg2: memref<1x128xf32, #tpu.memory_space<vmem>>, %arg3: memref<1x128xf32, #tpu.memory_space<vmem>>, %arg4: memref<512x128xbf16, #tpu.memory_space<vmem>>) attributes {dimension_semantics = [#tpu.dimension_semantics<parallel>], iteration_bounds = array<i64: 4>, scalar_prefetch = 0 : i64, scratch_operands = 0 : i64, tpu.core_type = #tpu.core_type<tc>, window_params = [{transform_indices = @transform_0, window_bounds = array<i64: 512, 128>}, {pipeline_mode = #tpu.pipeline_mode<synchronous>, transform_indices = @transform_1, window_bounds = array<i64: 1, 128>}, {pipeline_mode = #tpu.pipeline_mode<synchronous>, transform_indices = @transform_2, window_bounds = array<i64: 1, 128>}, {transform_indices = @transform_3, window_bounds = array<i64: 512, 128>}]} {
    %c0 = arith.constant 0 : index
    %c0_0 = arith.constant 0 : index
    %0 = vector.load %arg1[%c0, %c0_0] : memref<512x128xf32, #tpu.memory_space<vmem>>, vector<512x128xf32>
    %c0_1 = arith.constant 0 : index
    %c0_2 = arith.constant 0 : index
    %1 = vector.load %arg2[%c0_1, %c0_2] : memref<1x128xf32, #tpu.memory_space<vmem>>, vector<1x128xf32>
    %2 = vector.broadcast %1 : vector<1x128xf32> to vector<512x128xf32>
    %3 = arith.mulf %0, %2 : vector<512x128xf32>
    %c0_3 = arith.constant 0 : index
    %c0_4 = arith.constant 0 : index
    %4 = vector.load %arg3[%c0_3, %c0_4] : memref<1x128xf32, #tpu.memory_space<vmem>>, vector<1x128xf32>
    %5 = vector.broadcast %4 : vector<1x128xf32> to vector<512x128xf32>
    %6 = arith.addf %3, %5 : vector<512x128xf32>
    %cst = arith.constant 0.000000e+00 : f32
    %7 = vector.broadcast %cst : f32 to vector<512x128xf32>
    %8 = arith.maximumf %6, %7 : vector<512x128xf32>
    %9 = arith.truncf %8 : vector<512x128xf32> to vector<512x128xbf16>
    %c0_5 = arith.constant 0 : index
    %c0_6 = arith.constant 0 : index
    %10 = vector.load %arg4[%c0_5, %c0_6] : memref<512x128xbf16, #tpu.memory_space<vmem>>, vector<512x128xbf16>
    tpu.vector_store %arg4[%c0_5, %c0_6], %9 {strides = array<i32>} : memref<512x128xbf16, #tpu.memory_space<vmem>>, vector<512x128xbf16>,
    return
  }
  func.func @transform_0(%arg0: i32) -> (i32, i32) {
    %c0_i32 = arith.constant 0 : i32
    %c0_i32_0 = arith.constant 0 : i32
    return %arg0, %c0_i32 : i32, i32
  }
  func.func @transform_1(%arg0: i32) -> (i32, i32) {
    %c0_i32 = arith.constant 0 : i32
    %c0_i32_0 = arith.constant 0 : i32
    %c0_i32_1 = arith.constant 0 : i32
    return %c0_i32, %c0_i32_0 : i32, i32
  }
  func.func @transform_2(%arg0: i32) -> (i32, i32) {
    %c0_i32 = arith.constant 0 : i32
    %c0_i32_0 = arith.constant 0 : i32
    %c0_i32_1 = arith.constant 0 : i32
    return %c0_i32, %c0_i32_0 : i32, i32
  }
  func.func @transform_3(%arg0: i32) -> (i32, i32) {
    %c0_i32 = arith.constant 0 : i32
    %c0_i32_0 = arith.constant 0 : i32
    return %arg0, %c0_i32 : i32, i32
  }
}

module attributes {stable_mosaic.version = 11 : i64} {
  func.func @_mm_kernel_single_k(%arg0: i32, %arg1: i32, %arg2: i32, %arg3: i32, %arg4: memref<1x512x128xbf16, #tpu.memory_space<vmem>>, %arg5: memref<1x128x128xbf16, #tpu.memory_space<vmem>>, %arg6: memref<1x512x128xf32, #tpu.memory_space<vmem>>) attributes {dimension_semantics = [#tpu.dimension_semantics<parallel>, #tpu.dimension_semantics<parallel>, #tpu.dimension_semantics<parallel>, #tpu.dimension_semantics<arbitrary>], iteration_bounds = array<i64: 4, 4, 1, 1>, scalar_prefetch = 0 : i64, scratch_operands = 0 : i64, tpu.core_type = #tpu.core_type<tc>, window_params = [{transform_indices = @transform_0, window_bounds = array<i64: 1, 512, 128>}, {transform_indices = @transform_1, window_bounds = array<i64: 1, 128, 128>}, {transform_indices = @transform_2, window_bounds = array<i64: 1, 512, 128>}]} {
    %c0 = arith.constant 0 : index
    %c0_0 = arith.constant 0 : index
    %c0_1 = arith.constant 0 : index
    %0 = vector.load %arg4[%c0, %c0_0, %c0_1] : memref<1x512x128xbf16, #tpu.memory_space<vmem>>, vector<1x512x128xbf16>
    %1 = vector.shape_cast %0 : vector<1x512x128xbf16> to vector<512x128xbf16>
    %c0_2 = arith.constant 0 : index
    %c0_3 = arith.constant 0 : index
    %c0_4 = arith.constant 0 : index
    %2 = vector.load %arg5[%c0_2, %c0_3, %c0_4] : memref<1x128x128xbf16, #tpu.memory_space<vmem>>, vector<1x128x128xbf16>
    %3 = vector.shape_cast %2 : vector<1x128x128xbf16> to vector<128x128xbf16>
    %cst = arith.constant dense<0.000000e+00> : vector<512x128xf32>
    %4 = tpu.matmul %1, %3, %cst {dimension_numbers = #tpu.dot_dimension_numbers<[1], [0], [0], [1], [0, 0, 1, 1], [], []>} : vector<512x128xbf16>, vector<128x128xbf16>, vector<512x128xf32> -> vector<512x128xf32>
    %5 = math.tanh %4 : vector<512x128xf32>
    %c0_5 = arith.constant 0 : index
    %c0_6 = arith.constant 0 : index
    %c0_7 = arith.constant 0 : index
    %6 = vector.load %arg6[%c0_5, %c0_6, %c0_7] : memref<1x512x128xf32, #tpu.memory_space<vmem>>, vector<1x512x128xf32>
    %7 = vector.shape_cast %6 : vector<1x512x128xf32> to vector<512x128xf32>
    %8 = vector.shape_cast %5 : vector<512x128xf32> to vector<1x512x128xf32>
    tpu.vector_store %arg6[%c0_5, %c0_6, %c0_7], %8 {strides = array<i32>} : memref<1x512x128xf32, #tpu.memory_space<vmem>>, vector<1x512x128xf32>,
    return
  }
  func.func @transform_0(%arg0: i32, %arg1: i32, %arg2: i32, %arg3: i32) -> (i32, i32, i32) {
    %c0_i32 = arith.constant 0 : i32
    return %arg0, %arg1, %arg3 : i32, i32, i32
  }
  func.func @transform_1(%arg0: i32, %arg1: i32, %arg2: i32, %arg3: i32) -> (i32, i32, i32) {
    %c0_i32 = arith.constant 0 : i32
    return %arg0, %arg3, %arg2 : i32, i32, i32
  }
  func.func @transform_2(%arg0: i32, %arg1: i32, %arg2: i32, %arg3: i32) -> (i32, i32, i32) {
    %c0_i32 = arith.constant 0 : i32
    return %arg0, %arg1, %arg2 : i32, i32, i32
  }
}

</mosaic_0001>

<bundles_post_ra>
// kernel: generator_forward.12
= control target key start
LH: loop header
LB: loop body
LE: loop exit
PB: predicated region body
PF: predicated region fallthrough
CT: control target
= control target key end

     0   :  { %s74_s0 = inlined_call_operand.vmem [shape: f32[8,128], index: 0, kind: input, shape index: {}]   ;;  %s75_s1 = inlined_call_operand.vmem [shape: f32[1,128], index: 1, kind: input, shape index: {}]   ;;  %s76_s2 = inlined_call_operand.vmem [shape: f32[1,128], index: 2, kind: input, shape index: {}]   ;;  %s77_s3 = inlined_call_operand.vmem [shape: bf16[8,128], index: 3, kind: output, shape index: {}]  }
   0x1   :  { %v14_v0 = vld [vmem:[%s74_s0] sm:$0xff] }
   0x2   :  { %v40_v1 = vld [vmem:[%s75_s1] ss:$0 sm:$0xff] }
   0x3   :  { %v41_v2 = vld [vmem:[%s76_s2] ss:$0 sm:$0xff]  ;;  %v22_v3 = vmul.f32 %v40_v1, %v14_v0 }
   0x5   :  { %v30_v4 = vadd.f32 %v41_v2, %v22_v3 }
   0x7   :  { %vm31_vm0 = vcmp.ge.f32.partialorder %v30_v4, 0.0  ;;  %v32_v5 = vmul.f32 0.2, %v30_v4 }
   0x9   :  { %v33_v6 = vsel %vm31_vm0, %v30_v4, %v32_v5 }
   0xa   :  { %v34_v7 = vpack.c.bf16 %v33_v6, %v33_v6 }
   0xc   :  { %35 = vst [vmem:[%s77_s3] sm:$0xf] %v34_v7 }

// kernel: generator_forward.11
= control target key start
LH: loop header
LB: loop body
LE: loop exit
PB: predicated region body
PF: predicated region fallthrough
CT: control target
= control target key end

     0   :  { %v169_v0 = vmov 0.0   ;;  %vm170_vm0 = vmmov 0   ;;  %s216_s1 = inlined_call_operand.vmem [shape: bf16[1,128,128], index: 1, kind: input, shape index: {}]   ;;  %s217_s0 = inlined_call_operand.vmem [shape: bf16[1,8,128], index: 0, kind: input, shape index: {}]   ;;  %s218_s2 = inlined_call_operand.vmem [shape: f32[1,8,128], index: 2, kind: output, shape index: {}]  }
   0x1   :  { %139 = vmatprep.subr.bf16.mxu0 %v169_v0  ;;  %v161_v1 = vld [vmem:[%s216_s1] sm:$0xff]   ;;  %155 = vmatprep.mubr.msk.bf16.mxu0 %vm170_vm0, %v169_v0  ;;  %v162_v2 = vld [vmem:[%s216_s1 + $0x8] sm:$0xff]   ;;  %v163_v3 = vld [vmem:[%s216_s1 + $0x10] sm:$0xff]  }
   0x2   :  { %140 = vmatpush3.bf16.msra.mxu0 %v161_v1  ;;  %v164_v4 = vld [vmem:[%s216_s1 + $0x18] sm:$0xff]   ;;  %v165_v5 = vld [vmem:[%s216_s1 + $0x20] sm:$0xff]   ;;  %v166_v6 = vld [vmem:[%s216_s1 + $0x28] sm:$0xff]  }
   0x3   :  { %141 = vmatprep.subr.bf16.mxu0 %v169_v0  ;;  %v167_v7 = vld [vmem:[%s216_s1 + $0x30] sm:$0xff]   ;;  %v168_v8 = vld [vmem:[%s216_s1 + $0x38] sm:$0xff]   ;;  %v12_v9 = vld [vmem:[%s217_s0] sm:$0xf] }
   0x6   :  { %142 = vmatpush3.bf16.msra.mxu0 %v162_v2 }
   0x7   :  { %143 = vmatprep.subr.bf16.mxu0 %v169_v0 }
   0xa   :  { %144 = vmatpush3.bf16.msra.mxu0 %v163_v3 }
   0xb   :  { %145 = vmatprep.subr.bf16.mxu0 %v169_v0 }
   0xe   :  { %146 = vmatpush3.bf16.msra.mxu0 %v164_v4 }
   0xf   :  { %147 = vmatprep.subr.bf16.mxu0 %v169_v0 }
  0x12   :  { %148 = vmatpush3.bf16.msra.mxu0 %v165_v5 }
  0x13   :  { %149 = vmatprep.subr.bf16.mxu0 %v169_v0 }
  0x16   :  { %150 = vmatpush3.bf16.msra.mxu0 %v166_v6 }
  0x17   :  { %151 = vmatprep.subr.bf16.mxu0 %v169_v0 }
  0x1a   :  { %152 = vmatpush3.bf16.msra.mxu0 %v167_v7 }
  0x1b   :  { %153 = vmatprep.subr.bf16.mxu0 %v169_v0 }
  0x1e   :  { %154 = vmatpush3.bf16.msra.mxu0 %v168_v8 }
  0x21   :  { %156 = vmatmul.mubr.bf16.vlgmr.msra.gmra.mrb[0].mxu0 %v12_v9 }
  0xf4   :  { %v111_v10 = vpop.f32.mrb[0].mxu0 }
  0xf5   :  { %117 = vst [vmem:[%s218_s2] sm:$0xff] %v111_v10  ;;  %v157_v11 = vpop.f32.mrb[1].mxu0 }
  0xf6   :  { %v114_v12 = vpop.f32.mrb[2].mxu0 }
  0xf7   :  { %v158_v13 = vpop.f32.mrb[3].mxu0 }

// kernel: squeeze.67
= control target key start
LH: loop header
LB: loop body
LE: loop exit
PB: predicated region body
PF: predicated region fallthrough
CT: control target
= control target key end

     0   :  { %vm41_vm0 = vcmask 523264   ;;  %vm80_vm1 = vcmask 1047556   ;;  %s121_s8 = smov 64   ;;  %s198_s0 = inlined_call_operand.vmem [shape: f32[1,2,1024], index: 0, kind: input, shape index: {}]   ;;  %s199_s1 = inlined_call_operand.vmem [shape: f32[32,64], index: 1, kind: output, shape index: {}]  }
   0x1   :  { %v104_v0 = vld [vmem:[%s198_s0 + $0xe] sm:$0x3]  ;;  %v105_v1 = vld [vmem:[%s198_s0 + $0xc] sm:$0x3]  ;;  %v106_v2 = vld [vmem:[%s198_s0 + $0xa] sm:$0x3] }
   0x2   :  { %8 = vst [vmem:[#allocation0 + $0x38] sm:$0x3] %v104_v0  ;;  %13 = vst [vmem:[#allocation0 + $0x30] sm:$0x3] %v105_v1  ;;  %v107_v3 = vld [vmem:[%s198_s0 + $0x8] sm:$0x3] }
   0x3   :  { %18 = vst [vmem:[#allocation0 + $0x28] sm:$0x3] %v106_v2  ;;  %v108_v4 = vld [vmem:[%s198_s0 + $0x6] sm:$0x3]  ;;  %v109_v5 = vld [vmem:[%s198_s0 + $0x4] sm:$0x3] }
   0x4   :  { %23 = vst [vmem:[#allocation0 + $0x20] sm:$0x3] %v107_v3  ;;  %28 = vst [vmem:[#allocation0 + $0x18] sm:$0x3] %v108_v4  ;;  %v110_v6 = vld [vmem:[%s198_s0 + $0x2] sm:$0x3] }
   0x5   :  { %33 = vst [vmem:[#allocation0 + $0x10] sm:$0x3] %v109_v5  ;;  %v38_v7 = vld [vmem:[%s198_s0] sm:$0x3]  ;;  %37 = vst [vmem:[#allocation0 + $0x8] sm:$0x3] %v110_v6 }
   0x6   :  { %39 = vst [vmem:[#allocation0] sm:$0x3] %v38_v7 }
   0x9   :  { %v69_v9 = vld [vmem:[#allocation0 + $0x30] sm:$0x3]   ;;  %v74_v10 = vld [vmem:[#allocation0 + $0x38] sm:$0x3]  }
   0xa   :  { %v64_v8 = vld [vmem:[#allocation0 + $0x28] sm:$0x3]   ;;  %116 = vst.msk [vmem:[%s199_s1 + $0xc] ss:$16 sm:$0x3] %vm41_vm0, %v69_v9  }
   0xb   :  { %v54_v12 = vld [vmem:[#allocation0 + $0x18] sm:$0x3]   ;;  %v59_v13 = vld [vmem:[#allocation0 + $0x20] sm:$0x3]  }
   0xc   :  { %v49_v11 = vld [vmem:[#allocation0 + $0x10] sm:$0x3]   ;;  %115 = vst.msk [vmem:[%s199_s1 + $0xa] ss:$16 sm:$0x3] %vm41_vm0, %v64_v8  }
   0xd   :  { %117 = vst.msk [vmem:[%s199_s1 + $0xe] ss:$16 sm:$0x3] %vm41_vm0, %v74_v10   ;;  %v40_v14 = vld [vmem:[#allocation0] sm:$0x3]  }
   0xe   :  { %v44_v15 = vld [vmem:[#allocation0 + $0x8] sm:$0x3]   ;;  %112 = vst.msk [vmem:[%s199_s1 + $0x4] ss:$16 sm:$0x3] %vm41_vm0, %v49_v11  }
   0xf   :  { %113 = vst.msk [vmem:[%s199_s1 + $0x6] ss:$16 sm:$0x3] %vm41_vm0, %v54_v12   ;;  %114 = vst.msk [vmem:[%s199_s1 + $0x8] ss:$16 sm:$0x3] %vm41_vm0, %v59_v13  }
  0x10   :  { %42 = vst.msk [vmem:[%s199_s1] ss:$16 sm:$0x3] %vm41_vm0, %v40_v14   ;;  %111 = vst.msk [vmem:[%s199_s1 + $0x2] ss:$16 sm:$0x3] %vm41_vm0, %v44_v15  }
  0x11   :  { %v78_v16 = vld [vmem:[#allocation0] ss:$8 sm:$0xf]   ;;  %v88_v19 = vld [vmem:[#allocation0 + $0x1] ss:$8 sm:$0xf]  }
  0x12   :  { %v79_v17 = vld [vmem:[#allocation0] ss:$8 sm:$0xf0]   ;;  %v90_v20 = vld [vmem:[#allocation0 + $0x1] ss:$8 sm:$0xf0]  }
  0x13   :  { %v81_v18 = vsel %vm80_vm1, %v79_v17, %v78_v16  ;;  %v92_v21 = vsel %vm80_vm1, %v90_v20, %v88_v19 }
  0x14   :  { %82 = vrot.lane.b32.xlu0 %v81_v18, %s121_s8 }
  0x18   :  { %93 = vrot.lane.b32.xlu0 %v92_v21, %s121_s8 }
  0x86   :  { %v83_v22 = vpop.permute.xlu0 %82  }
  0x87   :  { %118 = vst.msk [vmem:[%s199_s1 + $0x1] ss:$2 sm:$0xff] %vm41_vm0, %v83_v22  }
  0x8a   :  { %v94_v23 = vpop.permute.xlu0 %93  }
  0x8b   :  { %119 = vst.msk [vmem:[%s199_s1 + $0x11] ss:$2 sm:$0xff] %vm41_vm0, %v94_v23  }

// kernel: generator_forward.13
= control target key start
LH: loop header
LB: loop body
LE: loop exit
PB: predicated region body
PF: predicated region fallthrough
CT: control target
= control target key end

     0   :  { %s764_s9 = smov 0   ;;  %s766_s10 = smov 0   ;;  %s850_s0 = inlined_call_operand.vmem [shape: bf16[1,8,128], index: 0, kind: input, shape index: {}]   ;;  %s851_s1 = inlined_call_operand.vmem [shape: bf16[1,128,1024], index: 1, kind: input, shape index: {}]   ;;  %s852_s2 = inlined_call_operand.vmem [shape: f32[1,8,1024], index: 2, kind: output, shape index: {}]  }
   0x1   :  { %s768_s11 = smov 0   ;;  %s770_s12 = smov 0  }
   0x2   :  { %s772_s13 = smov 0  }
   0x3 LB: > { %s30_s14 = sadd.s32 1, %s742_s12  ;;  %p86_p1 = scmp.ne.s32.totalorder %s734_s10, %s730_s9  ;;  %s746_s13 = sphi %s772_s13, %s12_s13   ;;  %s742_s12 = sphi %s770_s12, %s856_s12   ;;  %s738_s11 = sphi %s768_s11, %s855_s11   ;;  %s734_s10 = sphi %s766_s10, %s854_s10   ;;  %s730_s9 = sphi %s764_s9, %s853_s9  }
   0x4   : > { %p32_p0 = scmp.ge.s32.totalorder %s30_s14, 4  ;;  %p87_p2 = scmp.eq.s32.totalorder %s746_s13, 0 }
   0x5   : > { %s79_s16 = sadd.s32 1, %s734_s10  ;;  %p616_p5 = scmp.ge.s32.totalorder %s746_s13, 4 }
   0x6   : > { %s858_s14 = smov (%p32_p0, %s30_s14), 0  ;;  %p88_p3 = por %p87_p2, %p86_p1 }
   0x7   : > { %s75_s15 = ssub.s32 %s742_s12, %s858_s14  ;;  %155 = sbr.rel (%p616_p5) target bundleno = 34 (0x22), region = 20 }
   0x8   : > { %p77_p4 = scmp.eq.s32.totalorder %s75_s15, 0 }
   0xa   : > { %s799_s17 = scalar_select %p77_p4, %s734_s10, %s79_s16  }
   0xe   : > { %158 = sbr.rel (!%p88_p3) target bundleno = 34 (0x22), region = 24  ;;  %s160_s18 = sand.u32 (%p88_p3), 1, %s734_s10  }
   0xf   : > { %s642_s19 = sshll.u32 (%p88_p3), %s742_s12, 3  ;;  %s617_s20 = sshll.u32 (%p88_p3), %s160_s18, 7 }
  0x10   : > { %s807_s23 = scalar_lea.vmem (%p88_p3), %s851_s1, %s642_s19  ;;  %s162_s24 = scalar_lea.vmem (%p88_p3), [#allocation2], %s617_s20 }
  0x11   : > { %v228_v0 = vld [vmem:[%s807_s23] sm:$0xff] (%p88_p3) }
  0x12   : > { %v230_v1 = vld [vmem:[%s807_s23 + $0x20] sm:$0xff] (%p88_p3)  ;;  %229 = vst [vmem:[%s162_s24] sm:$0xff] (%p88_p3), %v228_v0 }
  0x13   : > { %v232_v2 = vld [vmem:[%s807_s23 + $0x40] sm:$0xff] (%p88_p3)  ;;  %231 = vst [vmem:[%s162_s24 + $0x8] sm:$0xff] (%p88_p3), %v230_v1 }
  0x14   : > { %233 = vst [vmem:[%s162_s24 + $0x10] sm:$0xff] (%p88_p3), %v232_v2  ;;  %v234_v3 = vld [vmem:[%s807_s23 + $0x60] sm:$0xff] (%p88_p3) }
  0x15   : > { %v236_v4 = vld [vmem:[%s807_s23 + $0x80] sm:$0xff]  ;;  %235 = vst [vmem:[%s162_s24 + $0x18] sm:$0xff] %v234_v3 }
  0x16   : > { %v238_v5 = vld [vmem:[%s807_s23 + $0xa0] sm:$0xff]  ;;  %237 = vst [vmem:[%s162_s24 + $0x20] sm:$0xff] %v236_v4 }
  0x17   : > { %239 = vst [vmem:[%s162_s24 + $0x28] sm:$0xff] %v238_v5  ;;  %v240_v6 = vld [vmem:[%s807_s23 + $0xc0] sm:$0xff] }
  0x18   : > { %v242_v7 = vld [vmem:[%s807_s23 + $0xe0] sm:$0xff]  ;;  %241 = vst [vmem:[%s162_s24 + $0x30] sm:$0xff] %v240_v6 }
  0x19   : > { %v244_v8 = vld [vmem:[%s807_s23 + $0x100] sm:$0xff]  ;;  %243 = vst [vmem:[%s162_s24 + $0x38] sm:$0xff] %v242_v7 }
  0x1a   : > { %245 = vst [vmem:[%s162_s24 + $0x40] sm:$0xff] %v244_v8  ;;  %v246_v9 = vld [vmem:[%s807_s23 + $0x120] sm:$0xff] }
  0x1b   : > { %v248_v10 = vld [vmem:[%s807_s23 + $0x140] sm:$0xff]  ;;  %247 = vst [vmem:[%s162_s24 + $0x48] sm:$0xff] %v246_v9 }
  0x1c   : > { %v250_v11 = vld [vmem:[%s807_s23 + $0x160] sm:$0xff]  ;;  %249 = vst [vmem:[%s162_s24 + $0x50] sm:$0xff] %v248_v10 }
  0x1d   : > { %251 = vst [vmem:[%s162_s24 + $0x58] sm:$0xff] %v250_v11  ;;  %v252_v12 = vld [vmem:[%s807_s23 + $0x180] sm:$0xff] }
  0x1e   : > { %v254_v13 = vld [vmem:[%s807_s23 + $0x1a0] sm:$0xff]  ;;  %253 = vst [vmem:[%s162_s24 + $0x60] sm:$0xff] %v252_v12 }
  0x1f   : > { %v256_v14 = vld [vmem:[%s807_s23 + $0x1c0] sm:$0xff]  ;;  %255 = vst [vmem:[%s162_s24 + $0x68] sm:$0xff] %v254_v13 }
  0x20   : > { %257 = vst [vmem:[%s162_s24 + $0x70] sm:$0xff] %v256_v14  ;;  %v258_v15 = vld [vmem:[%s807_s23 + $0x1e0] sm:$0xff] }
  0x21   : > { %259 = vst [vmem:[%s162_s24 + $0x78] sm:$0xff] %v258_v15 }
  0x22 PF: > { %p620_p6 = scmp.ge.s32.totalorder %s746_s13, 1  ;;  %p264_p7 = scmp.lt.s32.totalorder %s746_s13, 5 }
  0x24   : > { %p265_p8 = pnand %p620_p6, %p264_p7 }
  0x25   : > { %s271_s25 = sand.u32 (!%p265_p8), 1, %s730_s9   ;;  %v748_v16 = vmov (!%p265_p8), 0   ;;  %v337_v33 = vld [vmem:[%s850_s0] sm:$0xf] (!%p265_p8)  ;;  %s622_s30 = sshll.u32 (!%p265_p8), %s738_s11, 1 }
  0x26   : > { %268 = sbr.rel (%p265_p8) target bundleno = 288 (0x120), region = 62  ;;  %s621_s26 = sshll.u32 (!%p265_p8), %s271_s25, 7  ;;  %466 = vmatprep.mubr.bf16.mxu0 (!%p265_p8), %v748_v16 }
  0x27   : > { %s273_s27 = scalar_lea.vmem (!%p265_p8), [#allocation2], %s621_s26  ;;  %p327_p9 = scmp.lt.s32.totalorder (!%p265_p8), %s622_s30, 7 }
  0x28   : > { %v684_v17 = vld [vmem:[%s273_s27 + $0x4] ss:$8 sps:$4 sm:$0xff] (!%p265_p8)   ;;  %v686_v18 = vld [vmem:[%s273_s27] ss:$8 sps:$4 sm:$0xff] (!%p265_p8)   ;;  %v687_v19 = vld [vmem:[%s273_s27 + $0x14] ss:$8 sps:$4 sm:$0xff] (!%p265_p8)  }
  0x29   : > { %434 = vmatprep.subr.bf16.mxu0 (!%p265_p8), %v684_v17  ;;  %v689_v20 = vld [vmem:[%s273_s27 + $0x10] ss:$8 sps:$4 sm:$0xff] (!%p265_p8)   ;;  %v690_v21 = vld [vmem:[%s273_s27 + $0x24] ss:$8 sps:$4 sm:$0xff] (!%p265_p8)   ;;  %v692_v22 = vld [vmem:[%s273_s27 + $0x20] ss:$8 sps:$4 sm:$0xff] (!%p265_p8)  }
  0x2a   : > { %435 = vmatpush1.bf16.msra.mxu0 (!%p265_p8), %v686_v18  ;;  %v693_v23 = vld [vmem:[%s273_s27 + $0x34] ss:$8 sps:$4 sm:$0xff] (!%p265_p8)   ;;  %v695_v24 = vld [vmem:[%s273_s27 + $0x30] ss:$8 sps:$4 sm:$0xff] (!%p265_p8)   ;;  %v696_v25 = vld [vmem:[%s273_s27 + $0x44] ss:$8 sps:$4 sm:$0xff] (!%p265_p8)  }
  0x2b   : > { %436 = vmatprep.subr.bf16.mxu0 (!%p265_p8), %v687_v19  ;;  %v698_v26 = vld [vmem:[%s273_s27 + $0x40] ss:$8 sps:$4 sm:$0xff] (!%p265_p8)   ;;  %v699_v27 = vld [vmem:[%s273_s27 + $0x54] ss:$8 sps:$4 sm:$0xff] (!%p265_p8)   ;;  %v701_v28 = vld [vmem:[%s273_s27 + $0x50] ss:$8 sps:$4 sm:$0xff] (!%p265_p8)  }
  0x2c   : > { %v702_v29 = vld [vmem:[%s273_s27 + $0x64] ss:$8 sps:$4 sm:$0xff] (!%p265_p8)   ;;  %v704_v30 = vld [vmem:[%s273_s27 + $0x60] ss:$8 sps:$4 sm:$0xff] (!%p265_p8)   ;;  %v705_v31 = vld [vmem:[%s273_s27 + $0x74] ss:$8 sps:$4 sm:$0xff] (!%p265_p8)  }
  0x2d   : > { %v707_v32 = vld [vmem:[%s273_s27 + $0x70] ss:$8 sps:$4 sm:$0xff]   ;;  %s860_s30 = smov (!%p327_p9, %s622_s30), 7 }
  0x2e   : > { %437 = vmatpush1.bf16.msra.mxu0 %v689_v20  ;;  %s623_s3 = sshll.u32 %s860_s30, 3 }
  0x2f   : > { %438 = vmatprep.subr.bf16.mxu0 %v690_v21  ;;  %s334_s6 = scalar_lea.vmem %s852_s2, %s623_s3 }
  0x32   : > { %439 = vmatpush1.bf16.msra.mxu0 %v692_v22 }
  0x33   : > { %440 = vmatprep.subr.bf16.mxu0 %v693_v23 }
  0x36   : > { %441 = vmatpush1.bf16.msra.mxu0 %v695_v24 }
  0x37   : > { %442 = vmatprep.subr.bf16.mxu0 %v696_v25 }
  0x3a   : > { %443 = vmatpush1.bf16.msra.mxu0 %v698_v26 }
  0x3b   : > { %444 = vmatprep.subr.bf16.mxu0 %v699_v27 }
  0x3e   : > { %445 = vmatpush1.bf16.msra.mxu0 %v701_v28 }
  0x3f   : > { %446 = vmatprep.subr.bf16.mxu0 %v702_v29 }
  0x42   : > { %447 = vmatpush1.bf16.msra.mxu0 %v704_v30 }
  0x43   : > { %448 = vmatprep.subr.bf16.mxu0 %v705_v31 }
  0x46   : > { %449 = vmatpush1.bf16.msra.mxu0 %v707_v32 }
  0x49   : > { %467 = vmatmul.mubr.bf16.vlgmr.msra.gmra.mrb[0].mxu0 %v337_v33 }
 0x11c   : > { %v468_v34 = vpop.f32.mrb[0].mxu0 }
 0x11d   : > { %475 = vst [vmem:[%s334_s6] sm:$0xff] %v468_v34  ;;  %v470_v35 = vpop.f32.mrb[1].mxu0 }
 0x11e   : > { %476 = vst [vmem:[%s334_s6 + $0x8] sm:$0xff] %v470_v35  ;;  %v472_v36 = vpop.f32.mrb[2].mxu0 }
 0x11f   : > { %v473_v37 = vpop.f32.mrb[3].mxu0 }
 0x120 PF: > { %s12_s13 = sadd.s32 1, %s746_s13   ;;  %s853_s9 = smov %s734_s10 }
 0x121   : > { %p9_p10 = scmp.ge.s32.totalorder %s12_s13, 6   ;;  %s854_s10 = smov %s799_s17 }
 0x122   : > { %s855_s11 = smov %s742_s12  ;;  %s856_s12 = smov %s858_s14 }
 0x123   :  { %11 = sbr.rel (!%p9_p10) target bundleno = 3 (0x3), region = 104 }

// kernel: generator_forward.14
= control target key start
LH: loop header
LB: loop body
LE: loop exit
PB: predicated region body
PF: predicated region fallthrough
CT: control target
= control target key end

     0   :  { %s133_s0 = inlined_call_operand.vmem [shape: f32[32,128], index: 0, kind: input, shape index: {}]   ;;  %s134_s1 = inlined_call_operand.vmem [shape: f32[1,128], index: 1, kind: input, shape index: {}]   ;;  %s135_s2 = inlined_call_operand.vmem [shape: f32[1,128], index: 2, kind: input, shape index: {}]   ;;  %s136_s3 = inlined_call_operand.vmem [shape: bf16[32,128], index: 3, kind: output, shape index: {}]  }
   0x1   :  { %v14_v0 = vld [vmem:[%s133_s0] sm:$0xff]  ;;  %v15_v1 = vld [vmem:[%s133_s0 + $0x8] sm:$0xff]  ;;  %v16_v6 = vld [vmem:[%s133_s0 + $0x10] sm:$0xff] }
   0x2   :  { %v68_v2 = vld [vmem:[%s134_s1] ss:$0 sm:$0xff]  ;;  %v17_v7 = vld [vmem:[%s133_s0 + $0x18] sm:$0xff] }
   0x3   :  { %v25_v3 = vmul.f32 %v68_v2, %v14_v0  ;;  %v26_v4 = vmul.f32 %v68_v2, %v15_v1  ;;  %v69_v5 = vld [vmem:[%s135_s2] ss:$0 sm:$0xff]  ;;  %v27_v8 = vmul.f32 %v68_v2, %v16_v6  ;;  %v28_v9 = vmul.f32 %v68_v2, %v17_v7 }
   0x5   :  { %v36_v10 = vadd.f32 %v69_v5, %v25_v3  ;;  %v37_v11 = vadd.f32 %v69_v5, %v26_v4  ;;  %v38_v12 = vadd.f32 %v69_v5, %v27_v8  ;;  %v39_v13 = vadd.f32 %v69_v5, %v28_v9 }
   0x7   :  { %v40_v14 = vmax.f32 %v36_v10, 0.0  ;;  %v41_v15 = vmax.f32 %v37_v11, 0.0  ;;  %v42_v16 = vmax.f32 %v38_v12, 0.0  ;;  %v43_v17 = vmax.f32 %v39_v13, 0.0 }
   0x9   :  { %v81_v18 = vpack.c.bf16 %v41_v15, %v40_v14  ;;  %v86_v19 = vpack.c.bf16 %v43_v17, %v42_v16 }
   0xb   :  { %82 = vst [vmem:[%s136_s3] sm:$0xff] %v81_v18   ;;  %88 = vst [vmem:[%s136_s3 + $0x8] sm:$0xff] %v86_v19  }

// kernel: generator_forward.15
= control target key start
LH: loop header
LB: loop body
LE: loop exit
PB: predicated region body
PF: predicated region fallthrough
CT: control target
= control target key end

     0   :  { %s772_s9 = smov 0   ;;  %s774_s10 = smov 0   ;;  %s834_s0 = inlined_call_operand.vmem [shape: bf16[4,32,256], index: 0, kind: input, shape index: {}]   ;;  %s835_s1 = inlined_call_operand.vmem [shape: bf16[4,256,128], index: 1, kind: input, shape index: {}]   ;;  %s836_s2 = inlined_call_operand.vmem [shape: f32[4,32,128], index: 2, kind: output, shape index: {}]  }
   0x1   :  { %s776_s11 = smov 0  }
   0x2 LB: > { %s38_s12 = sadd.s32 1, %s751_s10  ;;  %p611_p0 = scmp.ge.s32.totalorder %s755_s11, 1  ;;  %s755_s11 = sphi %s776_s11, %s12_s11   ;;  %s751_s10 = sphi %s774_s10, %s838_s10   ;;  %s747_s9 = sphi %s772_s9, %s837_s9  }
   0x3   : > { %p40_p1 = scmp.ge.s32.totalorder %s38_s12, 4  ;;  %p179_p2 = scmp.lt.s32.totalorder %s755_s11, 5 }
   0x5   : > { %s840_s12 = smov (%p40_p1, %s38_s12), 0  ;;  %p180_p3 = pnand %p611_p0, %p179_p2 }
   0x6   : > { %p231_p4 = scmp.lt.s32.totalorder (!%p180_p3), %s747_s9, 3 }
   0x7   : > { %183 = sbr.rel (%p180_p3) target bundleno = 268 (0x10c), region = 28 }
   0xe   : > { %s842_s9 = smov (!%p231_p4, %s747_s9), 3 }
   0xf   : > { %s641_s13 = sshll.u32 %s842_s9, 7  ;;  %s640_s17 = sshll.u32 %s842_s9, 5 }
  0x10   : > { %s796_s16 = scalar_lea.vmem %s835_s1, %s641_s13  ;;  %s242_s20 = scalar_lea.vmem %s834_s0, %s640_s17 }
  0x11   : > { %v711_v0 = vld [vmem:[%s796_s16 + $0x40] sm:$0xff]   ;;  %v713_v2 = vld [vmem:[%s796_s16 + $0x48] sm:$0xff]   ;;  %v715_v4 = vld [vmem:[%s796_s16 + $0x50] sm:$0xff]   ;;  %s269_s23 = scalar_lea.vmem %s836_s2, %s640_s17 }
  0x12   : > { %v712_v1 = vld [vmem:[%s796_s16] sm:$0xff]   ;;  %643 = vmatprep.subr.bf16.mxu0 %v711_v0  ;;  %671 = vmatprep.subr.bf16.mxu1 %v711_v0  ;;  %v714_v3 = vld [vmem:[%s796_s16 + $0x8] sm:$0xff]   ;;  %v716_v5 = vld [vmem:[%s796_s16 + $0x10] sm:$0xff]  }
  0x13   : > { %644 = vmatpush3.bf16.msra.mxu0 %v712_v1  ;;  %679 = vmatpush3.bf16.msra.mxu1 %v712_v1  ;;  %v717_v6 = vld [vmem:[%s796_s16 + $0x58] sm:$0xff]   ;;  %v719_v8 = vld [vmem:[%s796_s16 + $0x60] sm:$0xff]   ;;  %v721_v10 = vld [vmem:[%s796_s16 + $0x68] sm:$0xff]  }
  0x14   : > { %645 = vmatprep.subr.bf16.mxu0 %v713_v2  ;;  %672 = vmatprep.subr.bf16.mxu1 %v713_v2  ;;  %v718_v7 = vld [vmem:[%s796_s16 + $0x18] sm:$0xff]   ;;  %v720_v9 = vld [vmem:[%s796_s16 + $0x20] sm:$0xff]   ;;  %v722_v13 = vld [vmem:[%s796_s16 + $0x28] sm:$0xff]  }
  0x15   : > { %v729_v11 = vld [vmem:[%s242_s20 + $0x4] ss:$8 sps:$4 sm:$0xff]   ;;  %v732_v12 = vld [vmem:[%s242_s20 + $0x14] ss:$8 sps:$4 sm:$0xff]   ;;  %v727_v18 = vld [vmem:[%s242_s20] ss:$8 sps:$4 sm:$0xff]  }
  0x16   : > { %v723_v14 = vld [vmem:[%s796_s16 + $0x70] sm:$0xff]   ;;  %456 = vmatprep.mubr.bf16.mxu0 %v729_v11  ;;  %464 = vmatprep.mubr.bf16.mxu1 %v732_v12  ;;  %v725_v16 = vld [vmem:[%s796_s16 + $0x78] sm:$0xff]  }
  0x17   : > { %646 = vmatpush3.bf16.msra.mxu0 %v714_v3  ;;  %680 = vmatpush3.bf16.msra.mxu1 %v714_v3  ;;  %v724_v15 = vld [vmem:[%s796_s16 + $0x30] sm:$0xff]   ;;  %v726_v17 = vld [vmem:[%s796_s16 + $0x38] sm:$0xff]  }
  0x18   : > { %647 = vmatprep.subr.bf16.mxu0 %v715_v4  ;;  %673 = vmatprep.subr.bf16.mxu1 %v715_v4  ;;  %v730_v19 = vld [vmem:[%s242_s20 + $0x10] ss:$8 sps:$4 sm:$0xff]  }
  0x1b   : > { %648 = vmatpush3.bf16.msra.mxu0 %v716_v5  ;;  %681 = vmatpush3.bf16.msra.mxu1 %v716_v5 }
  0x1c   : > { %649 = vmatprep.subr.bf16.mxu0 %v717_v6  ;;  %674 = vmatprep.subr.bf16.mxu1 %v717_v6 }
  0x1f   : > { %650 = vmatpush3.bf16.msra.mxu0 %v718_v7  ;;  %682 = vmatpush3.bf16.msra.mxu1 %v718_v7 }
  0x20   : > { %651 = vmatprep.subr.bf16.mxu0 %v719_v8  ;;  %675 = vmatprep.subr.bf16.mxu1 %v719_v8 }
  0x23   : > { %652 = vmatpush3.bf16.msra.mxu0 %v720_v9  ;;  %683 = vmatpush3.bf16.msra.mxu1 %v720_v9 }
  0x24   : > { %653 = vmatprep.subr.bf16.mxu0 %v721_v10  ;;  %676 = vmatprep.subr.bf16.mxu1 %v721_v10 }
  0x27   : > { %654 = vmatpush3.bf16.msra.mxu0 %v722_v13  ;;  %684 = vmatpush3.bf16.msra.mxu1 %v722_v13 }
  0x28   : > { %655 = vmatprep.subr.bf16.mxu0 %v723_v14  ;;  %677 = vmatprep.subr.bf16.mxu1 %v723_v14 }
  0x2b   : > { %656 = vmatpush3.bf16.msra.mxu0 %v724_v15  ;;  %685 = vmatpush3.bf16.msra.mxu1 %v724_v15 }
  0x2c   : > { %657 = vmatprep.subr.bf16.mxu0 %v725_v16  ;;  %678 = vmatprep.subr.bf16.mxu1 %v725_v16 }
  0x2f   : > { %658 = vmatpush3.bf16.msra.mxu0 %v726_v17  ;;  %686 = vmatpush3.bf16.msra.mxu1 %v726_v17 }
  0x32   : > { %457 = vmatmul.mubr.bf16.vlgmr.msra.gmra.mrb[0].mxu0 %v727_v18  ;;  %465 = vmatmul.mubr.bf16.vlgmr.msra.gmra.mrb[0].mxu1 %v730_v19 }
 0x105   : > { %v659_v20 = vpop.f32.mrb[0].mxu0  ;;  %v665_v21 = vpop.f32.mrb[0].mxu1 }
 0x106   : > { %v660_v22 = vpop.f32.mrb[1].mxu0  ;;  %v666_v23 = vpop.f32.mrb[1].mxu1 }
 0x107   : > { %v661_v24 = vadd.f32 %v660_v22, %v659_v20  ;;  %v667_v25 = vadd.f32 %v666_v23, %v665_v21  ;;  %v662_v26 = vpop.f32.mrb[2].mxu0  ;;  %v668_v27 = vpop.f32.mrb[2].mxu1 }
 0x108   : > { %v663_v28 = vpop.f32.mrb[3].mxu0  ;;  %v669_v29 = vpop.f32.mrb[3].mxu1 }
 0x109   : > { %473 = vst [vmem:[%s269_s23] sm:$0xff] %v661_v24  ;;  %475 = vst [vmem:[%s269_s23 + $0x10] sm:$0xff] %v667_v25  ;;  %v664_v30 = vadd.f32 %v663_v28, %v662_v26  ;;  %v670_v31 = vadd.f32 %v669_v29, %v668_v27 }
 0x10b   : > { %474 = vst [vmem:[%s269_s23 + $0x8] sm:$0xff] %v664_v30  ;;  %476 = vst [vmem:[%s269_s23 + $0x18] sm:$0xff] %v670_v31 }
 0x10c PF: > { %s12_s11 = sadd.s32 1, %s755_s11   ;;  %s837_s9 = smov %s751_s10 }
 0x10d   : > { %p9_p5 = scmp.ge.s32.totalorder %s12_s11, 6   ;;  %s838_s10 = smov %s840_s12 }
 0x10f   :  { %11 = sbr.rel (!%p9_p5) target bundleno = 2 (0x2), region = 61 }

// kernel: generator_forward.16
= control target key start
LH: loop header
LB: loop body
LE: loop exit
PB: predicated region body
PF: predicated region fallthrough
CT: control target
= control target key end

     0   :  { %s391_s0 = inlined_call_operand.vmem [shape: f32[128,128], index: 0, kind: input, shape index: {}]   ;;  %s392_s1 = inlined_call_operand.vmem [shape: f32[1,128], index: 1, kind: input, shape index: {}]   ;;  %s393_s2 = inlined_call_operand.vmem [shape: f32[1,128], index: 2, kind: input, shape index: {}]   ;;  %s394_s3 = inlined_call_operand.vmem [shape: bf16[128,128], index: 3, kind: output, shape index: {}]  }
   0x1   :  { %v14_v0 = vld [vmem:[%s391_s0] sm:$0xff]  ;;  %v15_v1 = vld [vmem:[%s391_s0 + $0x8] sm:$0xff]  ;;  %v16_v6 = vld [vmem:[%s391_s0 + $0x10] sm:$0xff] }
   0x2   :  { %v286_v2 = vld [vmem:[%s392_s1] ss:$0 sm:$0xff]  ;;  %v17_v7 = vld [vmem:[%s391_s0 + $0x18] sm:$0xff]  ;;  %v19_v11 = vld [vmem:[%s391_s0 + $0x28] sm:$0xff] }
   0x3   :  { %v37_v3 = vmul.f32 %v286_v2, %v14_v0  ;;  %v38_v4 = vmul.f32 %v286_v2, %v15_v1  ;;  %v293_v5 = vld [vmem:[%s393_s2] ss:$0 sm:$0xff]  ;;  %v39_v8 = vmul.f32 %v286_v2, %v16_v6  ;;  %v40_v9 = vmul.f32 %v286_v2, %v17_v7  ;;  %v20_v12 = vld [vmem:[%s391_s0 + $0x30] sm:$0xff]  ;;  %v21_v17 = vld [vmem:[%s391_s0 + $0x38] sm:$0xff] }
   0x4   :  { %v18_v10 = vld [vmem:[%s391_s0 + $0x20] sm:$0xff]  ;;  %v42_v16 = vmul.f32 %v286_v2, %v19_v11  ;;  %v43_v20 = vmul.f32 %v286_v2, %v20_v12  ;;  %v44_v21 = vmul.f32 %v286_v2, %v21_v17  ;;  %v23_v27 = vld [vmem:[%s391_s0 + $0x48] sm:$0xff]  ;;  %v24_v32 = vld [vmem:[%s391_s0 + $0x50] sm:$0xff] }
   0x5   :  { %v60_v13 = vadd.f32 %v293_v5, %v37_v3  ;;  %v61_v14 = vadd.f32 %v293_v5, %v38_v4  ;;  %v41_v15 = vmul.f32 %v286_v2, %v18_v10  ;;  %v62_v18 = vadd.f32 %v293_v5, %v39_v8  ;;  %v22_v22 = vld [vmem:[%s391_s0 + $0x40] sm:$0xff]  ;;  %v25_v33 = vld [vmem:[%s391_s0 + $0x58] sm:$0xff]  ;;  %v27_v39 = vld [vmem:[%s391_s0 + $0x68] sm:$0xff] }
   0x6   :  { %v63_v19 = vadd.f32 %v293_v5, %v40_v9  ;;  %v65_v26 = vadd.f32 %v293_v5, %v42_v16  ;;  %v66_v30 = vadd.f32 %v293_v5, %v43_v20  ;;  %v67_v31 = vadd.f32 %v293_v5, %v44_v21  ;;  %v26_v38 = vld [vmem:[%s391_s0 + $0x60] sm:$0xff]  ;;  %v28_v44 = vld [vmem:[%s391_s0 + $0x70] sm:$0xff]  ;;  %v29_v49 = vld [vmem:[%s391_s0 + $0x78] sm:$0xff] }
   0x7   :  { %v76_v23 = vmax.f32 %v60_v13, 0.0  ;;  %v77_v24 = vmax.f32 %v61_v14, 0.0  ;;  %v64_v25 = vadd.f32 %v293_v5, %v41_v15  ;;  %v78_v28 = vmax.f32 %v62_v18, 0.0 }
   0x8   :  { %v79_v29 = vmax.f32 %v63_v19, 0.0  ;;  %v81_v36 = vmax.f32 %v65_v26, 0.0  ;;  %v45_v37 = vmul.f32 %v286_v2, %v22_v22  ;;  %v82_v41 = vmax.f32 %v66_v30, 0.0 }
   0x9   :  { %v213_v34 = vpack.c.bf16 %v77_v24, %v76_v23  ;;  %v80_v35 = vmax.f32 %v64_v25, 0.0  ;;  %v83_v42 = vmax.f32 %v67_v31, 0.0  ;;  %v46_v43 = vmul.f32 %v286_v2, %v23_v27 }
   0xa   :  { %v218_v40 = vpack.c.bf16 %v79_v29, %v78_v28  ;;  %v68_v46 = vadd.f32 %v293_v5, %v45_v37  ;;  %v47_v47 = vmul.f32 %v286_v2, %v24_v32  ;;  %v48_v48 = vmul.f32 %v286_v2, %v25_v33 }
   0xb   :  { %214 = vst [vmem:[%s394_s3] sm:$0xff] %v213_v34   ;;  %v223_v45 = vpack.c.bf16 %v81_v36, %v80_v35  ;;  %v228_v50 = vpack.c.bf16 %v83_v42, %v82_v41  ;;  %v69_v51 = vadd.f32 %v293_v5, %v46_v43  ;;  %v49_v52 = vmul.f32 %v286_v2, %v26_v38 }
   0xc   :  { %250 = vst [vmem:[%s394_s3 + $0x8] sm:$0xff] %v218_v40   ;;  %v50_v53 = vmul.f32 %v286_v2, %v27_v39  ;;  %v84_v54 = vmax.f32 %v68_v46, 0.0  ;;  %v70_v55 = vadd.f32 %v293_v5, %v47_v47  ;;  %v71_v56 = vadd.f32 %v293_v5, %v48_v48 }
   0xd   :  { %251 = vst [vmem:[%s394_s3 + $0x10] sm:$0xff] %v223_v45   ;;  %v51_v57 = vmul.f32 %v286_v2, %v28_v44  ;;  %252 = vst [vmem:[%s394_s3 + $0x18] sm:$0xff] %v228_v50   ;;  %v85_v58 = vmax.f32 %v69_v51, 0.0  ;;  %v72_v59 = vadd.f32 %v293_v5, %v49_v52  ;;  %v52_v61 = vmul.f32 %v286_v2, %v29_v49 }
   0xe   :  { %v73_v60 = vadd.f32 %v293_v5, %v50_v53  ;;  %v86_v62 = vmax.f32 %v70_v55, 0.0  ;;  %v87_v63 = vmax.f32 %v71_v56, 0.0 }
   0xf   :  { %v74_v0 = vadd.f32 %v293_v5, %v51_v57  ;;  %v233_v1 = vpack.c.bf16 %v85_v58, %v84_v54  ;;  %v88_v3 = vmax.f32 %v72_v59, 0.0  ;;  %v75_v6 = vadd.f32 %v293_v5, %v52_v61 }
  0x10   :  { %v89_v4 = vmax.f32 %v73_v60, 0.0  ;;  %v238_v7 = vpack.c.bf16 %v87_v63, %v86_v62 }
  0x11   :  { %v90_v8 = vmax.f32 %v74_v0, 0.0  ;;  %253 = vst [vmem:[%s394_s3 + $0x20] sm:$0xff] %v233_v1   ;;  %v91_v10 = vmax.f32 %v75_v6, 0.0 }
  0x12   :  { %v243_v9 = vpack.c.bf16 %v89_v4, %v88_v3  ;;  %254 = vst [vmem:[%s394_s3 + $0x28] sm:$0xff] %v238_v7  }
  0x13   :  { %v248_v2 = vpack.c.bf16 %v91_v10, %v90_v8 }
  0x14   :  { %255 = vst [vmem:[%s394_s3 + $0x30] sm:$0xff] %v243_v9  }
  0x15   :  { %256 = vst [vmem:[%s394_s3 + $0x38] sm:$0xff] %v248_v2  }

// kernel: generator_forward.17
= control target key start
LH: loop header
LB: loop body
LE: loop exit
PB: predicated region body
PF: predicated region fallthrough
CT: control target
= control target key end

     0   :  { %s807_s9 = smov 0   ;;  %s809_s10 = smov 0   ;;  %s885_s0 = inlined_call_operand.vmem [shape: bf16[4,128,128], index: 0, kind: input, shape index: {}]   ;;  %s886_s1 = inlined_call_operand.vmem [shape: bf16[4,128,128], index: 1, kind: input, shape index: {}]   ;;  %s887_s2 = inlined_call_operand.vmem [shape: f32[4,128,128], index: 2, kind: output, shape index: {}]  }
   0x1   :  { %s811_s11 = smov 0  }
   0x2 LB: > { %s38_s12 = sadd.s32 1, %s786_s10  ;;  %p636_p0 = scmp.ge.s32.totalorder %s790_s11, 1  ;;  %s790_s11 = sphi %s811_s11, %s12_s11   ;;  %s786_s10 = sphi %s809_s10, %s889_s10   ;;  %s782_s9 = sphi %s807_s9, %s888_s9  }
   0x3   : > { %p40_p1 = scmp.ge.s32.totalorder %s38_s12, 4  ;;  %p176_p2 = scmp.lt.s32.totalorder %s790_s11, 5 }
   0x5   : > { %s891_s12 = smov (%p40_p1, %s38_s12), 0  ;;  %p177_p3 = pnand %p636_p0, %p176_p2 }
   0x6   : > { %p225_p4 = scmp.lt.s32.totalorder (!%p177_p3), %s782_s9, 3 }
   0x7   : > { %180 = sbr.rel (%p177_p3) target bundleno = 274 (0x112), region = 28 }
   0xe   : > { %s893_s9 = smov (!%p225_p4, %s782_s9), 3 }
   0xf   : > { %s661_s13 = sshll.u32 %s893_s9, 6  ;;  %s663_s20 = sshll.u32 %s893_s9, 7 }
  0x10   : > { %s831_s16 = scalar_lea.vmem %s886_s1, %s661_s13  ;;  %s839_s19 = scalar_lea.vmem %s885_s0, %s661_s13 }
  0x11   : > { %v752_v0 = vld [vmem:[%s831_s16] sm:$0xff]   ;;  %v753_v1 = vld [vmem:[%s831_s16 + $0x8] sm:$0xff]   ;;  %v754_v2 = vld [vmem:[%s831_s16 + $0x10] sm:$0xff]   ;;  %s858_s23 = scalar_lea.vmem %s887_s2, %s663_s20 }
  0x12   : > { %680 = vmatprep.subr.bf16.mxu0 %v752_v0  ;;  %712 = vmatprep.subr.bf16.mxu1 %v752_v0  ;;  %v755_v3 = vld [vmem:[%s831_s16 + $0x18] sm:$0xff]   ;;  %v760_v4 = vld [vmem:[%s839_s19] sm:$0xff]   ;;  %v757_v7 = vld [vmem:[%s831_s16 + $0x28] sm:$0xff]  }
  0x13   : > { %681 = vmatpush3.bf16.msra.mxu0 %v752_v0  ;;  %720 = vmatpush3.bf16.msra.mxu1 %v752_v0  ;;  %v761_v5 = vld [vmem:[%s839_s19 + $0x20] sm:$0xff]   ;;  %v758_v8 = vld [vmem:[%s831_s16 + $0x30] sm:$0xff]   ;;  %v759_v9 = vld [vmem:[%s831_s16 + $0x38] sm:$0xff]  }
  0x14   : > { %682 = vmatprep.subr.bf16.mxu0 %v753_v1  ;;  %713 = vmatprep.subr.bf16.mxu1 %v753_v1  ;;  %v756_v6 = vld [vmem:[%s831_s16 + $0x20] sm:$0xff]   ;;  %v762_v10 = vld [vmem:[%s839_s19 + $0x8] sm:$0xff]   ;;  %v764_v12 = vld [vmem:[%s839_s19 + $0x10] sm:$0xff]  }
  0x15   : > { %696 = vmatprep.mubr.bf16.mxu0 %v760_v4  ;;  %704 = vmatprep.mubr.bf16.mxu1 %v761_v5  ;;  %v763_v11 = vld [vmem:[%s839_s19 + $0x28] sm:$0xff]   ;;  %v765_v13 = vld [vmem:[%s839_s19 + $0x30] sm:$0xff]   ;;  %v766_v14 = vld [vmem:[%s839_s19 + $0x18] sm:$0xff]  }
  0x16   : > { %v767_v15 = vld [vmem:[%s839_s19 + $0x38] sm:$0xff]  }
  0x17   : > { %683 = vmatpush3.bf16.msra.mxu0 %v753_v1  ;;  %721 = vmatpush3.bf16.msra.mxu1 %v753_v1 }
  0x18   : > { %684 = vmatprep.subr.bf16.mxu0 %v754_v2  ;;  %714 = vmatprep.subr.bf16.mxu1 %v754_v2 }
  0x1b   : > { %685 = vmatpush3.bf16.msra.mxu0 %v754_v2  ;;  %722 = vmatpush3.bf16.msra.mxu1 %v754_v2 }
  0x1c   : > { %686 = vmatprep.subr.bf16.mxu0 %v755_v3  ;;  %715 = vmatprep.subr.bf16.mxu1 %v755_v3 }
  0x1f   : > { %687 = vmatpush3.bf16.msra.mxu0 %v755_v3  ;;  %723 = vmatpush3.bf16.msra.mxu1 %v755_v3 }
  0x20   : > { %688 = vmatprep.subr.bf16.mxu0 %v756_v6  ;;  %716 = vmatprep.subr.bf16.mxu1 %v756_v6 }
  0x23   : > { %689 = vmatpush3.bf16.msra.mxu0 %v756_v6  ;;  %724 = vmatpush3.bf16.msra.mxu1 %v756_v6 }
  0x24   : > { %690 = vmatprep.subr.bf16.mxu0 %v757_v7  ;;  %717 = vmatprep.subr.bf16.mxu1 %v757_v7 }
  0x27   : > { %691 = vmatpush3.bf16.msra.mxu0 %v757_v7  ;;  %725 = vmatpush3.bf16.msra.mxu1 %v757_v7 }
  0x28   : > { %692 = vmatprep.subr.bf16.mxu0 %v758_v8  ;;  %718 = vmatprep.subr.bf16.mxu1 %v758_v8 }
  0x2b   : > { %693 = vmatpush3.bf16.msra.mxu0 %v758_v8  ;;  %726 = vmatpush3.bf16.msra.mxu1 %v758_v8 }
  0x2c   : > { %694 = vmatprep.subr.bf16.mxu0 %v759_v9  ;;  %719 = vmatprep.subr.bf16.mxu1 %v759_v9 }
  0x2f   : > { %695 = vmatpush3.bf16.msra.mxu0 %v759_v9  ;;  %727 = vmatpush3.bf16.msra.mxu1 %v759_v9 }
  0x32   : > { %697 = vmatmul.mubr.bf16.vlgmr.msra.gmra.mrb[0].mxu0 %v762_v10  ;;  %705 = vmatmul.mubr.bf16.vlgmr.msra.gmra.mrb[0].mxu1 %v763_v11 }
  0x33   : > { %700 = vmatprep.mubr.bf16.mxu0 %v764_v12  ;;  %708 = vmatprep.mubr.bf16.mxu1 %v765_v13 }
  0x3a   : > { %701 = vmatmul.mubr.bf16.gmra.mrb[4].mxu0 %v766_v14  ;;  %709 = vmatmul.mubr.bf16.gmra.mrb[4].mxu1 %v767_v15 }
 0x105   : > { %v698_v16 = vpop.f32.mrb[0].mxu0  ;;  %v706_v17 = vpop.f32.mrb[0].mxu1 }
 0x106   : > { %491 = vst [vmem:[%s858_s23 + $0x10] sm:$0xff] %v698_v16  ;;  %499 = vst [vmem:[%s858_s23 + $0x50] sm:$0xff] %v706_v17  ;;  %v426_v18 = vpop.f32.mrb[1].mxu0  ;;  %v458_v19 = vpop.f32.mrb[1].mxu1 }
 0x107   : > { %489 = vst [vmem:[%s858_s23] sm:$0xff] %v426_v18  ;;  %497 = vst [vmem:[%s858_s23 + $0x40] sm:$0xff] %v458_v19  ;;  %v699_v20 = vpop.f32.mrb[2].mxu0  ;;  %v707_v21 = vpop.f32.mrb[2].mxu1 }
 0x108   : > { %492 = vst [vmem:[%s858_s23 + $0x18] sm:$0xff] %v699_v20  ;;  %500 = vst [vmem:[%s858_s23 + $0x58] sm:$0xff] %v707_v21  ;;  %v429_v22 = vpop.f32.mrb[3].mxu0  ;;  %v461_v23 = vpop.f32.mrb[3].mxu1 }
 0x109   : > { %490 = vst [vmem:[%s858_s23 + $0x8] sm:$0xff] %v429_v22  ;;  %498 = vst [vmem:[%s858_s23 + $0x48] sm:$0xff] %v461_v23 }
 0x10d   : > { %v702_v24 = vpop.f32.mrb[4].mxu0  ;;  %v710_v25 = vpop.f32.mrb[4].mxu1 }
 0x10e   : > { %495 = vst [vmem:[%s858_s23 + $0x30] sm:$0xff] %v702_v24  ;;  %503 = vst [vmem:[%s858_s23 + $0x70] sm:$0xff] %v710_v25  ;;  %v442_v26 = vpop.f32.mrb[5].mxu0  ;;  %v474_v27 = vpop.f32.mrb[5].mxu1 }
 0x10f   : > { %493 = vst [vmem:[%s858_s23 + $0x20] sm:$0xff] %v442_v26  ;;  %501 = vst [vmem:[%s858_s23 + $0x60] sm:$0xff] %v474_v27  ;;  %v703_v28 = vpop.f32.mrb[6].mxu0  ;;  %v711_v29 = vpop.f32.mrb[6].mxu1 }
 0x110   : > { %496 = vst [vmem:[%s858_s23 + $0x38] sm:$0xff] %v703_v28  ;;  %504 = vst [vmem:[%s858_s23 + $0x78] sm:$0xff] %v711_v29  ;;  %v445_v30 = vpop.f32.mrb[7].mxu0  ;;  %v477_v31 = vpop.f32.mrb[7].mxu1 }
 0x111   : > { %494 = vst [vmem:[%s858_s23 + $0x28] sm:$0xff] %v445_v30  ;;  %502 = vst [vmem:[%s858_s23 + $0x68] sm:$0xff] %v477_v31 }
 0x112 PF: > { %s12_s11 = sadd.s32 1, %s790_s11   ;;  %s888_s9 = smov %s786_s10 }
 0x113   : > { %p9_p5 = scmp.ge.s32.totalorder %s12_s11, 6   ;;  %s889_s10 = smov %s891_s12 }
 0x115   :  { %11 = sbr.rel (!%p9_p5) target bundleno = 2 (0x2), region = 61 }

// kernel: generator_forward.18
= control target key start
LH: loop header
LB: loop body
LE: loop exit
PB: predicated region body
PF: predicated region fallthrough
CT: control target
= control target key end

     0   :  { %s1375_s0 = inlined_call_operand.vmem [shape: f32[512,128], index: 0, kind: input, shape index: {}]   ;;  %s1376_s1 = inlined_call_operand.vmem [shape: f32[1,128], index: 1, kind: input, shape index: {}]   ;;  %s1377_s2 = inlined_call_operand.vmem [shape: f32[1,128], index: 2, kind: input, shape index: {}]   ;;  %s1378_s3 = inlined_call_operand.vmem [shape: bf16[512,128], index: 3, kind: output, shape index: {}]  }
   0x1   :  { %v14_v0 = vld [vmem:[%s1375_s0] sm:$0xff]  ;;  %v15_v1 = vld [vmem:[%s1375_s0 + $0x8] sm:$0xff]  ;;  %v16_v6 = vld [vmem:[%s1375_s0 + $0x10] sm:$0xff] }
   0x2   :  { %v958_v2 = vld [vmem:[%s1376_s1] ss:$0 sm:$0xff]  ;;  %v17_v7 = vld [vmem:[%s1375_s0 + $0x18] sm:$0xff]  ;;  %v19_v11 = vld [vmem:[%s1375_s0 + $0x28] sm:$0xff] }
   0x3   :  { %v85_v3 = vmul.f32 %v958_v2, %v14_v0  ;;  %v86_v4 = vmul.f32 %v958_v2, %v15_v1  ;;  %v965_v5 = vld [vmem:[%s1377_s2] ss:$0 sm:$0xff]  ;;  %v87_v8 = vmul.f32 %v958_v2, %v16_v6  ;;  %v88_v9 = vmul.f32 %v958_v2, %v17_v7  ;;  %v20_v12 = vld [vmem:[%s1375_s0 + $0x30] sm:$0xff]  ;;  %v21_v17 = vld [vmem:[%s1375_s0 + $0x38] sm:$0xff] }
   0x4   :  { %v18_v10 = vld [vmem:[%s1375_s0 + $0x20] sm:$0xff]  ;;  %v90_v16 = vmul.f32 %v958_v2, %v19_v11  ;;  %v91_v20 = vmul.f32 %v958_v2, %v20_v12  ;;  %v92_v21 = vmul.f32 %v958_v2, %v21_v17  ;;  %v23_v27 = vld [vmem:[%s1375_s0 + $0x48] sm:$0xff]  ;;  %v24_v32 = vld [vmem:[%s1375_s0 + $0x50] sm:$0xff] }
   0x5   :  { %v156_v13 = vadd.f32 %v965_v5, %v85_v3  ;;  %v157_v14 = vadd.f32 %v965_v5, %v86_v4  ;;  %v89_v15 = vmul.f32 %v958_v2, %v18_v10  ;;  %v158_v18 = vadd.f32 %v965_v5, %v87_v8  ;;  %v22_v22 = vld [vmem:[%s1375_s0 + $0x40] sm:$0xff]  ;;  %v25_v33 = vld [vmem:[%s1375_s0 + $0x58] sm:$0xff]  ;;  %v27_v39 = vld [vmem:[%s1375_s0 + $0x68] sm:$0xff] }
   0x6   :  { %v159_v19 = vadd.f32 %v965_v5, %v88_v9  ;;  %v161_v26 = vadd.f32 %v965_v5, %v90_v16  ;;  %v162_v30 = vadd.f32 %v965_v5, %v91_v20  ;;  %v163_v31 = vadd.f32 %v965_v5, %v92_v21  ;;  %v26_v38 = vld [vmem:[%s1375_s0 + $0x60] sm:$0xff]  ;;  %v28_v44 = vld [vmem:[%s1375_s0 + $0x70] sm:$0xff]  ;;  %v29_v49 = vld [vmem:[%s1375_s0 + $0x78] sm:$0xff] }
   0x7   :  { %v220_v23 = vmax.f32 %v156_v13, 0.0  ;;  %v221_v24 = vmax.f32 %v157_v14, 0.0  ;;  %v160_v25 = vadd.f32 %v965_v5, %v89_v15  ;;  %v222_v28 = vmax.f32 %v158_v18, 0.0  ;;  %v30_v54 = vld [vmem:[%s1375_s0 + $0x80] sm:$0xff]  ;;  %v31_v63 = vld [vmem:[%s1375_s0 + $0x88] sm:$0xff]  ;;  %v32_v6 = vld [vmem:[%s1375_s0 + $0x90] sm:$0xff] }
   0x8   :  { %v223_v29 = vmax.f32 %v159_v19, 0.0  ;;  %v225_v36 = vmax.f32 %v161_v26, 0.0  ;;  %v93_v37 = vmul.f32 %v958_v2, %v22_v22  ;;  %v226_v41 = vmax.f32 %v162_v30, 0.0  ;;  %v33_v7 = vld [vmem:[%s1375_s0 + $0x98] sm:$0xff]  ;;  %v34_v12 = vld [vmem:[%s1375_s0 + $0xa0] sm:$0xff]  ;;  %v35_v13 = vld [vmem:[%s1375_s0 + $0xa8] sm:$0xff] }
   0x9   :  { %v741_v34 = vpack.c.bf16 %v221_v24, %v220_v23  ;;  %v224_v35 = vmax.f32 %v160_v25, 0.0  ;;  %v227_v42 = vmax.f32 %v163_v31, 0.0  ;;  %v94_v43 = vmul.f32 %v958_v2, %v23_v27  ;;  %v36_v18 = vld [vmem:[%s1375_s0 + $0xb0] sm:$0xff]  ;;  %v37_v23 = vld [vmem:[%s1375_s0 + $0xb8] sm:$0xff] }
   0xa   :  { %v746_v40 = vpack.c.bf16 %v223_v29, %v222_v28  ;;  %v164_v46 = vadd.f32 %v965_v5, %v93_v37  ;;  %v95_v47 = vmul.f32 %v958_v2, %v24_v32  ;;  %v96_v48 = vmul.f32 %v958_v2, %v25_v33  ;;  %v38_v28 = vld [vmem:[%s1375_s0 + $0xc0] sm:$0xff]  ;;  %v39_v37 = vld [vmem:[%s1375_s0 + $0xc8] sm:$0xff] }
   0xb   :  { %742 = vst [vmem:[%s1378_s3] sm:$0xff] %v741_v34   ;;  %v751_v45 = vpack.c.bf16 %v225_v36, %v224_v35  ;;  %v756_v50 = vpack.c.bf16 %v227_v42, %v226_v41  ;;  %v165_v51 = vadd.f32 %v965_v5, %v94_v43  ;;  %v97_v52 = vmul.f32 %v958_v2, %v26_v38  ;;  %v40_v42 = vld [vmem:[%s1375_s0 + $0xd0] sm:$0xff]  ;;  %v41_v43 = vld [vmem:[%s1375_s0 + $0xd8] sm:$0xff] }
   0xc   :  { %898 = vst [vmem:[%s1378_s3 + $0x8] sm:$0xff] %v746_v40   ;;  %v98_v53 = vmul.f32 %v958_v2, %v27_v39  ;;  %v228_v55 = vmax.f32 %v164_v46, 0.0  ;;  %v166_v56 = vadd.f32 %v965_v5, %v95_v47  ;;  %v167_v57 = vadd.f32 %v965_v5, %v96_v48  ;;  %v42_v48 = vld [vmem:[%s1375_s0 + $0xe0] sm:$0xff] }
   0xd   :  { %899 = vst [vmem:[%s1378_s3 + $0x10] sm:$0xff] %v751_v45   ;;  %v99_v58 = vmul.f32 %v958_v2, %v28_v44  ;;  %900 = vst [vmem:[%s1378_s3 + $0x18] sm:$0xff] %v756_v50   ;;  %v229_v59 = vmax.f32 %v165_v51, 0.0  ;;  %v168_v60 = vadd.f32 %v965_v5, %v97_v52  ;;  %v100_v62 = vmul.f32 %v958_v2, %v29_v49  ;;  %v43_v49 = vld [vmem:[%s1375_s0 + $0xe8] sm:$0xff] }
   0xe   :  { %v169_v61 = vadd.f32 %v965_v5, %v98_v53  ;;  %v230_v0 = vmax.f32 %v166_v56, 0.0  ;;  %v231_v1 = vmax.f32 %v167_v57, 0.0  ;;  %v101_v4 = vmul.f32 %v958_v2, %v30_v54  ;;  %v44_v54 = vld [vmem:[%s1375_s0 + $0xf0] sm:$0xff] }
   0xf   :  { %v170_v3 = vadd.f32 %v965_v5, %v99_v58  ;;  %v761_v8 = vpack.c.bf16 %v229_v59, %v228_v55  ;;  %v232_v9 = vmax.f32 %v168_v60, 0.0  ;;  %v171_v11 = vadd.f32 %v965_v5, %v100_v62  ;;  %v45_v59 = vld [vmem:[%s1375_s0 + $0xf8] sm:$0xff] }
  0x10   :  { %v233_v10 = vmax.f32 %v169_v61, 0.0  ;;  %v766_v14 = vpack.c.bf16 %v231_v1, %v230_v0  ;;  %v102_v16 = vmul.f32 %v958_v2, %v31_v63  ;;  %v172_v17 = vadd.f32 %v965_v5, %v101_v4  ;;  %v46_v0 = vld [vmem:[%s1375_s0 + $0x100] sm:$0xff] }
  0x11   :  { %v234_v15 = vmax.f32 %v170_v3, 0.0  ;;  %901 = vst [vmem:[%s1378_s3 + $0x20] sm:$0xff] %v761_v8   ;;  %v235_v20 = vmax.f32 %v171_v11, 0.0  ;;  %v103_v21 = vmul.f32 %v958_v2, %v32_v6  ;;  %v104_v22 = vmul.f32 %v958_v2, %v33_v7  ;;  %v47_v11 = vld [vmem:[%s1375_s0 + $0x108] sm:$0xff] }
  0x12   :  { %v771_v19 = vpack.c.bf16 %v233_v10, %v232_v9  ;;  %902 = vst [vmem:[%s1378_s3 + $0x28] sm:$0xff] %v766_v14   ;;  %v173_v24 = vadd.f32 %v965_v5, %v102_v16  ;;  %v236_v25 = vmax.f32 %v172_v17, 0.0  ;;  %v105_v26 = vmul.f32 %v958_v2, %v34_v12  ;;  %v48_v16 = vld [vmem:[%s1375_s0 + $0x110] sm:$0xff]  ;;  %v49_v17 = vld [vmem:[%s1375_s0 + $0x118] sm:$0xff] }
  0x13   :  { %v106_v27 = vmul.f32 %v958_v2, %v35_v13  ;;  %v776_v29 = vpack.c.bf16 %v235_v20, %v234_v15  ;;  %v174_v30 = vadd.f32 %v965_v5, %v103_v21  ;;  %v175_v31 = vadd.f32 %v965_v5, %v104_v22  ;;  %v50_v22 = vld [vmem:[%s1375_s0 + $0x120] sm:$0xff] }
  0x14   :  { %903 = vst [vmem:[%s1378_s3 + $0x30] sm:$0xff] %v771_v19   ;;  %v107_v32 = vmul.f32 %v958_v2, %v36_v18  ;;  %v237_v33 = vmax.f32 %v173_v24, 0.0  ;;  %v176_v34 = vadd.f32 %v965_v5, %v105_v26  ;;  %v108_v36 = vmul.f32 %v958_v2, %v37_v23  ;;  %v51_v23 = vld [vmem:[%s1375_s0 + $0x128] sm:$0xff] }
  0x15   :  { %v177_v35 = vadd.f32 %v965_v5, %v106_v27  ;;  %904 = vst [vmem:[%s1378_s3 + $0x38] sm:$0xff] %v776_v29   ;;  %v238_v38 = vmax.f32 %v174_v30, 0.0  ;;  %v239_v39 = vmax.f32 %v175_v31, 0.0  ;;  %v109_v41 = vmul.f32 %v958_v2, %v38_v28  ;;  %v52_v28 = vld [vmem:[%s1375_s0 + $0x130] sm:$0xff] }
  0x16   :  { %v178_v40 = vadd.f32 %v965_v5, %v107_v32  ;;  %v781_v44 = vpack.c.bf16 %v237_v33, %v236_v25  ;;  %v240_v45 = vmax.f32 %v176_v34, 0.0  ;;  %v179_v47 = vadd.f32 %v965_v5, %v108_v36  ;;  %v53_v33 = vld [vmem:[%s1375_s0 + $0x138] sm:$0xff] }
  0x17   :  { %v241_v46 = vmax.f32 %v177_v35, 0.0  ;;  %v786_v50 = vpack.c.bf16 %v239_v39, %v238_v38  ;;  %v110_v52 = vmul.f32 %v958_v2, %v39_v37  ;;  %v180_v53 = vadd.f32 %v965_v5, %v109_v41  ;;  %v54_v38 = vld [vmem:[%s1375_s0 + $0x140] sm:$0xff] }
  0x18   :  { %v242_v51 = vmax.f32 %v178_v40, 0.0  ;;  %905 = vst [vmem:[%s1378_s3 + $0x40] sm:$0xff] %v781_v44   ;;  %v243_v56 = vmax.f32 %v179_v47, 0.0  ;;  %v111_v57 = vmul.f32 %v958_v2, %v40_v42  ;;  %v112_v58 = vmul.f32 %v958_v2, %v41_v43  ;;  %v55_v47 = vld [vmem:[%s1375_s0 + $0x148] sm:$0xff] }
  0x19   :  { %v791_v55 = vpack.c.bf16 %v241_v46, %v240_v45  ;;  %906 = vst [vmem:[%s1378_s3 + $0x48] sm:$0xff] %v786_v50   ;;  %v181_v60 = vadd.f32 %v965_v5, %v110_v52  ;;  %v244_v61 = vmax.f32 %v180_v53, 0.0  ;;  %v113_v62 = vmul.f32 %v958_v2, %v42_v48  ;;  %v56_v52 = vld [vmem:[%s1375_s0 + $0x150] sm:$0xff]  ;;  %v57_v53 = vld [vmem:[%s1375_s0 + $0x158] sm:$0xff] }
  0x1a   :  { %v114_v63 = vmul.f32 %v958_v2, %v43_v49  ;;  %v796_v1 = vpack.c.bf16 %v243_v56, %v242_v51  ;;  %v182_v3 = vadd.f32 %v965_v5, %v111_v57  ;;  %v183_v4 = vadd.f32 %v965_v5, %v112_v58  ;;  %v58_v58 = vld [vmem:[%s1375_s0 + $0x160] sm:$0xff] }
  0x1b   :  { %907 = vst [vmem:[%s1378_s3 + $0x50] sm:$0xff] %v791_v55   ;;  %v115_v6 = vmul.f32 %v958_v2, %v44_v54  ;;  %v245_v7 = vmax.f32 %v181_v60, 0.0  ;;  %v184_v8 = vadd.f32 %v965_v5, %v113_v62  ;;  %v116_v10 = vmul.f32 %v958_v2, %v45_v59  ;;  %v59_v59 = vld [vmem:[%s1375_s0 + $0x168] sm:$0xff] }
  0x1c   :  { %v185_v9 = vadd.f32 %v965_v5, %v114_v63  ;;  %908 = vst [vmem:[%s1378_s3 + $0x58] sm:$0xff] %v796_v1   ;;  %v246_v12 = vmax.f32 %v182_v3, 0.0  ;;  %v247_v13 = vmax.f32 %v183_v4, 0.0  ;;  %v117_v15 = vmul.f32 %v958_v2, %v46_v0  ;;  %v60_v0 = vld [vmem:[%s1375_s0 + $0x170] sm:$0xff] }
  0x1d   :  { %v186_v14 = vadd.f32 %v965_v5, %v115_v6  ;;  %v801_v18 = vpack.c.bf16 %v245_v7, %v244_v61  ;;  %v248_v19 = vmax.f32 %v184_v8, 0.0  ;;  %v187_v21 = vadd.f32 %v965_v5, %v116_v10  ;;  %v61_v7 = vld [vmem:[%s1375_s0 + $0x178] sm:$0xff] }
  0x1e   :  { %v249_v20 = vmax.f32 %v185_v9, 0.0  ;;  %v806_v24 = vpack.c.bf16 %v247_v13, %v246_v12  ;;  %v118_v26 = vmul.f32 %v958_v2, %v47_v11  ;;  %v188_v27 = vadd.f32 %v965_v5, %v117_v15  ;;  %v62_v12 = vld [vmem:[%s1375_s0 + $0x180] sm:$0xff] }
  0x1f   :  { %v250_v25 = vmax.f32 %v186_v14, 0.0  ;;  %909 = vst [vmem:[%s1378_s3 + $0x60] sm:$0xff] %v801_v18   ;;  %v251_v30 = vmax.f32 %v187_v21, 0.0  ;;  %v119_v31 = vmul.f32 %v958_v2, %v48_v16  ;;  %v120_v32 = vmul.f32 %v958_v2, %v49_v17  ;;  %v63_v21 = vld [vmem:[%s1375_s0 + $0x188] sm:$0xff] }
  0x20   :  { %v811_v29 = vpack.c.bf16 %v249_v20, %v248_v19  ;;  %910 = vst [vmem:[%s1378_s3 + $0x68] sm:$0xff] %v806_v24   ;;  %v189_v34 = vadd.f32 %v965_v5, %v118_v26  ;;  %v252_v35 = vmax.f32 %v188_v27, 0.0  ;;  %v121_v36 = vmul.f32 %v958_v2, %v50_v22  ;;  %v64_v26 = vld [vmem:[%s1375_s0 + $0x190] sm:$0xff]  ;;  %v65_v27 = vld [vmem:[%s1375_s0 + $0x198] sm:$0xff] }
  0x21   :  { %v122_v37 = vmul.f32 %v958_v2, %v51_v23  ;;  %v816_v39 = vpack.c.bf16 %v251_v30, %v250_v25  ;;  %v190_v40 = vadd.f32 %v965_v5, %v119_v31  ;;  %v191_v41 = vadd.f32 %v965_v5, %v120_v32  ;;  %v66_v32 = vld [vmem:[%s1375_s0 + $0x1a0] sm:$0xff] }
  0x22   :  { %911 = vst [vmem:[%s1378_s3 + $0x70] sm:$0xff] %v811_v29   ;;  %v123_v42 = vmul.f32 %v958_v2, %v52_v28  ;;  %v253_v43 = vmax.f32 %v189_v34, 0.0  ;;  %v192_v44 = vadd.f32 %v965_v5, %v121_v36  ;;  %v124_v46 = vmul.f32 %v958_v2, %v53_v33  ;;  %v67_v33 = vld [vmem:[%s1375_s0 + $0x1a8] sm:$0xff] }
  0x23   :  { %v193_v45 = vadd.f32 %v965_v5, %v122_v37  ;;  %912 = vst [vmem:[%s1378_s3 + $0x78] sm:$0xff] %v816_v39   ;;  %v254_v48 = vmax.f32 %v190_v40, 0.0  ;;  %v255_v49 = vmax.f32 %v191_v41, 0.0  ;;  %v125_v51 = vmul.f32 %v958_v2, %v54_v38  ;;  %v68_v38 = vld [vmem:[%s1375_s0 + $0x1b0] sm:$0xff] }
  0x24   :  { %v194_v50 = vadd.f32 %v965_v5, %v123_v42  ;;  %v821_v54 = vpack.c.bf16 %v253_v43, %v252_v35  ;;  %v256_v55 = vmax.f32 %v192_v44, 0.0  ;;  %v195_v57 = vadd.f32 %v965_v5, %v124_v46  ;;  %v69_v43 = vld [vmem:[%s1375_s0 + $0x1b8] sm:$0xff] }
  0x25   :  { %v257_v56 = vmax.f32 %v193_v45, 0.0  ;;  %v826_v60 = vpack.c.bf16 %v255_v49, %v254_v48  ;;  %v126_v62 = vmul.f32 %v958_v2, %v55_v47  ;;  %v196_v63 = vadd.f32 %v965_v5, %v125_v51  ;;  %v70_v48 = vld [vmem:[%s1375_s0 + $0x1c0] sm:$0xff] }
  0x26   :  { %v258_v61 = vmax.f32 %v194_v50, 0.0  ;;  %913 = vst [vmem:[%s1378_s3 + $0x80] sm:$0xff] %v821_v54   ;;  %v259_v3 = vmax.f32 %v195_v57, 0.0  ;;  %v127_v4 = vmul.f32 %v958_v2, %v56_v52  ;;  %v128_v6 = vmul.f32 %v958_v2, %v57_v53  ;;  %v71_v57 = vld [vmem:[%s1375_s0 + $0x1c8] sm:$0xff] }
  0x27   :  { %v831_v1 = vpack.c.bf16 %v257_v56, %v256_v55  ;;  %914 = vst [vmem:[%s1378_s3 + $0x88] sm:$0xff] %v826_v60   ;;  %v197_v8 = vadd.f32 %v965_v5, %v126_v62  ;;  %v260_v9 = vmax.f32 %v196_v63, 0.0  ;;  %v129_v10 = vmul.f32 %v958_v2, %v58_v58  ;;  %v72_v62 = vld [vmem:[%s1375_s0 + $0x1d0] sm:$0xff]  ;;  %v73_v63 = vld [vmem:[%s1375_s0 + $0x1d8] sm:$0xff] }
  0x28   :  { %v130_v11 = vmul.f32 %v958_v2, %v59_v59  ;;  %v836_v13 = vpack.c.bf16 %v259_v3, %v258_v61  ;;  %v198_v14 = vadd.f32 %v965_v5, %v127_v4  ;;  %v199_v15 = vadd.f32 %v965_v5, %v128_v6  ;;  %v74_v6 = vld [vmem:[%s1375_s0 + $0x1e0] sm:$0xff] }
  0x29   :  { %915 = vst [vmem:[%s1378_s3 + $0x90] sm:$0xff] %v831_v1   ;;  %v131_v16 = vmul.f32 %v958_v2, %v60_v0  ;;  %v261_v17 = vmax.f32 %v197_v8, 0.0  ;;  %v200_v18 = vadd.f32 %v965_v5, %v129_v10  ;;  %v132_v20 = vmul.f32 %v958_v2, %v61_v7  ;;  %v75_v7 = vld [vmem:[%s1375_s0 + $0x1e8] sm:$0xff] }
  0x2a   :  { %v201_v19 = vadd.f32 %v965_v5, %v130_v11  ;;  %916 = vst [vmem:[%s1378_s3 + $0x98] sm:$0xff] %v836_v13   ;;  %v262_v22 = vmax.f32 %v198_v14, 0.0  ;;  %v263_v23 = vmax.f32 %v199_v15, 0.0  ;;  %v133_v25 = vmul.f32 %v958_v2, %v62_v12  ;;  %v76_v12 = vld [vmem:[%s1375_s0 + $0x1f0] sm:$0xff] }
  0x2b   :  { %v202_v24 = vadd.f32 %v965_v5, %v131_v16  ;;  %v841_v28 = vpack.c.bf16 %v261_v17, %v260_v9  ;;  %v264_v29 = vmax.f32 %v200_v18, 0.0  ;;  %v203_v31 = vadd.f32 %v965_v5, %v132_v20  ;;  %v77_v17 = vld [vmem:[%s1375_s0 + $0x1f8] sm:$0xff] }
  0x2c   :  { %v265_v30 = vmax.f32 %v201_v19, 0.0  ;;  %v846_v34 = vpack.c.bf16 %v263_v23, %v262_v22  ;;  %v134_v36 = vmul.f32 %v958_v2, %v63_v21  ;;  %v204_v37 = vadd.f32 %v965_v5, %v133_v25 }
  0x2d   :  { %v266_v35 = vmax.f32 %v202_v24, 0.0  ;;  %917 = vst [vmem:[%s1378_s3 + $0xa0] sm:$0xff] %v841_v28   ;;  %v267_v40 = vmax.f32 %v203_v31, 0.0  ;;  %v135_v41 = vmul.f32 %v958_v2, %v64_v26  ;;  %v136_v42 = vmul.f32 %v958_v2, %v65_v27 }
  0x2e   :  { %v851_v39 = vpack.c.bf16 %v265_v30, %v264_v29  ;;  %918 = vst [vmem:[%s1378_s3 + $0xa8] sm:$0xff] %v846_v34   ;;  %v205_v44 = vadd.f32 %v965_v5, %v134_v36  ;;  %v268_v45 = vmax.f32 %v204_v37, 0.0  ;;  %v137_v46 = vmul.f32 %v958_v2, %v66_v32 }
  0x2f   :  { %v138_v47 = vmul.f32 %v958_v2, %v67_v33  ;;  %v856_v49 = vpack.c.bf16 %v267_v40, %v266_v35  ;;  %v206_v50 = vadd.f32 %v965_v5, %v135_v41  ;;  %v207_v51 = vadd.f32 %v965_v5, %v136_v42 }
  0x30   :  { %919 = vst [vmem:[%s1378_s3 + $0xb0] sm:$0xff] %v851_v39   ;;  %v139_v52 = vmul.f32 %v958_v2, %v68_v38  ;;  %v269_v53 = vmax.f32 %v205_v44, 0.0  ;;  %v208_v54 = vadd.f32 %v965_v5, %v137_v46  ;;  %v140_v56 = vmul.f32 %v958_v2, %v69_v43 }
  0x31   :  { %v209_v55 = vadd.f32 %v965_v5, %v138_v47  ;;  %920 = vst [vmem:[%s1378_s3 + $0xb8] sm:$0xff] %v856_v49   ;;  %v270_v58 = vmax.f32 %v206_v50, 0.0  ;;  %v271_v59 = vmax.f32 %v207_v51, 0.0  ;;  %v141_v61 = vmul.f32 %v958_v2, %v70_v48 }
  0x32   :  { %v210_v60 = vadd.f32 %v965_v5, %v139_v52  ;;  %v861_v0 = vpack.c.bf16 %v269_v53, %v268_v45  ;;  %v272_v1 = vmax.f32 %v208_v54, 0.0  ;;  %v211_v4 = vadd.f32 %v965_v5, %v140_v56 }
  0x33   :  { %v273_v3 = vmax.f32 %v209_v55, 0.0  ;;  %v866_v8 = vpack.c.bf16 %v271_v59, %v270_v58  ;;  %v142_v10 = vmul.f32 %v958_v2, %v71_v57  ;;  %v212_v11 = vadd.f32 %v965_v5, %v141_v61 }
  0x34   :  { %v274_v9 = vmax.f32 %v210_v60, 0.0  ;;  %921 = vst [vmem:[%s1378_s3 + $0xc0] sm:$0xff] %v861_v0   ;;  %v275_v14 = vmax.f32 %v211_v4, 0.0  ;;  %v143_v15 = vmul.f32 %v958_v2, %v72_v62  ;;  %v144_v16 = vmul.f32 %v958_v2, %v73_v63 }
  0x35   :  { %v871_v13 = vpack.c.bf16 %v273_v3, %v272_v1  ;;  %922 = vst [vmem:[%s1378_s3 + $0xc8] sm:$0xff] %v866_v8   ;;  %v213_v18 = vadd.f32 %v965_v5, %v142_v10  ;;  %v276_v19 = vmax.f32 %v212_v11, 0.0  ;;  %v145_v20 = vmul.f32 %v958_v2, %v74_v6 }
  0x36   :  { %v146_v21 = vmul.f32 %v958_v2, %v75_v7  ;;  %v876_v22 = vpack.c.bf16 %v275_v14, %v274_v9  ;;  %v214_v23 = vadd.f32 %v965_v5, %v143_v15  ;;  %v215_v24 = vadd.f32 %v965_v5, %v144_v16 }
  0x37   :  { %923 = vst [vmem:[%s1378_s3 + $0xd0] sm:$0xff] %v871_v13   ;;  %v147_v25 = vmul.f32 %v958_v2, %v76_v12  ;;  %v277_v26 = vmax.f32 %v213_v18, 0.0  ;;  %v216_v27 = vadd.f32 %v965_v5, %v145_v20  ;;  %v148_v29 = vmul.f32 %v958_v2, %v77_v17 }
  0x38   :  { %v217_v28 = vadd.f32 %v965_v5, %v146_v21  ;;  %924 = vst [vmem:[%s1378_s3 + $0xd8] sm:$0xff] %v876_v22   ;;  %v278_v30 = vmax.f32 %v214_v23, 0.0  ;;  %v279_v31 = vmax.f32 %v215_v24, 0.0 }
  0x39   :  { %v218_v32 = vadd.f32 %v965_v5, %v147_v25  ;;  %v881_v33 = vpack.c.bf16 %v277_v26, %v276_v19  ;;  %v280_v34 = vmax.f32 %v216_v27, 0.0  ;;  %v219_v36 = vadd.f32 %v965_v5, %v148_v29 }
  0x3a   :  { %v281_v35 = vmax.f32 %v217_v28, 0.0  ;;  %v886_v37 = vpack.c.bf16 %v279_v31, %v278_v30 }
  0x3b   :  { %v282_v38 = vmax.f32 %v218_v32, 0.0  ;;  %925 = vst [vmem:[%s1378_s3 + $0xe0] sm:$0xff] %v881_v33   ;;  %v283_v39 = vmax.f32 %v219_v36, 0.0 }
  0x3c   :  { %v891_v2 = vpack.c.bf16 %v281_v35, %v280_v34  ;;  %926 = vst [vmem:[%s1378_s3 + $0xe8] sm:$0xff] %v886_v37  }
  0x3d   :  { %v896_v40 = vpack.c.bf16 %v283_v39, %v282_v38 }
  0x3e   :  { %927 = vst [vmem:[%s1378_s3 + $0xf0] sm:$0xff] %v891_v2  }
  0x3f   :  { %928 = vst [vmem:[%s1378_s3 + $0xf8] sm:$0xff] %v896_v40  }

// kernel: generator_forward.19
= control target key start
LH: loop header
LB: loop body
LE: loop exit
PB: predicated region body
PF: predicated region fallthrough
CT: control target
= control target key end

     0   :  { %s1359_s9 = smov 0   ;;  %s1361_s10 = smov 0   ;;  %s1510_s0 = inlined_call_operand.vmem [shape: bf16[4,512,128], index: 0, kind: input, shape index: {}]   ;;  %s1511_s1 = inlined_call_operand.vmem [shape: bf16[4,128,128], index: 1, kind: input, shape index: {}]   ;;  %s1512_s2 = inlined_call_operand.vmem [shape: f32[4,512,128], index: 2, kind: output, shape index: {}]  }
   0x1   :  { %s1363_s11 = smov 0  }
   0x2 LB: > { %s38_s12 = sadd.s32 1, %s1338_s10  ;;  %p1068_p0 = scmp.ge.s32.totalorder %s1342_s11, 1  ;;  %s1342_s11 = sphi %s1363_s11, %s12_s11   ;;  %s1338_s10 = sphi %s1361_s10, %s1514_s10   ;;  %s1334_s9 = sphi %s1359_s9, %s1513_s9  }
   0x3   : > { %p40_p1 = scmp.ge.s32.totalorder %s38_s12, 4  ;;  %p176_p2 = scmp.lt.s32.totalorder %s1342_s11, 5 }
   0x5   : > { %s1516_s12 = smov (%p40_p1, %s38_s12), 0  ;;  %p177_p3 = pnand %p1068_p0, %p176_p2 }
   0x6   : > { %p225_p4 = scmp.lt.s32.totalorder (!%p177_p3), %s1334_s9, 3 }
   0x7   : > { %180 = sbr.rel (%p177_p3) target bundleno = 322 (0x142), region = 28 }
   0xe   : > { %s1518_s9 = smov (!%p225_p4, %s1334_s9), 3 }
   0xf   : > { %s1118_s13 = sshll.u32 %s1518_s9, 6  ;;  %s1117_s17 = sshll.u32 %s1518_s9, 8 }
  0x10   : > { %s1383_s16 = scalar_lea.vmem %s1511_s1, %s1118_s13  ;;  %s1392_s20 = scalar_lea.vmem %s1510_s0, %s1117_s17 }
  0x11   : > { %v1280_v0 = vld [vmem:[%s1383_s16] sm:$0xff]   ;;  %v1281_v1 = vld [vmem:[%s1383_s16 + $0x8] sm:$0xff]   ;;  %v1282_v2 = vld [vmem:[%s1383_s16 + $0x10] sm:$0xff]   ;;  %s1119_s21 = sshll.u32 %s1518_s9, 9 }
  0x12   : > { %1160 = vmatprep.subr.bf16.mxu0 %v1280_v0  ;;  %1240 = vmatprep.subr.bf16.mxu1 %v1280_v0  ;;  %v1283_v3 = vld [vmem:[%s1383_s16 + $0x18] sm:$0xff]   ;;  %v1288_v4 = vld [vmem:[%s1392_s20] sm:$0xff]   ;;  %v1285_v7 = vld [vmem:[%s1383_s16 + $0x28] sm:$0xff]   ;;  %s1435_s24 = scalar_lea.vmem %s1512_s2, %s1119_s21 }
  0x13   : > { %1161 = vmatpush3.bf16.msra.mxu0 %v1280_v0  ;;  %1248 = vmatpush3.bf16.msra.mxu1 %v1280_v0  ;;  %v1289_v5 = vld [vmem:[%s1392_s20 + $0x80] sm:$0xff]   ;;  %v1286_v8 = vld [vmem:[%s1383_s16 + $0x30] sm:$0xff]   ;;  %v1287_v9 = vld [vmem:[%s1383_s16 + $0x38] sm:$0xff]  }
  0x14   : > { %1162 = vmatprep.subr.bf16.mxu0 %v1281_v1  ;;  %1241 = vmatprep.subr.bf16.mxu1 %v1281_v1  ;;  %v1284_v6 = vld [vmem:[%s1383_s16 + $0x20] sm:$0xff]   ;;  %v1290_v10 = vld [vmem:[%s1392_s20 + $0x8] sm:$0xff]   ;;  %v1292_v12 = vld [vmem:[%s1392_s20 + $0x10] sm:$0xff]  }
  0x15   : > { %1176 = vmatprep.mubr.bf16.mxu0 %v1288_v4  ;;  %1208 = vmatprep.mubr.bf16.mxu1 %v1289_v5  ;;  %v1291_v11 = vld [vmem:[%s1392_s20 + $0x88] sm:$0xff]   ;;  %v1293_v13 = vld [vmem:[%s1392_s20 + $0x90] sm:$0xff]   ;;  %v1294_v14 = vld [vmem:[%s1392_s20 + $0x18] sm:$0xff]  }
  0x16   : > { %v1295_v15 = vld [vmem:[%s1392_s20 + $0x98] sm:$0xff]   ;;  %v1296_v16 = vld [vmem:[%s1392_s20 + $0x20] sm:$0xff]   ;;  %v1298_v18 = vld [vmem:[%s1392_s20 + $0x28] sm:$0xff]  }
  0x17   : > { %1163 = vmatpush3.bf16.msra.mxu0 %v1281_v1  ;;  %1249 = vmatpush3.bf16.msra.mxu1 %v1281_v1  ;;  %v1297_v17 = vld [vmem:[%s1392_s20 + $0xa0] sm:$0xff]   ;;  %v1299_v19 = vld [vmem:[%s1392_s20 + $0xa8] sm:$0xff]   ;;  %v1300_v20 = vld [vmem:[%s1392_s20 + $0x30] sm:$0xff]  }
  0x18   : > { %1164 = vmatprep.subr.bf16.mxu0 %v1282_v2  ;;  %1242 = vmatprep.subr.bf16.mxu1 %v1282_v2  ;;  %v1301_v21 = vld [vmem:[%s1392_s20 + $0xb0] sm:$0xff]   ;;  %v1302_v22 = vld [vmem:[%s1392_s20 + $0x38] sm:$0xff]   ;;  %v1304_v24 = vld [vmem:[%s1392_s20 + $0x40] sm:$0xff]  }
  0x19   : > { %v1303_v23 = vld [vmem:[%s1392_s20 + $0xb8] sm:$0xff]   ;;  %v1305_v25 = vld [vmem:[%s1392_s20 + $0xc0] sm:$0xff]   ;;  %v1306_v26 = vld [vmem:[%s1392_s20 + $0x48] sm:$0xff]  }
  0x1a   : > { %v1307_v27 = vld [vmem:[%s1392_s20 + $0xc8] sm:$0xff]   ;;  %v1308_v28 = vld [vmem:[%s1392_s20 + $0x50] sm:$0xff]   ;;  %v1310_v30 = vld [vmem:[%s1392_s20 + $0x58] sm:$0xff]  }
  0x1b   : > { %1165 = vmatpush3.bf16.msra.mxu0 %v1282_v2  ;;  %1250 = vmatpush3.bf16.msra.mxu1 %v1282_v2  ;;  %v1309_v29 = vld [vmem:[%s1392_s20 + $0xd0] sm:$0xff]   ;;  %v1311_v31 = vld [vmem:[%s1392_s20 + $0xd8] sm:$0xff]   ;;  %v1312_v32 = vld [vmem:[%s1392_s20 + $0x60] sm:$0xff]  }
  0x1c   : > { %1166 = vmatprep.subr.bf16.mxu0 %v1283_v3  ;;  %1243 = vmatprep.subr.bf16.mxu1 %v1283_v3  ;;  %v1313_v33 = vld [vmem:[%s1392_s20 + $0xe0] sm:$0xff]   ;;  %v1314_v34 = vld [vmem:[%s1392_s20 + $0x68] sm:$0xff]   ;;  %v1316_v36 = vld [vmem:[%s1392_s20 + $0x70] sm:$0xff]  }
  0x1d   : > { %v1315_v35 = vld [vmem:[%s1392_s20 + $0xe8] sm:$0xff]   ;;  %v1317_v37 = vld [vmem:[%s1392_s20 + $0xf0] sm:$0xff]   ;;  %v1318_v38 = vld [vmem:[%s1392_s20 + $0x78] sm:$0xff]  }
  0x1e   : > { %v1319_v39 = vld [vmem:[%s1392_s20 + $0xf8] sm:$0xff]  }
  0x1f   : > { %1167 = vmatpush3.bf16.msra.mxu0 %v1283_v3  ;;  %1251 = vmatpush3.bf16.msra.mxu1 %v1283_v3 }
  0x20   : > { %1168 = vmatprep.subr.bf16.mxu0 %v1284_v6  ;;  %1244 = vmatprep.subr.bf16.mxu1 %v1284_v6 }
  0x23   : > { %1169 = vmatpush3.bf16.msra.mxu0 %v1284_v6  ;;  %1252 = vmatpush3.bf16.msra.mxu1 %v1284_v6 }
  0x24   : > { %1170 = vmatprep.subr.bf16.mxu0 %v1285_v7  ;;  %1245 = vmatprep.subr.bf16.mxu1 %v1285_v7 }
  0x27   : > { %1171 = vmatpush3.bf16.msra.mxu0 %v1285_v7  ;;  %1253 = vmatpush3.bf16.msra.mxu1 %v1285_v7 }
  0x28   : > { %1172 = vmatprep.subr.bf16.mxu0 %v1286_v8  ;;  %1246 = vmatprep.subr.bf16.mxu1 %v1286_v8 }
  0x2b   : > { %1173 = vmatpush3.bf16.msra.mxu0 %v1286_v8  ;;  %1254 = vmatpush3.bf16.msra.mxu1 %v1286_v8 }
  0x2c   : > { %1174 = vmatprep.subr.bf16.mxu0 %v1287_v9  ;;  %1247 = vmatprep.subr.bf16.mxu1 %v1287_v9 }
  0x2f   : > { %1175 = vmatpush3.bf16.msra.mxu0 %v1287_v9  ;;  %1255 = vmatpush3.bf16.msra.mxu1 %v1287_v9 }
  0x32   : > { %1177 = vmatmul.mubr.bf16.vlgmr.msra.gmra.mrb[0].mxu0 %v1290_v10  ;;  %1209 = vmatmul.mubr.bf16.vlgmr.msra.gmra.mrb[0].mxu1 %v1291_v11 }
  0x33   : > { %1180 = vmatprep.mubr.bf16.mxu0 %v1292_v12  ;;  %1212 = vmatprep.mubr.bf16.mxu1 %v1293_v13 }
  0x3a   : > { %1181 = vmatmul.mubr.bf16.gmra.mrb[4].mxu0 %v1294_v14  ;;  %1213 = vmatmul.mubr.bf16.gmra.mrb[4].mxu1 %v1295_v15 }
  0x3b   : > { %1184 = vmatprep.mubr.bf16.mxu0 %v1296_v16  ;;  %1216 = vmatprep.mubr.bf16.mxu1 %v1297_v17 }
  0x42   : > { %1185 = vmatmul.mubr.bf16.gmra.mrb[8].mxu0 %v1298_v18  ;;  %1217 = vmatmul.mubr.bf16.gmra.mrb[8].mxu1 %v1299_v19 }
  0x43   : > { %1188 = vmatprep.mubr.bf16.mxu0 %v1300_v20  ;;  %1220 = vmatprep.mubr.bf16.mxu1 %v1301_v21 }
  0x4a   : > { %1189 = vmatmul.mubr.bf16.gmra.mrb[12].mxu0 %v1302_v22  ;;  %1221 = vmatmul.mubr.bf16.gmra.mrb[12].mxu1 %v1303_v23 }
  0x4b   : > { %1192 = vmatprep.mubr.bf16.mxu0 %v1304_v24  ;;  %1224 = vmatprep.mubr.bf16.mxu1 %v1305_v25 }
  0x52   : > { %1193 = vmatmul.mubr.bf16.gmra.mrb[16].mxu0 %v1306_v26  ;;  %1225 = vmatmul.mubr.bf16.gmra.mrb[16].mxu1 %v1307_v27 }
  0x53   : > { %1196 = vmatprep.mubr.bf16.mxu0 %v1308_v28  ;;  %1228 = vmatprep.mubr.bf16.mxu1 %v1309_v29 }
  0x5a   : > { %1197 = vmatmul.mubr.bf16.gmra.mrb[20].mxu0 %v1310_v30  ;;  %1229 = vmatmul.mubr.bf16.gmra.mrb[20].mxu1 %v1311_v31 }
  0x5b   : > { %1200 = vmatprep.mubr.bf16.mxu0 %v1312_v32  ;;  %1232 = vmatprep.mubr.bf16.mxu1 %v1313_v33 }
  0x62   : > { %1201 = vmatmul.mubr.bf16.gmra.mrb[24].mxu0 %v1314_v34  ;;  %1233 = vmatmul.mubr.bf16.gmra.mrb[24].mxu1 %v1315_v35 }
  0x63   : > { %1204 = vmatprep.mubr.bf16.mxu0 %v1316_v36  ;;  %1236 = vmatprep.mubr.bf16.mxu1 %v1317_v37 }
  0x6a   : > { %1205 = vmatmul.mubr.bf16.gmra.mrb[28].mxu0 %v1318_v38  ;;  %1237 = vmatmul.mubr.bf16.gmra.mrb[28].mxu1 %v1319_v39 }
 0x105   : > { %v1178_v40 = vpop.f32.mrb[0].mxu0  ;;  %v1210_v41 = vpop.f32.mrb[0].mxu1 }
 0x106   : > { %875 = vst [vmem:[%s1435_s24 + $0x10] sm:$0xff] %v1178_v40  ;;  %907 = vst [vmem:[%s1435_s24 + $0x110] sm:$0xff] %v1210_v41  ;;  %v618_v42 = vpop.f32.mrb[1].mxu0  ;;  %v746_v43 = vpop.f32.mrb[1].mxu1 }
 0x107   : > { %873 = vst [vmem:[%s1435_s24] sm:$0xff] %v618_v42  ;;  %905 = vst [vmem:[%s1435_s24 + $0x100] sm:$0xff] %v746_v43  ;;  %v1179_v44 = vpop.f32.mrb[2].mxu0  ;;  %v1211_v45 = vpop.f32.mrb[2].mxu1 }
 0x108   : > { %876 = vst [vmem:[%s1435_s24 + $0x18] sm:$0xff] %v1179_v44  ;;  %908 = vst [vmem:[%s1435_s24 + $0x118] sm:$0xff] %v1211_v45  ;;  %v621_v46 = vpop.f32.mrb[3].mxu0  ;;  %v749_v47 = vpop.f32.mrb[3].mxu1 }
 0x109   : > { %874 = vst [vmem:[%s1435_s24 + $0x8] sm:$0xff] %v621_v46  ;;  %906 = vst [vmem:[%s1435_s24 + $0x108] sm:$0xff] %v749_v47 }
 0x10d   : > { %v1182_v48 = vpop.f32.mrb[4].mxu0  ;;  %v1214_v49 = vpop.f32.mrb[4].mxu1 }
 0x10e   : > { %879 = vst [vmem:[%s1435_s24 + $0x30] sm:$0xff] %v1182_v48  ;;  %911 = vst [vmem:[%s1435_s24 + $0x130] sm:$0xff] %v1214_v49  ;;  %v634_v50 = vpop.f32.mrb[5].mxu0  ;;  %v762_v51 = vpop.f32.mrb[5].mxu1 }
 0x10f   : > { %877 = vst [vmem:[%s1435_s24 + $0x20] sm:$0xff] %v634_v50  ;;  %909 = vst [vmem:[%s1435_s24 + $0x120] sm:$0xff] %v762_v51  ;;  %v1183_v52 = vpop.f32.mrb[6].mxu0  ;;  %v1215_v53 = vpop.f32.mrb[6].mxu1 }
 0x110   : > { %880 = vst [vmem:[%s1435_s24 + $0x38] sm:$0xff] %v1183_v52  ;;  %912 = vst [vmem:[%s1435_s24 + $0x138] sm:$0xff] %v1215_v53  ;;  %v637_v54 = vpop.f32.mrb[7].mxu0  ;;  %v765_v55 = vpop.f32.mrb[7].mxu1 }
 0x111   : > { %878 = vst [vmem:[%s1435_s24 + $0x28] sm:$0xff] %v637_v54  ;;  %910 = vst [vmem:[%s1435_s24 + $0x128] sm:$0xff] %v765_v55 }
 0x115   : > { %v1186_v56 = vpop.f32.mrb[8].mxu0  ;;  %v1218_v57 = vpop.f32.mrb[8].mxu1 }
 0x116   : > { %883 = vst [vmem:[%s1435_s24 + $0x50] sm:$0xff] %v1186_v56  ;;  %915 = vst [vmem:[%s1435_s24 + $0x150] sm:$0xff] %v1218_v57  ;;  %v650_v58 = vpop.f32.mrb[9].mxu0  ;;  %v778_v59 = vpop.f32.mrb[9].mxu1 }
 0x117   : > { %881 = vst [vmem:[%s1435_s24 + $0x40] sm:$0xff] %v650_v58  ;;  %913 = vst [vmem:[%s1435_s24 + $0x140] sm:$0xff] %v778_v59  ;;  %v1187_v60 = vpop.f32.mrb[10].mxu0  ;;  %v1219_v61 = vpop.f32.mrb[10].mxu1 }
 0x118   : > { %884 = vst [vmem:[%s1435_s24 + $0x58] sm:$0xff] %v1187_v60  ;;  %916 = vst [vmem:[%s1435_s24 + $0x158] sm:$0xff] %v1219_v61  ;;  %v653_v62 = vpop.f32.mrb[11].mxu0  ;;  %v781_v63 = vpop.f32.mrb[11].mxu1 }
 0x119   : > { %882 = vst [vmem:[%s1435_s24 + $0x48] sm:$0xff] %v653_v62  ;;  %914 = vst [vmem:[%s1435_s24 + $0x148] sm:$0xff] %v781_v63 }
 0x11d   : > { %v1190_v0 = vpop.f32.mrb[12].mxu0  ;;  %v1222_v1 = vpop.f32.mrb[12].mxu1 }
 0x11e   : > { %887 = vst [vmem:[%s1435_s24 + $0x70] sm:$0xff] %v1190_v0  ;;  %919 = vst [vmem:[%s1435_s24 + $0x170] sm:$0xff] %v1222_v1  ;;  %v666_v2 = vpop.f32.mrb[13].mxu0  ;;  %v794_v3 = vpop.f32.mrb[13].mxu1 }
 0x11f   : > { %885 = vst [vmem:[%s1435_s24 + $0x60] sm:$0xff] %v666_v2  ;;  %917 = vst [vmem:[%s1435_s24 + $0x160] sm:$0xff] %v794_v3  ;;  %v1191_v4 = vpop.f32.mrb[14].mxu0  ;;  %v1223_v5 = vpop.f32.mrb[14].mxu1 }
 0x120   : > { %888 = vst [vmem:[%s1435_s24 + $0x78] sm:$0xff] %v1191_v4  ;;  %920 = vst [vmem:[%s1435_s24 + $0x178] sm:$0xff] %v1223_v5  ;;  %v669_v6 = vpop.f32.mrb[15].mxu0  ;;  %v797_v7 = vpop.f32.mrb[15].mxu1 }
 0x121   : > { %886 = vst [vmem:[%s1435_s24 + $0x68] sm:$0xff] %v669_v6  ;;  %918 = vst [vmem:[%s1435_s24 + $0x168] sm:$0xff] %v797_v7 }
 0x125   : > { %v1194_v8 = vpop.f32.mrb[16].mxu0  ;;  %v1226_v9 = vpop.f32.mrb[16].mxu1 }
 0x126   : > { %891 = vst [vmem:[%s1435_s24 + $0x90] sm:$0xff] %v1194_v8  ;;  %923 = vst [vmem:[%s1435_s24 + $0x190] sm:$0xff] %v1226_v9  ;;  %v682_v10 = vpop.f32.mrb[17].mxu0  ;;  %v810_v11 = vpop.f32.mrb[17].mxu1 }
 0x127   : > { %889 = vst [vmem:[%s1435_s24 + $0x80] sm:$0xff] %v682_v10  ;;  %921 = vst [vmem:[%s1435_s24 + $0x180] sm:$0xff] %v810_v11  ;;  %v1195_v12 = vpop.f32.mrb[18].mxu0  ;;  %v1227_v13 = vpop.f32.mrb[18].mxu1 }
 0x128   : > { %892 = vst [vmem:[%s1435_s24 + $0x98] sm:$0xff] %v1195_v12  ;;  %924 = vst [vmem:[%s1435_s24 + $0x198] sm:$0xff] %v1227_v13  ;;  %v685_v14 = vpop.f32.mrb[19].mxu0  ;;  %v813_v15 = vpop.f32.mrb[19].mxu1 }
 0x129   : > { %890 = vst [vmem:[%s1435_s24 + $0x88] sm:$0xff] %v685_v14  ;;  %922 = vst [vmem:[%s1435_s24 + $0x188] sm:$0xff] %v813_v15 }
 0x12d   : > { %v1198_v16 = vpop.f32.mrb[20].mxu0  ;;  %v1230_v17 = vpop.f32.mrb[20].mxu1 }
 0x12e   : > { %895 = vst [vmem:[%s1435_s24 + $0xb0] sm:$0xff] %v1198_v16  ;;  %927 = vst [vmem:[%s1435_s24 + $0x1b0] sm:$0xff] %v1230_v17  ;;  %v698_v18 = vpop.f32.mrb[21].mxu0  ;;  %v826_v19 = vpop.f32.mrb[21].mxu1 }
 0x12f   : > { %893 = vst [vmem:[%s1435_s24 + $0xa0] sm:$0xff] %v698_v18  ;;  %925 = vst [vmem:[%s1435_s24 + $0x1a0] sm:$0xff] %v826_v19  ;;  %v1199_v20 = vpop.f32.mrb[22].mxu0  ;;  %v1231_v21 = vpop.f32.mrb[22].mxu1 }
 0x130   : > { %896 = vst [vmem:[%s1435_s24 + $0xb8] sm:$0xff] %v1199_v20  ;;  %928 = vst [vmem:[%s1435_s24 + $0x1b8] sm:$0xff] %v1231_v21  ;;  %v701_v22 = vpop.f32.mrb[23].mxu0  ;;  %v829_v23 = vpop.f32.mrb[23].mxu1 }
 0x131   : > { %894 = vst [vmem:[%s1435_s24 + $0xa8] sm:$0xff] %v701_v22  ;;  %926 = vst [vmem:[%s1435_s24 + $0x1a8] sm:$0xff] %v829_v23 }
 0x135   : > { %v1202_v24 = vpop.f32.mrb[24].mxu0  ;;  %v1234_v25 = vpop.f32.mrb[24].mxu1 }
 0x136   : > { %899 = vst [vmem:[%s1435_s24 + $0xd0] sm:$0xff] %v1202_v24  ;;  %931 = vst [vmem:[%s1435_s24 + $0x1d0] sm:$0xff] %v1234_v25  ;;  %v714_v26 = vpop.f32.mrb[25].mxu0  ;;  %v842_v27 = vpop.f32.mrb[25].mxu1 }
 0x137   : > { %897 = vst [vmem:[%s1435_s24 + $0xc0] sm:$0xff] %v714_v26  ;;  %929 = vst [vmem:[%s1435_s24 + $0x1c0] sm:$0xff] %v842_v27  ;;  %v1203_v28 = vpop.f32.mrb[26].mxu0  ;;  %v1235_v29 = vpop.f32.mrb[26].mxu1 }
 0x138   : > { %900 = vst [vmem:[%s1435_s24 + $0xd8] sm:$0xff] %v1203_v28  ;;  %932 = vst [vmem:[%s1435_s24 + $0x1d8] sm:$0xff] %v1235_v29  ;;  %v717_v30 = vpop.f32.mrb[27].mxu0  ;;  %v845_v31 = vpop.f32.mrb[27].mxu1 }
 0x139   : > { %898 = vst [vmem:[%s1435_s24 + $0xc8] sm:$0xff] %v717_v30  ;;  %930 = vst [vmem:[%s1435_s24 + $0x1c8] sm:$0xff] %v845_v31 }
 0x13d   : > { %v1206_v32 = vpop.f32.mrb[28].mxu0  ;;  %v1238_v33 = vpop.f32.mrb[28].mxu1 }
 0x13e   : > { %903 = vst [vmem:[%s1435_s24 + $0xf0] sm:$0xff] %v1206_v32  ;;  %935 = vst [vmem:[%s1435_s24 + $0x1f0] sm:$0xff] %v1238_v33  ;;  %v730_v34 = vpop.f32.mrb[29].mxu0  ;;  %v858_v35 = vpop.f32.mrb[29].mxu1 }
 0x13f   : > { %901 = vst [vmem:[%s1435_s24 + $0xe0] sm:$0xff] %v730_v34  ;;  %933 = vst [vmem:[%s1435_s24 + $0x1e0] sm:$0xff] %v858_v35  ;;  %v1207_v36 = vpop.f32.mrb[30].mxu0  ;;  %v1239_v37 = vpop.f32.mrb[30].mxu1 }
 0x140   : > { %904 = vst [vmem:[%s1435_s24 + $0xf8] sm:$0xff] %v1207_v36  ;;  %936 = vst [vmem:[%s1435_s24 + $0x1f8] sm:$0xff] %v1239_v37  ;;  %v733_v38 = vpop.f32.mrb[31].mxu0  ;;  %v861_v39 = vpop.f32.mrb[31].mxu1 }
 0x141   : > { %902 = vst [vmem:[%s1435_s24 + $0xe8] sm:$0xff] %v733_v38  ;;  %934 = vst [vmem:[%s1435_s24 + $0x1e8] sm:$0xff] %v861_v39 }
 0x142 PF: > { %s12_s11 = sadd.s32 1, %s1342_s11   ;;  %s1513_s9 = smov %s1338_s10 }
 0x143   : > { %p9_p5 = scmp.ge.s32.totalorder %s12_s11, 6   ;;  %s1514_s10 = smov %s1516_s12 }
 0x145   :  { %11 = sbr.rel (!%p9_p5) target bundleno = 2 (0x2), region = 61 }

// kernel: generator_forward.20
= control target key start
LH: loop header
LB: loop body
LE: loop exit
PB: predicated region body
PF: predicated region fallthrough
CT: control target
= control target key end

     0   :  { %s1188_s12 = smov 0   ;;  %s1447_s0 = inlined_call_operand.vmem [shape: f32[2048,128], index: 0, kind: input, shape index: {}]   ;;  %s1448_s1 = inlined_call_operand.vmem [shape: f32[1,128], index: 1, kind: input, shape index: {}]   ;;  %s1449_s2 = inlined_call_operand.vmem [shape: f32[1,128], index: 2, kind: input, shape index: {}]   ;;  %s1450_s3 = inlined_call_operand.vmem [shape: bf16[2048,128], index: 3, kind: output, shape index: {}]  }
   0x1 LB: > { %s820_s13 = sadd.s32 4294967295, %s1166_s12   ;;  %p824_p0 = scmp.ge.s32.totalorder %s1166_s12, 1  ;;  %s1166_s12 = sphi %s1188_s12, %s13_s12  }
   0x2   : > { %p138_p1 = scmp.lt.s32.totalorder %s1166_s12, 5 }
   0x4   : > { %p139_p2 = pnand %p824_p0, %p138_p1 }
   0x5   : > { %s825_s14 = sshll.u32 (!%p139_p2), %s820_s13, 6  ;;  %v1202_v0 = vld [vmem:[%s1448_s1] ss:$0 sm:$0xff] (!%p139_p2) }
   0x6   : > { %142 = sbr.rel (%p139_p2) target bundleno = 79 (0x4f), region = 32  ;;  %p163_p3 = scmp.lt.s32.totalorder (!%p139_p2), %s825_s14, 255  ;;  %v1212_v1 = vld [vmem:[%s1449_s2] ss:$0 sm:$0xff] (!%p139_p2) }
   0xd   : > { %s1452_s14 = smov (!%p163_p3, %s825_s14), 255 }
   0xe   : > { %s826_s15 = sshll.u32 %s1452_s14, 3  ;;  %s828_s23 = sshll.u32 %s1452_s14, 2 }
   0xf   : > { %s1207_s20 = scalar_lea.vmem %s1447_s0, %s826_s15  ;;  %s1244_s26 = scalar_lea.vmem %s1450_s3, %s828_s23 }
  0x10   : > { %v174_v2 = vld [vmem:[%s1207_s20] sm:$0xff]  ;;  %v175_v3 = vld [vmem:[%s1207_s20 + $0x8] sm:$0xff]  ;;  %v176_v4 = vld [vmem:[%s1207_s20 + $0x10] sm:$0xff] }
  0x11   : > { %v245_v5 = vmul.f32 %v1202_v0, %v174_v2  ;;  %v246_v6 = vmul.f32 %v1202_v0, %v175_v3  ;;  %v177_v7 = vld [vmem:[%s1207_s20 + $0x18] sm:$0xff]  ;;  %v247_v8 = vmul.f32 %v1202_v0, %v176_v4  ;;  %v178_v9 = vld [vmem:[%s1207_s20 + $0x20] sm:$0xff]  ;;  %v179_v10 = vld [vmem:[%s1207_s20 + $0x28] sm:$0xff] }
  0x12   : > { %v248_v11 = vmul.f32 %v1202_v0, %v177_v7  ;;  %v249_v12 = vmul.f32 %v1202_v0, %v178_v9  ;;  %v250_v13 = vmul.f32 %v1202_v0, %v179_v10  ;;  %v180_v14 = vld [vmem:[%s1207_s20 + $0x30] sm:$0xff]  ;;  %v181_v15 = vld [vmem:[%s1207_s20 + $0x38] sm:$0xff]  ;;  %v182_v24 = vld [vmem:[%s1207_s20 + $0x40] sm:$0xff] }
  0x13   : > { %v316_v16 = vadd.f32 %v1212_v1, %v245_v5  ;;  %v317_v17 = vadd.f32 %v1212_v1, %v246_v6  ;;  %v318_v18 = vadd.f32 %v1212_v1, %v247_v8  ;;  %v251_v19 = vmul.f32 %v1202_v0, %v180_v14  ;;  %v183_v25 = vld [vmem:[%s1207_s20 + $0x48] sm:$0xff]  ;;  %v184_v30 = vld [vmem:[%s1207_s20 + $0x50] sm:$0xff]  ;;  %v185_v35 = vld [vmem:[%s1207_s20 + $0x58] sm:$0xff] }
  0x14   : > { %v319_v20 = vadd.f32 %v1212_v1, %v248_v11  ;;  %v320_v21 = vadd.f32 %v1212_v1, %v249_v12  ;;  %v321_v22 = vadd.f32 %v1212_v1, %v250_v13  ;;  %v252_v23 = vmul.f32 %v1202_v0, %v181_v15  ;;  %v186_v36 = vld [vmem:[%s1207_s20 + $0x60] sm:$0xff]  ;;  %v187_v41 = vld [vmem:[%s1207_s20 + $0x68] sm:$0xff]  ;;  %v188_v42 = vld [vmem:[%s1207_s20 + $0x70] sm:$0xff] }
  0x15   : > { %v380_v26 = vmax.f32 %v316_v16, 0.0  ;;  %v381_v27 = vmax.f32 %v317_v17, 0.0  ;;  %v382_v28 = vmax.f32 %v318_v18, 0.0  ;;  %v322_v29 = vadd.f32 %v1212_v1, %v251_v19  ;;  %v189_v51 = vld [vmem:[%s1207_s20 + $0x78] sm:$0xff]  ;;  %v190_v56 = vld [vmem:[%s1207_s20 + $0x80] sm:$0xff]  ;;  %v191_v61 = vld [vmem:[%s1207_s20 + $0x88] sm:$0xff] }
  0x16   : > { %v383_v31 = vmax.f32 %v319_v20, 0.0  ;;  %v384_v32 = vmax.f32 %v320_v21, 0.0  ;;  %v385_v33 = vmax.f32 %v321_v22, 0.0  ;;  %v323_v34 = vadd.f32 %v1212_v1, %v252_v23  ;;  %v192_v4 = vld [vmem:[%s1207_s20 + $0x90] sm:$0xff]  ;;  %v193_v5 = vld [vmem:[%s1207_s20 + $0x98] sm:$0xff]  ;;  %v194_v10 = vld [vmem:[%s1207_s20 + $0xa0] sm:$0xff] }
  0x17   : > { %v964_v37 = vpack.c.bf16 %v381_v27, %v380_v26  ;;  %v386_v38 = vmax.f32 %v322_v29, 0.0  ;;  %v253_v39 = vmul.f32 %v1202_v0, %v182_v24  ;;  %v254_v40 = vmul.f32 %v1202_v0, %v183_v25  ;;  %v195_v15 = vld [vmem:[%s1207_s20 + $0xa8] sm:$0xff]  ;;  %v196_v20 = vld [vmem:[%s1207_s20 + $0xb0] sm:$0xff]  ;;  %v197_v25 = vld [vmem:[%s1207_s20 + $0xb8] sm:$0xff] }
  0x18   : > { %v969_v43 = vpack.c.bf16 %v383_v31, %v382_v28  ;;  %v974_v44 = vpack.c.bf16 %v385_v33, %v384_v32  ;;  %v387_v45 = vmax.f32 %v323_v34, 0.0  ;;  %v255_v46 = vmul.f32 %v1202_v0, %v184_v30  ;;  %v198_v30 = vld [vmem:[%s1207_s20 + $0xc0] sm:$0xff] }
  0x19   : > { %965 = vst [vmem:[%s1244_s26] sm:$0xff] %v964_v37   ;;  %v324_v47 = vadd.f32 %v1212_v1, %v253_v39  ;;  %v325_v48 = vadd.f32 %v1212_v1, %v254_v40  ;;  %v256_v49 = vmul.f32 %v1202_v0, %v185_v35  ;;  %v257_v50 = vmul.f32 %v1202_v0, %v186_v36  ;;  %v199_v35 = vld [vmem:[%s1207_s20 + $0xc8] sm:$0xff]  ;;  %v200_v40 = vld [vmem:[%s1207_s20 + $0xd0] sm:$0xff] }
  0x1a   : > { %1121 = vst [vmem:[%s1244_s26 + $0x8] sm:$0xff] %v969_v43   ;;  %1122 = vst [vmem:[%s1244_s26 + $0x10] sm:$0xff] %v974_v44   ;;  %v979_v52 = vpack.c.bf16 %v387_v45, %v386_v38  ;;  %v326_v53 = vadd.f32 %v1212_v1, %v255_v46  ;;  %v258_v54 = vmul.f32 %v1202_v0, %v187_v41  ;;  %v201_v41 = vld [vmem:[%s1207_s20 + $0xd8] sm:$0xff]  ;;  %v202_v46 = vld [vmem:[%s1207_s20 + $0xe0] sm:$0xff] }
  0x1b   : > { %v259_v55 = vmul.f32 %v1202_v0, %v188_v42  ;;  %v388_v57 = vmax.f32 %v324_v47, 0.0  ;;  %v389_v58 = vmax.f32 %v325_v48, 0.0  ;;  %v327_v59 = vadd.f32 %v1212_v1, %v256_v49 }
  0x1c   : > { %v328_v60 = vadd.f32 %v1212_v1, %v257_v50  ;;  %1123 = vst [vmem:[%s1244_s26 + $0x18] sm:$0xff] %v979_v52   ;;  %v390_v62 = vmax.f32 %v326_v53, 0.0  ;;  %v329_v63 = vadd.f32 %v1212_v1, %v258_v54  ;;  %v260_v2 = vmul.f32 %v1202_v0, %v189_v51  ;;  %v203_v51 = vld [vmem:[%s1207_s20 + $0xe8] sm:$0xff] }
  0x1d   : > { %v330_v3 = vadd.f32 %v1212_v1, %v259_v55  ;;  %v984_v6 = vpack.c.bf16 %v389_v58, %v388_v57  ;;  %v391_v7 = vmax.f32 %v327_v59, 0.0  ;;  %v261_v9 = vmul.f32 %v1202_v0, %v190_v56  ;;  %v204_v56 = vld [vmem:[%s1207_s20 + $0xf0] sm:$0xff] }
  0x1e   : > { %v392_v8 = vmax.f32 %v328_v60, 0.0  ;;  %v393_v11 = vmax.f32 %v329_v63, 0.0  ;;  %v331_v12 = vadd.f32 %v1212_v1, %v260_v2  ;;  %v262_v14 = vmul.f32 %v1202_v0, %v191_v61  ;;  %v205_v61 = vld [vmem:[%s1207_s20 + $0xf8] sm:$0xff] }
  0x1f   : > { %v394_v13 = vmax.f32 %v330_v3, 0.0  ;;  %1124 = vst [vmem:[%s1244_s26 + $0x20] sm:$0xff] %v984_v6   ;;  %v989_v16 = vpack.c.bf16 %v391_v7, %v390_v62  ;;  %v332_v17 = vadd.f32 %v1212_v1, %v261_v9  ;;  %v263_v18 = vmul.f32 %v1202_v0, %v192_v4  ;;  %v206_v4 = vld [vmem:[%s1207_s20 + $0x100] sm:$0xff]  ;;  %v207_v9 = vld [vmem:[%s1207_s20 + $0x108] sm:$0xff] }
  0x20   : > { %v264_v19 = vmul.f32 %v1202_v0, %v193_v5  ;;  %v994_v21 = vpack.c.bf16 %v393_v11, %v392_v8  ;;  %v395_v22 = vmax.f32 %v331_v12, 0.0  ;;  %v333_v23 = vadd.f32 %v1212_v1, %v262_v14  ;;  %v208_v14 = vld [vmem:[%s1207_s20 + $0x110] sm:$0xff] }
  0x21   : > { %v265_v24 = vmul.f32 %v1202_v0, %v194_v10  ;;  %1125 = vst [vmem:[%s1244_s26 + $0x28] sm:$0xff] %v989_v16   ;;  %v396_v26 = vmax.f32 %v332_v17, 0.0  ;;  %v334_v27 = vadd.f32 %v1212_v1, %v263_v18  ;;  %v266_v29 = vmul.f32 %v1202_v0, %v195_v15  ;;  %v209_v15 = vld [vmem:[%s1207_s20 + $0x118] sm:$0xff] }
  0x22   : > { %v335_v28 = vadd.f32 %v1212_v1, %v264_v19  ;;  %1126 = vst [vmem:[%s1244_s26 + $0x30] sm:$0xff] %v994_v21   ;;  %v999_v31 = vpack.c.bf16 %v395_v22, %v394_v13  ;;  %v397_v32 = vmax.f32 %v333_v23, 0.0  ;;  %v267_v34 = vmul.f32 %v1202_v0, %v196_v20  ;;  %v210_v20 = vld [vmem:[%s1207_s20 + $0x120] sm:$0xff] }
  0x23   : > { %v336_v33 = vadd.f32 %v1212_v1, %v265_v24  ;;  %v398_v36 = vmax.f32 %v334_v27, 0.0  ;;  %v337_v38 = vadd.f32 %v1212_v1, %v266_v29  ;;  %v268_v39 = vmul.f32 %v1202_v0, %v197_v25  ;;  %v211_v25 = vld [vmem:[%s1207_s20 + $0x128] sm:$0xff] }
  0x24   : > { %v399_v37 = vmax.f32 %v335_v28, 0.0  ;;  %1127 = vst [vmem:[%s1244_s26 + $0x38] sm:$0xff] %v999_v31   ;;  %v1004_v42 = vpack.c.bf16 %v397_v32, %v396_v26  ;;  %v338_v44 = vadd.f32 %v1212_v1, %v267_v34  ;;  %v269_v45 = vmul.f32 %v1202_v0, %v198_v30  ;;  %v212_v30 = vld [vmem:[%s1207_s20 + $0x130] sm:$0xff] }
  0x25   : > { %v400_v43 = vmax.f32 %v336_v33, 0.0  ;;  %v401_v48 = vmax.f32 %v337_v38, 0.0  ;;  %v339_v49 = vadd.f32 %v1212_v1, %v268_v39  ;;  %v270_v50 = vmul.f32 %v1202_v0, %v199_v35  ;;  %v213_v35 = vld [vmem:[%s1207_s20 + $0x138] sm:$0xff] }
  0x26   : > { %v1009_v47 = vpack.c.bf16 %v399_v37, %v398_v36  ;;  %1128 = vst [vmem:[%s1244_s26 + $0x40] sm:$0xff] %v1004_v42   ;;  %v402_v52 = vmax.f32 %v338_v44, 0.0  ;;  %v340_v53 = vadd.f32 %v1212_v1, %v269_v45  ;;  %v271_v54 = vmul.f32 %v1202_v0, %v200_v40  ;;  %v214_v40 = vld [vmem:[%s1207_s20 + $0x140] sm:$0xff]  ;;  %v215_v45 = vld [vmem:[%s1207_s20 + $0x148] sm:$0xff] }
  0x27   : > { %v272_v55 = vmul.f32 %v1202_v0, %v201_v41  ;;  %v1014_v57 = vpack.c.bf16 %v401_v48, %v400_v43  ;;  %v403_v58 = vmax.f32 %v339_v49, 0.0  ;;  %v341_v59 = vadd.f32 %v1212_v1, %v270_v50  ;;  %v216_v50 = vld [vmem:[%s1207_s20 + $0x150] sm:$0xff] }
  0x28   : > { %1129 = vst [vmem:[%s1244_s26 + $0x48] sm:$0xff] %v1009_v47   ;;  %v273_v60 = vmul.f32 %v1202_v0, %v202_v46  ;;  %v404_v62 = vmax.f32 %v340_v53, 0.0  ;;  %v342_v63 = vadd.f32 %v1212_v1, %v271_v54  ;;  %v274_v3 = vmul.f32 %v1202_v0, %v203_v51  ;;  %v217_v51 = vld [vmem:[%s1207_s20 + $0x158] sm:$0xff] }
  0x29   : > { %v343_v2 = vadd.f32 %v1212_v1, %v272_v55  ;;  %1130 = vst [vmem:[%s1244_s26 + $0x50] sm:$0xff] %v1014_v57   ;;  %v1019_v5 = vpack.c.bf16 %v403_v58, %v402_v52  ;;  %v405_v6 = vmax.f32 %v341_v59, 0.0  ;;  %v275_v8 = vmul.f32 %v1202_v0, %v204_v56  ;;  %v218_v56 = vld [vmem:[%s1207_s20 + $0x160] sm:$0xff] }
  0x2a   : > { %v344_v7 = vadd.f32 %v1212_v1, %v273_v60  ;;  %v406_v10 = vmax.f32 %v342_v63, 0.0  ;;  %v345_v12 = vadd.f32 %v1212_v1, %v274_v3  ;;  %v276_v13 = vmul.f32 %v1202_v0, %v205_v61  ;;  %v219_v61 = vld [vmem:[%s1207_s20 + $0x168] sm:$0xff] }
  0x2b   : > { %v407_v11 = vmax.f32 %v343_v2, 0.0  ;;  %1131 = vst [vmem:[%s1244_s26 + $0x58] sm:$0xff] %v1019_v5   ;;  %v1024_v16 = vpack.c.bf16 %v405_v6, %v404_v62  ;;  %v346_v18 = vadd.f32 %v1212_v1, %v275_v8  ;;  %v277_v19 = vmul.f32 %v1202_v0, %v206_v4  ;;  %v220_v4 = vld [vmem:[%s1207_s20 + $0x170] sm:$0xff] }
  0x2c   : > { %v408_v17 = vmax.f32 %v344_v7, 0.0  ;;  %v409_v22 = vmax.f32 %v345_v12, 0.0  ;;  %v347_v23 = vadd.f32 %v1212_v1, %v276_v13  ;;  %v278_v24 = vmul.f32 %v1202_v0, %v207_v9  ;;  %v221_v9 = vld [vmem:[%s1207_s20 + $0x178] sm:$0xff] }
  0x2d   : > { %v1029_v21 = vpack.c.bf16 %v407_v11, %v406_v10  ;;  %1132 = vst [vmem:[%s1244_s26 + $0x60] sm:$0xff] %v1024_v16   ;;  %v410_v26 = vmax.f32 %v346_v18, 0.0  ;;  %v348_v27 = vadd.f32 %v1212_v1, %v277_v19  ;;  %v279_v28 = vmul.f32 %v1202_v0, %v208_v14  ;;  %v222_v14 = vld [vmem:[%s1207_s20 + $0x180] sm:$0xff]  ;;  %v223_v19 = vld [vmem:[%s1207_s20 + $0x188] sm:$0xff] }
  0x2e   : > { %v280_v29 = vmul.f32 %v1202_v0, %v209_v15  ;;  %v1034_v31 = vpack.c.bf16 %v409_v22, %v408_v17  ;;  %v411_v32 = vmax.f32 %v347_v23, 0.0  ;;  %v349_v33 = vadd.f32 %v1212_v1, %v278_v24  ;;  %v224_v24 = vld [vmem:[%s1207_s20 + $0x190] sm:$0xff] }
  0x2f   : > { %1133 = vst [vmem:[%s1244_s26 + $0x68] sm:$0xff] %v1029_v21   ;;  %v281_v34 = vmul.f32 %v1202_v0, %v210_v20  ;;  %v412_v36 = vmax.f32 %v348_v27, 0.0  ;;  %v350_v37 = vadd.f32 %v1212_v1, %v279_v28  ;;  %v282_v39 = vmul.f32 %v1202_v0, %v211_v25  ;;  %v225_v25 = vld [vmem:[%s1207_s20 + $0x198] sm:$0xff] }
  0x30   : > { %v351_v38 = vadd.f32 %v1212_v1, %v280_v29  ;;  %1134 = vst [vmem:[%s1244_s26 + $0x70] sm:$0xff] %v1034_v31   ;;  %v1039_v41 = vpack.c.bf16 %v411_v32, %v410_v26  ;;  %v413_v42 = vmax.f32 %v349_v33, 0.0  ;;  %v283_v44 = vmul.f32 %v1202_v0, %v212_v30  ;;  %v226_v30 = vld [vmem:[%s1207_s20 + $0x1a0] sm:$0xff] }
  0x31   : > { %v352_v43 = vadd.f32 %v1212_v1, %v281_v34  ;;  %v414_v46 = vmax.f32 %v350_v37, 0.0  ;;  %v353_v48 = vadd.f32 %v1212_v1, %v282_v39  ;;  %v284_v49 = vmul.f32 %v1202_v0, %v213_v35  ;;  %v227_v35 = vld [vmem:[%s1207_s20 + $0x1a8] sm:$0xff] }
  0x32   : > { %v415_v47 = vmax.f32 %v351_v38, 0.0  ;;  %1135 = vst [vmem:[%s1244_s26 + $0x78] sm:$0xff] %v1039_v41   ;;  %v1044_v52 = vpack.c.bf16 %v413_v42, %v412_v36  ;;  %v354_v54 = vadd.f32 %v1212_v1, %v283_v44  ;;  %v285_v55 = vmul.f32 %v1202_v0, %v214_v40  ;;  %v228_v40 = vld [vmem:[%s1207_s20 + $0x1b0] sm:$0xff] }
  0x33   : > { %v416_v53 = vmax.f32 %v352_v43, 0.0  ;;  %v417_v58 = vmax.f32 %v353_v48, 0.0  ;;  %v355_v59 = vadd.f32 %v1212_v1, %v284_v49  ;;  %v286_v60 = vmul.f32 %v1202_v0, %v215_v45  ;;  %v229_v45 = vld [vmem:[%s1207_s20 + $0x1b8] sm:$0xff] }
  0x34   : > { %v1049_v57 = vpack.c.bf16 %v415_v47, %v414_v46  ;;  %1136 = vst [vmem:[%s1244_s26 + $0x80] sm:$0xff] %v1044_v52   ;;  %v418_v62 = vmax.f32 %v354_v54, 0.0  ;;  %v356_v63 = vadd.f32 %v1212_v1, %v285_v55  ;;  %v287_v2 = vmul.f32 %v1202_v0, %v216_v50  ;;  %v230_v50 = vld [vmem:[%s1207_s20 + $0x1c0] sm:$0xff]  ;;  %v231_v55 = vld [vmem:[%s1207_s20 + $0x1c8] sm:$0xff] }
  0x35   : > { %v288_v3 = vmul.f32 %v1202_v0, %v217_v51  ;;  %v1054_v5 = vpack.c.bf16 %v417_v58, %v416_v53  ;;  %v419_v6 = vmax.f32 %v355_v59, 0.0  ;;  %v357_v7 = vadd.f32 %v1212_v1, %v286_v60  ;;  %v232_v60 = vld [vmem:[%s1207_s20 + $0x1d0] sm:$0xff] }
  0x36   : > { %1137 = vst [vmem:[%s1244_s26 + $0x88] sm:$0xff] %v1049_v57   ;;  %v289_v8 = vmul.f32 %v1202_v0, %v218_v56  ;;  %v420_v10 = vmax.f32 %v356_v63, 0.0  ;;  %v358_v11 = vadd.f32 %v1212_v1, %v287_v2  ;;  %v290_v13 = vmul.f32 %v1202_v0, %v219_v61  ;;  %v233_v61 = vld [vmem:[%s1207_s20 + $0x1d8] sm:$0xff] }
  0x37   : > { %v359_v12 = vadd.f32 %v1212_v1, %v288_v3  ;;  %1138 = vst [vmem:[%s1244_s26 + $0x90] sm:$0xff] %v1054_v5   ;;  %v1059_v15 = vpack.c.bf16 %v419_v6, %v418_v62  ;;  %v421_v16 = vmax.f32 %v357_v7, 0.0  ;;  %v291_v18 = vmul.f32 %v1202_v0, %v220_v4  ;;  %v234_v4 = vld [vmem:[%s1207_s20 + $0x1e0] sm:$0xff] }
  0x38   : > { %v360_v17 = vadd.f32 %v1212_v1, %v289_v8  ;;  %v422_v20 = vmax.f32 %v358_v11, 0.0  ;;  %v361_v22 = vadd.f32 %v1212_v1, %v290_v13  ;;  %v292_v23 = vmul.f32 %v1202_v0, %v221_v9  ;;  %v235_v9 = vld [vmem:[%s1207_s20 + $0x1e8] sm:$0xff] }
  0x39   : > { %v423_v21 = vmax.f32 %v359_v12, 0.0  ;;  %1139 = vst [vmem:[%s1244_s26 + $0x98] sm:$0xff] %v1059_v15   ;;  %v1064_v26 = vpack.c.bf16 %v421_v16, %v420_v10  ;;  %v362_v28 = vadd.f32 %v1212_v1, %v291_v18  ;;  %v293_v29 = vmul.f32 %v1202_v0, %v222_v14  ;;  %v236_v14 = vld [vmem:[%s1207_s20 + $0x1f0] sm:$0xff] }
  0x3a   : > { %v424_v27 = vmax.f32 %v360_v17, 0.0  ;;  %v425_v32 = vmax.f32 %v361_v22, 0.0  ;;  %v363_v33 = vadd.f32 %v1212_v1, %v292_v23  ;;  %v294_v34 = vmul.f32 %v1202_v0, %v223_v19  ;;  %v237_v19 = vld [vmem:[%s1207_s20 + $0x1f8] sm:$0xff] }
  0x3b   : > { %v1069_v31 = vpack.c.bf16 %v423_v21, %v422_v20  ;;  %1140 = vst [vmem:[%s1244_s26 + $0xa0] sm:$0xff] %v1064_v26   ;;  %v426_v36 = vmax.f32 %v362_v28, 0.0  ;;  %v364_v37 = vadd.f32 %v1212_v1, %v293_v29  ;;  %v295_v38 = vmul.f32 %v1202_v0, %v224_v24 }
  0x3c   : > { %v296_v39 = vmul.f32 %v1202_v0, %v225_v25  ;;  %v1074_v41 = vpack.c.bf16 %v425_v32, %v424_v27  ;;  %v427_v42 = vmax.f32 %v363_v33, 0.0  ;;  %v365_v43 = vadd.f32 %v1212_v1, %v294_v34 }
  0x3d   : > { %1141 = vst [vmem:[%s1244_s26 + $0xa8] sm:$0xff] %v1069_v31   ;;  %v297_v44 = vmul.f32 %v1202_v0, %v226_v30  ;;  %v428_v46 = vmax.f32 %v364_v37, 0.0  ;;  %v366_v47 = vadd.f32 %v1212_v1, %v295_v38  ;;  %v298_v49 = vmul.f32 %v1202_v0, %v227_v35 }
  0x3e   : > { %v367_v48 = vadd.f32 %v1212_v1, %v296_v39  ;;  %1142 = vst [vmem:[%s1244_s26 + $0xb0] sm:$0xff] %v1074_v41   ;;  %v1079_v51 = vpack.c.bf16 %v427_v42, %v426_v36  ;;  %v429_v52 = vmax.f32 %v365_v43, 0.0  ;;  %v299_v54 = vmul.f32 %v1202_v0, %v228_v40 }
  0x3f   : > { %v368_v53 = vadd.f32 %v1212_v1, %v297_v44  ;;  %v430_v56 = vmax.f32 %v366_v47, 0.0  ;;  %v369_v58 = vadd.f32 %v1212_v1, %v298_v49  ;;  %v300_v59 = vmul.f32 %v1202_v0, %v229_v45 }
  0x40   : > { %v431_v57 = vmax.f32 %v367_v48, 0.0  ;;  %1143 = vst [vmem:[%s1244_s26 + $0xb8] sm:$0xff] %v1079_v51   ;;  %v1084_v62 = vpack.c.bf16 %v429_v52, %v428_v46  ;;  %v370_v2 = vadd.f32 %v1212_v1, %v299_v54  ;;  %v301_v3 = vmul.f32 %v1202_v0, %v230_v50 }
  0x41   : > { %v432_v63 = vmax.f32 %v368_v53, 0.0  ;;  %v433_v6 = vmax.f32 %v369_v58, 0.0  ;;  %v371_v7 = vadd.f32 %v1212_v1, %v300_v59  ;;  %v302_v8 = vmul.f32 %v1202_v0, %v231_v55 }
  0x42   : > { %v1089_v5 = vpack.c.bf16 %v431_v57, %v430_v56  ;;  %1144 = vst [vmem:[%s1244_s26 + $0xc0] sm:$0xff] %v1084_v62   ;;  %v434_v10 = vmax.f32 %v370_v2, 0.0  ;;  %v372_v11 = vadd.f32 %v1212_v1, %v301_v3  ;;  %v303_v12 = vmul.f32 %v1202_v0, %v232_v60 }
  0x43   : > { %v304_v13 = vmul.f32 %v1202_v0, %v233_v61  ;;  %v1094_v15 = vpack.c.bf16 %v433_v6, %v432_v63  ;;  %v435_v16 = vmax.f32 %v371_v7, 0.0  ;;  %v373_v17 = vadd.f32 %v1212_v1, %v302_v8 }
  0x44   : > { %1145 = vst [vmem:[%s1244_s26 + $0xc8] sm:$0xff] %v1089_v5   ;;  %v305_v18 = vmul.f32 %v1202_v0, %v234_v4  ;;  %v436_v20 = vmax.f32 %v372_v11, 0.0  ;;  %v374_v21 = vadd.f32 %v1212_v1, %v303_v12  ;;  %v306_v23 = vmul.f32 %v1202_v0, %v235_v9 }
  0x45   : > { %v375_v22 = vadd.f32 %v1212_v1, %v304_v13  ;;  %1146 = vst [vmem:[%s1244_s26 + $0xd0] sm:$0xff] %v1094_v15   ;;  %v1099_v24 = vpack.c.bf16 %v435_v16, %v434_v10  ;;  %v437_v25 = vmax.f32 %v373_v17, 0.0  ;;  %v307_v27 = vmul.f32 %v1202_v0, %v236_v14 }
  0x46   : > { %v376_v26 = vadd.f32 %v1212_v1, %v305_v18  ;;  %v438_v28 = vmax.f32 %v374_v21, 0.0  ;;  %v377_v30 = vadd.f32 %v1212_v1, %v306_v23  ;;  %v308_v31 = vmul.f32 %v1202_v0, %v237_v19 }
  0x47   : > { %v439_v29 = vmax.f32 %v375_v22, 0.0  ;;  %1147 = vst [vmem:[%s1244_s26 + $0xd8] sm:$0xff] %v1099_v24   ;;  %v1104_v32 = vpack.c.bf16 %v437_v25, %v436_v20  ;;  %v378_v34 = vadd.f32 %v1212_v1, %v307_v27 }
  0x48   : > { %v440_v33 = vmax.f32 %v376_v26, 0.0  ;;  %v441_v36 = vmax.f32 %v377_v30, 0.0  ;;  %v379_v37 = vadd.f32 %v1212_v1, %v308_v31 }
  0x49   : > { %v1109_v35 = vpack.c.bf16 %v439_v29, %v438_v28  ;;  %1148 = vst [vmem:[%s1244_s26 + $0xe0] sm:$0xff] %v1104_v32   ;;  %v442_v38 = vmax.f32 %v378_v34, 0.0 }
  0x4a   : > { %v1114_v39 = vpack.c.bf16 %v441_v36, %v440_v33  ;;  %v443_v40 = vmax.f32 %v379_v37, 0.0 }
  0x4b   : > { %1149 = vst [vmem:[%s1244_s26 + $0xe8] sm:$0xff] %v1109_v35  }
  0x4c   : > { %1150 = vst [vmem:[%s1244_s26 + $0xf0] sm:$0xff] %v1114_v39   ;;  %v1119_v41 = vpack.c.bf16 %v443_v40, %v442_v38 }
  0x4e   : > { %1151 = vst [vmem:[%s1244_s26 + $0xf8] sm:$0xff] %v1119_v41  }
  0x4f PF: > { %s13_s12 = sadd.s32 1, %s1166_s12  }
  0x50   : > { %p10_p4 = scmp.ge.s32.totalorder %s13_s12, 6  }
  0x52   :  { %12 = sbr.rel (!%p10_p4) target bundleno = 1 (0x1), region = 62 }

// kernel: generator_forward.21
= control target key start
LH: loop header
LB: loop body
LE: loop exit
PB: predicated region body
PF: predicated region fallthrough
CT: control target
= control target key end

     0   :  { %s1586_s9 = smov 0   ;;  %s1588_s10 = smov 0   ;;  %s1754_s0 = inlined_call_operand.vmem [shape: bf16[4,2048,128], index: 0, kind: input, shape index: {}]   ;;  %s1755_s1 = inlined_call_operand.vmem [shape: bf16[4,128,128], index: 1, kind: input, shape index: {}]   ;;  %s1756_s2 = inlined_call_operand.vmem [shape: f32[4,2048,128], index: 2, kind: output, shape index: {}]  }
   0x1   :  { %s1590_s11 = smov 0   ;;  %s1592_s12 = smov 0  }
   0x2   :  { %s1594_s13 = smov 0  }
   0x3 LB: > { %s34_s14 = sadd.s32 1, %s1561_s11  ;;  %s38_s15 = sadd.s32 1, %s1565_s12  ;;  %s1569_s13 = sphi %s1594_s13, %s12_s13   ;;  %s1565_s12 = sphi %s1592_s12, %s1760_s12   ;;  %s1561_s11 = sphi %s1590_s11, %s1759_s11   ;;  %s1557_s10 = sphi %s1588_s10, %s1758_s10   ;;  %s1553_s9 = sphi %s1586_s9, %s1757_s9  }
   0x4   : > { %p36_p0 = scmp.ge.s32.totalorder %s34_s14, 4  ;;  %p1135_p1 = scmp.ge.s32.totalorder %s1569_s13, 1 }
   0x5   : > { %p176_p2 = scmp.lt.s32.totalorder %s1569_s13, 17 }
   0x6   : > { %s1762_s14 = smov (%p36_p0, %s34_s14), 0  ;;  %s1764_s15 = smov (!%p36_p0, %s38_s15), %s1565_s12 }
   0x7   : > { %p177_p3 = pnand %p1135_p1, %p176_p2  ;;  %p40_p4 = scmp.ge.s32.totalorder %s1764_s15, 4 }
   0x8   : > { %s1136_s16 = sshll.u32 (!%p177_p3), %s1553_s9, 6  ;;  %p225_p5 = scmp.lt.s32.totalorder (!%p177_p3), %s1557_s10, 3 }
   0x9   : > { %s1766_s15 = smov (%p40_p4, %s1764_s15), 0  ;;  %180 = sbr.rel (%p177_p3) target bundleno = 342 (0x156), region = 28 }
   0xa   : > { %p227_p6 = scmp.lt.s32.totalorder (!%p177_p3), %s1136_s16, 255 }
  0x10   : > { %s1768_s10 = smov (!%p225_p5, %s1557_s10), 3  ;;  %s1770_s16 = smov (!%p227_p6, %s1136_s16), 255 }
  0x11   : > { %s1137_s17 = sshll.u32 %s1768_s10, 8  ;;  %s1186_s18 = sshll.u32 %s1768_s10, 6 }
  0x12   : > { %s1619_s21 = scalar_lea.vmem %s1755_s1, %s1186_s18  ;;  %s1621_s22 = sadd.s32 %s1137_s17, %s1770_s16 }
  0x13   : > { %v1363_v0 = vld [vmem:[%s1619_s21] sm:$0xff]   ;;  %v1364_v1 = vld [vmem:[%s1619_s21 + $0x8] sm:$0xff]   ;;  %s1138_s23 = sshll.u32 %s1621_s22, 2  ;;  %v1365_v2 = vld [vmem:[%s1619_s21 + $0x10] sm:$0xff]   ;;  %s1143_s27 = sshll.u32 %s1621_s22, 3 }
  0x14   : > { %1227 = vmatprep.subr.bf16.mxu0 %v1363_v0  ;;  %1307 = vmatprep.subr.bf16.mxu1 %v1363_v0  ;;  %s1630_s26 = scalar_lea.vmem %s1754_s0, %s1138_s23  ;;  %v1366_v3 = vld [vmem:[%s1619_s21 + $0x18] sm:$0xff]   ;;  %v1367_v6 = vld [vmem:[%s1619_s21 + $0x20] sm:$0xff]   ;;  %v1368_v7 = vld [vmem:[%s1619_s21 + $0x28] sm:$0xff]   ;;  %s1673_s30 = scalar_lea.vmem %s1756_s2, %s1143_s27 }
  0x15   : > { %1228 = vmatpush3.bf16.msra.mxu0 %v1363_v0  ;;  %1315 = vmatpush3.bf16.msra.mxu1 %v1363_v0  ;;  %v1371_v4 = vld [vmem:[%s1630_s26] sm:$0xff]   ;;  %v1369_v8 = vld [vmem:[%s1619_s21 + $0x30] sm:$0xff]   ;;  %v1370_v9 = vld [vmem:[%s1619_s21 + $0x38] sm:$0xff]  }
  0x16   : > { %1229 = vmatprep.subr.bf16.mxu0 %v1364_v1  ;;  %1308 = vmatprep.subr.bf16.mxu1 %v1364_v1  ;;  %v1372_v5 = vld [vmem:[%s1630_s26 + $0x80] sm:$0xff]   ;;  %v1373_v10 = vld [vmem:[%s1630_s26 + $0x8] sm:$0xff]   ;;  %v1375_v12 = vld [vmem:[%s1630_s26 + $0x10] sm:$0xff]  }
  0x17   : > { %1243 = vmatprep.mubr.bf16.mxu0 %v1371_v4  ;;  %1275 = vmatprep.mubr.bf16.mxu1 %v1372_v5  ;;  %v1374_v11 = vld [vmem:[%s1630_s26 + $0x88] sm:$0xff]   ;;  %v1376_v13 = vld [vmem:[%s1630_s26 + $0x90] sm:$0xff]   ;;  %v1377_v14 = vld [vmem:[%s1630_s26 + $0x18] sm:$0xff]  }
  0x18   : > { %v1378_v15 = vld [vmem:[%s1630_s26 + $0x98] sm:$0xff]   ;;  %v1379_v16 = vld [vmem:[%s1630_s26 + $0x20] sm:$0xff]   ;;  %v1381_v18 = vld [vmem:[%s1630_s26 + $0x28] sm:$0xff]  }
  0x19   : > { %1230 = vmatpush3.bf16.msra.mxu0 %v1364_v1  ;;  %1316 = vmatpush3.bf16.msra.mxu1 %v1364_v1  ;;  %v1380_v17 = vld [vmem:[%s1630_s26 + $0xa0] sm:$0xff]   ;;  %v1382_v19 = vld [vmem:[%s1630_s26 + $0xa8] sm:$0xff]   ;;  %v1383_v20 = vld [vmem:[%s1630_s26 + $0x30] sm:$0xff]  }
  0x1a   : > { %1231 = vmatprep.subr.bf16.mxu0 %v1365_v2  ;;  %1309 = vmatprep.subr.bf16.mxu1 %v1365_v2  ;;  %v1384_v21 = vld [vmem:[%s1630_s26 + $0xb0] sm:$0xff]   ;;  %v1385_v22 = vld [vmem:[%s1630_s26 + $0x38] sm:$0xff]   ;;  %v1387_v24 = vld [vmem:[%s1630_s26 + $0x40] sm:$0xff]  }
  0x1b   : > { %v1386_v23 = vld [vmem:[%s1630_s26 + $0xb8] sm:$0xff]   ;;  %v1388_v25 = vld [vmem:[%s1630_s26 + $0xc0] sm:$0xff]   ;;  %v1389_v26 = vld [vmem:[%s1630_s26 + $0x48] sm:$0xff]  }
  0x1c   : > { %v1390_v27 = vld [vmem:[%s1630_s26 + $0xc8] sm:$0xff]   ;;  %v1391_v28 = vld [vmem:[%s1630_s26 + $0x50] sm:$0xff]   ;;  %v1393_v30 = vld [vmem:[%s1630_s26 + $0x58] sm:$0xff]  }
  0x1d   : > { %1232 = vmatpush3.bf16.msra.mxu0 %v1365_v2  ;;  %1317 = vmatpush3.bf16.msra.mxu1 %v1365_v2  ;;  %v1392_v29 = vld [vmem:[%s1630_s26 + $0xd0] sm:$0xff]   ;;  %v1394_v31 = vld [vmem:[%s1630_s26 + $0xd8] sm:$0xff]   ;;  %v1395_v32 = vld [vmem:[%s1630_s26 + $0x60] sm:$0xff]  }
  0x1e   : > { %1233 = vmatprep.subr.bf16.mxu0 %v1366_v3  ;;  %1310 = vmatprep.subr.bf16.mxu1 %v1366_v3  ;;  %v1396_v33 = vld [vmem:[%s1630_s26 + $0xe0] sm:$0xff]   ;;  %v1397_v34 = vld [vmem:[%s1630_s26 + $0x68] sm:$0xff]   ;;  %v1399_v36 = vld [vmem:[%s1630_s26 + $0x70] sm:$0xff]  }
  0x1f   : > { %v1398_v35 = vld [vmem:[%s1630_s26 + $0xe8] sm:$0xff]   ;;  %v1400_v37 = vld [vmem:[%s1630_s26 + $0xf0] sm:$0xff]   ;;  %v1401_v38 = vld [vmem:[%s1630_s26 + $0x78] sm:$0xff]  }
  0x20   : > { %v1402_v39 = vld [vmem:[%s1630_s26 + $0xf8] sm:$0xff]  }
  0x21   : > { %1234 = vmatpush3.bf16.msra.mxu0 %v1366_v3  ;;  %1318 = vmatpush3.bf16.msra.mxu1 %v1366_v3 }
  0x22   : > { %1235 = vmatprep.subr.bf16.mxu0 %v1367_v6  ;;  %1311 = vmatprep.subr.bf16.mxu1 %v1367_v6 }
  0x25   : > { %1236 = vmatpush3.bf16.msra.mxu0 %v1367_v6  ;;  %1319 = vmatpush3.bf16.msra.mxu1 %v1367_v6 }
  0x26   : > { %1237 = vmatprep.subr.bf16.mxu0 %v1368_v7  ;;  %1312 = vmatprep.subr.bf16.mxu1 %v1368_v7 }
  0x29   : > { %1238 = vmatpush3.bf16.msra.mxu0 %v1368_v7  ;;  %1320 = vmatpush3.bf16.msra.mxu1 %v1368_v7 }
  0x2a   : > { %1239 = vmatprep.subr.bf16.mxu0 %v1369_v8  ;;  %1313 = vmatprep.subr.bf16.mxu1 %v1369_v8 }
  0x2d   : > { %1240 = vmatpush3.bf16.msra.mxu0 %v1369_v8  ;;  %1321 = vmatpush3.bf16.msra.mxu1 %v1369_v8 }
  0x2e   : > { %1241 = vmatprep.subr.bf16.mxu0 %v1370_v9  ;;  %1314 = vmatprep.subr.bf16.mxu1 %v1370_v9 }
  0x31   : > { %1242 = vmatpush3.bf16.msra.mxu0 %v1370_v9  ;;  %1322 = vmatpush3.bf16.msra.mxu1 %v1370_v9 }
  0x34   : > { %1244 = vmatmul.mubr.bf16.vlgmr.msra.gmra.mrb[0].mxu0 %v1373_v10  ;;  %1276 = vmatmul.mubr.bf16.vlgmr.msra.gmra.mrb[0].mxu1 %v1374_v11 }
  0x35   : > { %1247 = vmatprep.mubr.bf16.mxu0 %v1375_v12  ;;  %1279 = vmatprep.mubr.bf16.mxu1 %v1376_v13 }
  0x3c   : > { %1248 = vmatmul.mubr.bf16.gmra.mrb[4].mxu0 %v1377_v14  ;;  %1280 = vmatmul.mubr.bf16.gmra.mrb[4].mxu1 %v1378_v15 }
  0x3d   : > { %1251 = vmatprep.mubr.bf16.mxu0 %v1379_v16  ;;  %1283 = vmatprep.mubr.bf16.mxu1 %v1380_v17 }
  0x44   : > { %1252 = vmatmul.mubr.bf16.gmra.mrb[8].mxu0 %v1381_v18  ;;  %1284 = vmatmul.mubr.bf16.gmra.mrb[8].mxu1 %v1382_v19 }
  0x45   : > { %1255 = vmatprep.mubr.bf16.mxu0 %v1383_v20  ;;  %1287 = vmatprep.mubr.bf16.mxu1 %v1384_v21 }
  0x4c   : > { %1256 = vmatmul.mubr.bf16.gmra.mrb[12].mxu0 %v1385_v22  ;;  %1288 = vmatmul.mubr.bf16.gmra.mrb[12].mxu1 %v1386_v23 }
  0x4d   : > { %1259 = vmatprep.mubr.bf16.mxu0 %v1387_v24  ;;  %1291 = vmatprep.mubr.bf16.mxu1 %v1388_v25 }
  0x54   : > { %1260 = vmatmul.mubr.bf16.gmra.mrb[16].mxu0 %v1389_v26  ;;  %1292 = vmatmul.mubr.bf16.gmra.mrb[16].mxu1 %v1390_v27 }
  0x55   : > { %1263 = vmatprep.mubr.bf16.mxu0 %v1391_v28  ;;  %1295 = vmatprep.mubr.bf16.mxu1 %v1392_v29 }
  0x5c   : > { %1264 = vmatmul.mubr.bf16.gmra.mrb[20].mxu0 %v1393_v30  ;;  %1296 = vmatmul.mubr.bf16.gmra.mrb[20].mxu1 %v1394_v31 }
  0x5d   : > { %1267 = vmatprep.mubr.bf16.mxu0 %v1395_v32  ;;  %1299 = vmatprep.mubr.bf16.mxu1 %v1396_v33 }
  0x64   : > { %1268 = vmatmul.mubr.bf16.gmra.mrb[24].mxu0 %v1397_v34  ;;  %1300 = vmatmul.mubr.bf16.gmra.mrb[24].mxu1 %v1398_v35 }
  0x65   : > { %1271 = vmatprep.mubr.bf16.mxu0 %v1399_v36  ;;  %1303 = vmatprep.mubr.bf16.mxu1 %v1400_v37 }
  0x6c   : > { %1272 = vmatmul.mubr.bf16.gmra.mrb[28].mxu0 %v1401_v38  ;;  %1304 = vmatmul.mubr.bf16.gmra.mrb[28].mxu1 %v1402_v39 }
 0x107   : > { %v1245_v40 = vpop.f32.mrb[0].mxu0  ;;  %v1277_v41 = vpop.f32.mrb[0].mxu1 }
 0x108   : > { %1403 = vtanh.f32 %v1245_v40  ;;  %v618_v42 = vpop.f32.mrb[1].mxu0  ;;  %v746_v43 = vpop.f32.mrb[1].mxu1 }
 0x109   : > { %1405 = vtanh.f32 %v1277_v41  ;;  %v1246_v44 = vpop.f32.mrb[2].mxu0  ;;  %v1278_v45 = vpop.f32.mrb[2].mxu1 }
 0x10a   : > { %1407 = vtanh.f32 %v618_v42  ;;  %v621_v46 = vpop.f32.mrb[3].mxu0  ;;  %v749_v47 = vpop.f32.mrb[3].mxu1 }
 0x10b   : > { %1409 = vtanh.f32 %v746_v43 }
 0x10c   : > { %1411 = vtanh.f32 %v1246_v44 }
 0x10d   : > { %1413 = vtanh.f32 %v1278_v45 }
 0x10e   : > { %1415 = vtanh.f32 %v621_v46 }
 0x10f   : > { %1417 = vtanh.f32 %v749_v47  ;;  %v1249_v48 = vpop.f32.mrb[4].mxu0  ;;  %v1281_v49 = vpop.f32.mrb[4].mxu1 }
 0x110   : > { %1419 = vtanh.f32 %v1249_v48  ;;  %v634_v50 = vpop.f32.mrb[5].mxu0  ;;  %v762_v51 = vpop.f32.mrb[5].mxu1 }
 0x111   : > { %1421 = vtanh.f32 %v1281_v49  ;;  %v1250_v52 = vpop.f32.mrb[6].mxu0  ;;  %v1282_v53 = vpop.f32.mrb[6].mxu1 }
 0x112   : > { %v1404_v54 = vpop.eup %1403  ;;  %1423 = vtanh.f32 %v634_v50  ;;  %v637_v55 = vpop.f32.mrb[7].mxu0 }
 0x113   : > { %v765_v56 = vpop.f32.mrb[7].mxu1  ;;  %v1406_v57 = vpop.eup %1405  ;;  %939 = vst [vmem:[%s1673_s30 + $0x10] sm:$0xff] %v1404_v54  ;;  %1425 = vtanh.f32 %v762_v51 }
 0x114   : > { %v1408_v58 = vpop.eup %1407  ;;  %971 = vst [vmem:[%s1673_s30 + $0x110] sm:$0xff] %v1406_v57  ;;  %1427 = vtanh.f32 %v1250_v52 }
 0x115   : > { %v1410_v59 = vpop.eup %1409  ;;  %937 = vst [vmem:[%s1673_s30] sm:$0xff] %v1408_v58  ;;  %1429 = vtanh.f32 %v1282_v53 }
 0x116   : > { %v1412_v60 = vpop.eup %1411  ;;  %969 = vst [vmem:[%s1673_s30 + $0x100] sm:$0xff] %v1410_v59  ;;  %1431 = vtanh.f32 %v637_v55 }
 0x117   : > { %v1414_v61 = vpop.eup %1413  ;;  %940 = vst [vmem:[%s1673_s30 + $0x18] sm:$0xff] %v1412_v60  ;;  %1433 = vtanh.f32 %v765_v56  ;;  %v1253_v62 = vpop.f32.mrb[8].mxu0 }
 0x118   : > { %v1285_v63 = vpop.f32.mrb[8].mxu1  ;;  %v1416_v0 = vpop.eup %1415  ;;  %972 = vst [vmem:[%s1673_s30 + $0x118] sm:$0xff] %v1414_v61  ;;  %1435 = vtanh.f32 %v1253_v62 }
 0x119   : > { %v650_v1 = vpop.f32.mrb[9].mxu0  ;;  %v778_v2 = vpop.f32.mrb[9].mxu1  ;;  %938 = vst [vmem:[%s1673_s30 + $0x8] sm:$0xff] %v1416_v0  ;;  %1437 = vtanh.f32 %v1285_v63 }
 0x11a   : > { %v1418_v3 = vpop.eup %1417  ;;  %v1254_v4 = vpop.f32.mrb[10].mxu0  ;;  %1439 = vtanh.f32 %v650_v1 }
 0x11b   : > { %v1286_v5 = vpop.f32.mrb[10].mxu1  ;;  %v1420_v6 = vpop.eup %1419  ;;  %970 = vst [vmem:[%s1673_s30 + $0x108] sm:$0xff] %v1418_v3  ;;  %1441 = vtanh.f32 %v778_v2 }
 0x11c   : > { %v653_v7 = vpop.f32.mrb[11].mxu0  ;;  %v781_v8 = vpop.f32.mrb[11].mxu1  ;;  %943 = vst [vmem:[%s1673_s30 + $0x30] sm:$0xff] %v1420_v6  ;;  %1443 = vtanh.f32 %v1254_v4 }
 0x11d   : > { %v1422_v9 = vpop.eup %1421  ;;  %1445 = vtanh.f32 %v1286_v5 }
 0x11e   : > { %v1424_v10 = vpop.eup %1423  ;;  %975 = vst [vmem:[%s1673_s30 + $0x130] sm:$0xff] %v1422_v9  ;;  %1447 = vtanh.f32 %v653_v7 }
 0x11f   : > { %v1426_v11 = vpop.eup %1425  ;;  %941 = vst [vmem:[%s1673_s30 + $0x20] sm:$0xff] %v1424_v10  ;;  %1449 = vtanh.f32 %v781_v8  ;;  %v1257_v14 = vpop.f32.mrb[12].mxu0 }
 0x120   : > { %v1428_v12 = vpop.eup %1427  ;;  %973 = vst [vmem:[%s1673_s30 + $0x120] sm:$0xff] %v1426_v11  ;;  %v1289_v15 = vpop.f32.mrb[12].mxu1  ;;  %1451 = vtanh.f32 %v1257_v14 }
 0x121   : > { %v1430_v13 = vpop.eup %1429  ;;  %944 = vst [vmem:[%s1673_s30 + $0x38] sm:$0xff] %v1428_v12  ;;  %v666_v17 = vpop.f32.mrb[13].mxu0  ;;  %1453 = vtanh.f32 %v1289_v15 }
 0x122   : > { %v1432_v16 = vpop.eup %1431  ;;  %976 = vst [vmem:[%s1673_s30 + $0x138] sm:$0xff] %v1430_v13  ;;  %v794_v18 = vpop.f32.mrb[13].mxu1  ;;  %1455 = vtanh.f32 %v666_v17 }
 0x123   : > { %v1434_v19 = vpop.eup %1433  ;;  %942 = vst [vmem:[%s1673_s30 + $0x28] sm:$0xff] %v1432_v16  ;;  %v1258_v20 = vpop.f32.mrb[14].mxu0  ;;  %1457 = vtanh.f32 %v794_v18 }
 0x124   : > { %v1290_v21 = vpop.f32.mrb[14].mxu1  ;;  %v1436_v22 = vpop.eup %1435  ;;  %974 = vst [vmem:[%s1673_s30 + $0x128] sm:$0xff] %v1434_v19  ;;  %1459 = vtanh.f32 %v1258_v20 }
 0x125   : > { %v669_v23 = vpop.f32.mrb[15].mxu0  ;;  %v797_v24 = vpop.f32.mrb[15].mxu1  ;;  %947 = vst [vmem:[%s1673_s30 + $0x50] sm:$0xff] %v1436_v22  ;;  %1461 = vtanh.f32 %v1290_v21 }
 0x126   : > { %v1438_v25 = vpop.eup %1437  ;;  %1463 = vtanh.f32 %v669_v23 }
 0x127   : > { %v1440_v26 = vpop.eup %1439  ;;  %979 = vst [vmem:[%s1673_s30 + $0x150] sm:$0xff] %v1438_v25  ;;  %1465 = vtanh.f32 %v797_v24  ;;  %v1261_v30 = vpop.f32.mrb[16].mxu0 }
 0x128   : > { %v1442_v27 = vpop.eup %1441  ;;  %945 = vst [vmem:[%s1673_s30 + $0x40] sm:$0xff] %v1440_v26  ;;  %v1293_v31 = vpop.f32.mrb[16].mxu1  ;;  %1467 = vtanh.f32 %v1261_v30 }
 0x129   : > { %v1444_v28 = vpop.eup %1443  ;;  %977 = vst [vmem:[%s1673_s30 + $0x140] sm:$0xff] %v1442_v27  ;;  %v682_v33 = vpop.f32.mrb[17].mxu0  ;;  %1469 = vtanh.f32 %v1293_v31 }
 0x12a   : > { %v1446_v29 = vpop.eup %1445  ;;  %948 = vst [vmem:[%s1673_s30 + $0x58] sm:$0xff] %v1444_v28  ;;  %v810_v34 = vpop.f32.mrb[17].mxu1  ;;  %1471 = vtanh.f32 %v682_v33 }
 0x12b   : > { %v1448_v32 = vpop.eup %1447  ;;  %980 = vst [vmem:[%s1673_s30 + $0x158] sm:$0xff] %v1446_v29  ;;  %v1262_v36 = vpop.f32.mrb[18].mxu0  ;;  %1473 = vtanh.f32 %v810_v34 }
 0x12c   : > { %v1450_v35 = vpop.eup %1449  ;;  %946 = vst [vmem:[%s1673_s30 + $0x48] sm:$0xff] %v1448_v32  ;;  %v1294_v37 = vpop.f32.mrb[18].mxu1  ;;  %1475 = vtanh.f32 %v1262_v36 }
 0x12d   : > { %v1452_v38 = vpop.eup %1451  ;;  %978 = vst [vmem:[%s1673_s30 + $0x148] sm:$0xff] %v1450_v35  ;;  %v685_v39 = vpop.f32.mrb[19].mxu0  ;;  %1477 = vtanh.f32 %v1294_v37 }
 0x12e   : > { %v813_v40 = vpop.f32.mrb[19].mxu1  ;;  %v1454_v41 = vpop.eup %1453  ;;  %951 = vst [vmem:[%s1673_s30 + $0x70] sm:$0xff] %v1452_v38  ;;  %1479 = vtanh.f32 %v685_v39 }
 0x12f   : > { %v1456_v42 = vpop.eup %1455  ;;  %983 = vst [vmem:[%s1673_s30 + $0x170] sm:$0xff] %v1454_v41  ;;  %1481 = vtanh.f32 %v813_v40  ;;  %v1265_v46 = vpop.f32.mrb[20].mxu0 }
 0x130   : > { %v1458_v43 = vpop.eup %1457  ;;  %949 = vst [vmem:[%s1673_s30 + $0x60] sm:$0xff] %v1456_v42  ;;  %v1297_v47 = vpop.f32.mrb[20].mxu1  ;;  %1483 = vtanh.f32 %v1265_v46 }
 0x131   : > { %v1460_v44 = vpop.eup %1459  ;;  %981 = vst [vmem:[%s1673_s30 + $0x160] sm:$0xff] %v1458_v43  ;;  %v698_v49 = vpop.f32.mrb[21].mxu0  ;;  %1485 = vtanh.f32 %v1297_v47 }
 0x132   : > { %v1462_v45 = vpop.eup %1461  ;;  %952 = vst [vmem:[%s1673_s30 + $0x78] sm:$0xff] %v1460_v44  ;;  %v826_v50 = vpop.f32.mrb[21].mxu1  ;;  %1487 = vtanh.f32 %v698_v49 }
 0x133   : > { %v1464_v48 = vpop.eup %1463  ;;  %984 = vst [vmem:[%s1673_s30 + $0x178] sm:$0xff] %v1462_v45  ;;  %v1266_v52 = vpop.f32.mrb[22].mxu0  ;;  %1489 = vtanh.f32 %v826_v50 }
 0x134   : > { %v1466_v51 = vpop.eup %1465  ;;  %950 = vst [vmem:[%s1673_s30 + $0x68] sm:$0xff] %v1464_v48  ;;  %v1298_v53 = vpop.f32.mrb[22].mxu1  ;;  %1491 = vtanh.f32 %v1266_v52 }
 0x135   : > { %v1468_v54 = vpop.eup %1467  ;;  %982 = vst [vmem:[%s1673_s30 + $0x168] sm:$0xff] %v1466_v51  ;;  %v701_v55 = vpop.f32.mrb[23].mxu0  ;;  %1493 = vtanh.f32 %v1298_v53 }
 0x136   : > { %v829_v56 = vpop.f32.mrb[23].mxu1  ;;  %v1470_v57 = vpop.eup %1469  ;;  %955 = vst [vmem:[%s1673_s30 + $0x90] sm:$0xff] %v1468_v54  ;;  %1495 = vtanh.f32 %v701_v55 }
 0x137   : > { %v1472_v58 = vpop.eup %1471  ;;  %987 = vst [vmem:[%s1673_s30 + $0x190] sm:$0xff] %v1470_v57  ;;  %1497 = vtanh.f32 %v829_v56  ;;  %v1269_v62 = vpop.f32.mrb[24].mxu0 }
 0x138   : > { %v1474_v59 = vpop.eup %1473  ;;  %953 = vst [vmem:[%s1673_s30 + $0x80] sm:$0xff] %v1472_v58  ;;  %v1301_v63 = vpop.f32.mrb[24].mxu1  ;;  %1499 = vtanh.f32 %v1269_v62 }
 0x139   : > { %v1476_v60 = vpop.eup %1475  ;;  %985 = vst [vmem:[%s1673_s30 + $0x180] sm:$0xff] %v1474_v59  ;;  %v714_v1 = vpop.f32.mrb[25].mxu0  ;;  %1501 = vtanh.f32 %v1301_v63 }
 0x13a   : > { %v1478_v61 = vpop.eup %1477  ;;  %956 = vst [vmem:[%s1673_s30 + $0x98] sm:$0xff] %v1476_v60  ;;  %v842_v2 = vpop.f32.mrb[25].mxu1  ;;  %1503 = vtanh.f32 %v714_v1 }
 0x13b   : > { %v1480_v0 = vpop.eup %1479  ;;  %988 = vst [vmem:[%s1673_s30 + $0x198] sm:$0xff] %v1478_v61  ;;  %v1270_v4 = vpop.f32.mrb[26].mxu0  ;;  %1505 = vtanh.f32 %v842_v2 }
 0x13c   : > { %v1482_v3 = vpop.eup %1481  ;;  %954 = vst [vmem:[%s1673_s30 + $0x88] sm:$0xff] %v1480_v0  ;;  %v1302_v5 = vpop.f32.mrb[26].mxu1  ;;  %1507 = vtanh.f32 %v1270_v4 }
 0x13d   : > { %v1484_v6 = vpop.eup %1483  ;;  %986 = vst [vmem:[%s1673_s30 + $0x188] sm:$0xff] %v1482_v3  ;;  %v717_v7 = vpop.f32.mrb[27].mxu0  ;;  %1509 = vtanh.f32 %v1302_v5 }
 0x13e   : > { %v845_v8 = vpop.f32.mrb[27].mxu1  ;;  %v1486_v9 = vpop.eup %1485  ;;  %959 = vst [vmem:[%s1673_s30 + $0xb0] sm:$0xff] %v1484_v6  ;;  %1511 = vtanh.f32 %v717_v7 }
 0x13f   : > { %v1488_v10 = vpop.eup %1487  ;;  %991 = vst [vmem:[%s1673_s30 + $0x1b0] sm:$0xff] %v1486_v9  ;;  %1513 = vtanh.f32 %v845_v8  ;;  %v1273_v14 = vpop.f32.mrb[28].mxu0 }
 0x140   : > { %v1490_v11 = vpop.eup %1489  ;;  %957 = vst [vmem:[%s1673_s30 + $0xa0] sm:$0xff] %v1488_v10  ;;  %v1305_v15 = vpop.f32.mrb[28].mxu1  ;;  %1515 = vtanh.f32 %v1273_v14 }
 0x141   : > { %v1492_v12 = vpop.eup %1491  ;;  %989 = vst [vmem:[%s1673_s30 + $0x1a0] sm:$0xff] %v1490_v11  ;;  %v730_v17 = vpop.f32.mrb[29].mxu0  ;;  %1517 = vtanh.f32 %v1305_v15 }
 0x142   : > { %v1494_v13 = vpop.eup %1493  ;;  %960 = vst [vmem:[%s1673_s30 + $0xb8] sm:$0xff] %v1492_v12  ;;  %v858_v18 = vpop.f32.mrb[29].mxu1  ;;  %1519 = vtanh.f32 %v730_v17 }
 0x143   : > { %v1496_v16 = vpop.eup %1495  ;;  %992 = vst [vmem:[%s1673_s30 + $0x1b8] sm:$0xff] %v1494_v13  ;;  %v1274_v20 = vpop.f32.mrb[30].mxu0  ;;  %1521 = vtanh.f32 %v858_v18 }
 0x144   : > { %v1498_v19 = vpop.eup %1497  ;;  %958 = vst [vmem:[%s1673_s30 + $0xa8] sm:$0xff] %v1496_v16  ;;  %v1306_v21 = vpop.f32.mrb[30].mxu1  ;;  %1523 = vtanh.f32 %v1274_v20 }
 0x145   : > { %v1500_v22 = vpop.eup %1499  ;;  %990 = vst [vmem:[%s1673_s30 + $0x1a8] sm:$0xff] %v1498_v19  ;;  %v733_v23 = vpop.f32.mrb[31].mxu0  ;;  %1525 = vtanh.f32 %v1306_v21 }
 0x146   : > { %v861_v24 = vpop.f32.mrb[31].mxu1  ;;  %v1502_v25 = vpop.eup %1501  ;;  %963 = vst [vmem:[%s1673_s30 + $0xd0] sm:$0xff] %v1500_v22  ;;  %1527 = vtanh.f32 %v733_v23 }
 0x147   : > { %v1504_v26 = vpop.eup %1503  ;;  %995 = vst [vmem:[%s1673_s30 + $0x1d0] sm:$0xff] %v1502_v25  ;;  %1529 = vtanh.f32 %v861_v24 }
 0x148   : > { %v1506_v27 = vpop.eup %1505  ;;  %961 = vst [vmem:[%s1673_s30 + $0xc0] sm:$0xff] %v1504_v26 }
 0x149   : > { %v1508_v28 = vpop.eup %1507  ;;  %993 = vst [vmem:[%s1673_s30 + $0x1c0] sm:$0xff] %v1506_v27 }
 0x14a   : > { %v1510_v29 = vpop.eup %1509  ;;  %964 = vst [vmem:[%s1673_s30 + $0xd8] sm:$0xff] %v1508_v28 }
 0x14b   : > { %v1512_v30 = vpop.eup %1511  ;;  %996 = vst [vmem:[%s1673_s30 + $0x1d8] sm:$0xff] %v1510_v29 }
 0x14c   : > { %v1514_v31 = vpop.eup %1513  ;;  %962 = vst [vmem:[%s1673_s30 + $0xc8] sm:$0xff] %v1512_v30 }
 0x14d   : > { %v1516_v32 = vpop.eup %1515  ;;  %994 = vst [vmem:[%s1673_s30 + $0x1c8] sm:$0xff] %v1514_v31 }
 0x14e   : > { %v1518_v33 = vpop.eup %1517  ;;  %967 = vst [vmem:[%s1673_s30 + $0xf0] sm:$0xff] %v1516_v32 }
 0x14f   : > { %v1520_v34 = vpop.eup %1519  ;;  %999 = vst [vmem:[%s1673_s30 + $0x1f0] sm:$0xff] %v1518_v33 }
 0x150   : > { %v1522_v35 = vpop.eup %1521  ;;  %965 = vst [vmem:[%s1673_s30 + $0xe0] sm:$0xff] %v1520_v34 }
 0x151   : > { %v1524_v36 = vpop.eup %1523  ;;  %997 = vst [vmem:[%s1673_s30 + $0x1e0] sm:$0xff] %v1522_v35 }
 0x152   : > { %v1526_v37 = vpop.eup %1525  ;;  %968 = vst [vmem:[%s1673_s30 + $0xf8] sm:$0xff] %v1524_v36 }
 0x153   : > { %v1528_v38 = vpop.eup %1527  ;;  %1000 = vst [vmem:[%s1673_s30 + $0x1f8] sm:$0xff] %v1526_v37 }
 0x154   : > { %v1530_v39 = vpop.eup %1529  ;;  %966 = vst [vmem:[%s1673_s30 + $0xe8] sm:$0xff] %v1528_v38 }
 0x155   : > { %998 = vst [vmem:[%s1673_s30 + $0x1e8] sm:$0xff] %v1530_v39 }
 0x156 PF: > { %s12_s13 = sadd.s32 1, %s1569_s13   ;;  %s1757_s9 = smov %s1561_s11 }
 0x157   : > { %p9_p7 = scmp.ge.s32.totalorder %s12_s13, 18   ;;  %s1758_s10 = smov %s1565_s12 }
 0x158   : > { %s1759_s11 = smov %s1762_s14  ;;  %s1760_s12 = smov %s1766_s15 }
 0x159   :  { %11 = sbr.rel (!%p9_p7) target bundleno = 3 (0x3), region = 61 }

</bundles_post_ra>
